<compile_context>
chip_gen: v5e
topology: v5e:2x2
jax: 0.10.0
libtpu: 0.0.40
codegen_flags: <defaults>
</compile_context>

<pallas_src>
import functools

import jax
import jax.numpy as jnp
from jax.experimental import pallas as pl
from jax.experimental.pallas import tpu as pltpu

FEATURES = 64   # DnCNN hidden width
CIN_PAD = 8     # pad the 3 input channels to 8 for the layer-0 im2col


def _round_up(a, b):
    return (a + b - 1) // b * b


def _compute_dtype():
    # bf16 MXU operands on real TPUs; f32 elsewhere (CPU interpret backends have
    # no bf16 x bf16 -> f32 dot).
    return jnp.bfloat16 if jax.default_backend() == "tpu" else jnp.float32


def _vmem_limit_bytes():
    # Generation-aware: ~62% of physical VMEM => ~40 MiB on v7x (64 MiB),
    # 80 MiB on v5e/v6e (128 MiB), leaving headroom for double-buffered I/O
    # blocks, weights and compiler temporaries.
    try:
        cap = pltpu.get_tpu_info().vmem_capacity_bytes
    except Exception:
        cap = 128 * 1024 * 1024
    return min((cap * 5) // 8, 96 * 1024 * 1024)


# ----------------------------------------------------------------------------
# Fused kernel: all 17 conv layers for one batch item (channels-first layout)
# ----------------------------------------------------------------------------
def _genclean_fused_kernel(x_ref, w0_ref, b0_ref, wm_ref, bm_ref, wl_ref, bl_ref,
                           mask_ref, o_ref, act_ref, *, Wp, SM, NS, G):
    """
    x_ref   : (1, CP, Wtot)  cdtype  guarded, flattened, zero-halo'd input frame:
                                     [G guard | Hp*Wp frame | strip pad | G guard]
    w0_ref  : (F, 9*CP)      cdtype  layer-0 3x3 weight, K order = (tap, cin)
    b0_ref  : (F, 1)         f32
    wm_ref  : (L, F, 9*F)    cdtype  15 middle 3x3 weights
    bm_ref  : (L, F, 1)      f32
    wl_ref  : (C, F)         cdtype  final 1x1 weight
    bl_ref  : (C, 1)         f32
    mask_ref: (1, Mp_r)      f32     1.0 on interior pixels, 0.0 on halo ring / pad
    o_ref   : (1, C, Mp_r)   f32     channels-first flat output (lane-dense)
    act_ref : (2, F, Wtot)   cdtype  ping-pong activation frames (VMEM scratch)

    Static: Wp = W+2, SM = lanes per strip (mult of 128), NS = #strips,
            G = guard lanes (>= Wp+1, mult of 128).
    """
    F = wm_ref.shape[1]
    n_mid = wm_ref.shape[0]
    cdtype = act_ref.dtype
    Wtot = act_ref.shape[2]
    halo = Wp + 1
    EXT = SM + 2 * halo
    # Flat tap offsets of the 3x3 window, (ky, kx) row-major -> matches weight pack.
    offs = [(ky - 1) * Wp + (kx - 1) for ky in range(3) for kx in range(3)]

    # Zero only the tiny guard bands (ring correctness comes from the where-mask
    # below); all frame stores are full-width and aligned, never masked.
    act_ref[:, :, 0:G] = jnp.zeros((2, F, G), cdtype)
    act_ref[:, :, Wtot - G:Wtot] = jnp.zeros((2, F, G), cdtype)

    def conv3x3_strip(ext, w, b, p0):
        # ext: (Fin, EXT) activations covering flat positions [p0-halo, p0+SM+halo)
        taps = [ext[:, halo + d: halo + d + SM] for d in offs]
        col_t = jnp.concatenate(taps, axis=0)                           # (9*Fin, SM)
        acc = jnp.dot(w, col_t, preferred_element_type=jnp.float32)     # (F, SM) f32
        acc = jnp.maximum(acc + b, 0.0)
        # Force the 1-px halo ring / strip pad to exact zero so the next layer
        # sees SAME-padding zeros (where-select also drops any guard garbage).
        m = mask_ref[:, pl.ds(p0, SM)]
        return jnp.where(m > 0.5, acc, 0.0).astype(cdtype)

    # ---- layer 0: Conv3x3(channels -> F) + ReLU, input -> act[0] --------------
    def layer0_strip(s, carry):
        p0 = s * SM
        ext = x_ref[0, :, pl.ds(G + p0 - halo, EXT)]                    # (CP, EXT)
        act_ref[0, :, pl.ds(G + p0, SM)] = conv3x3_strip(
            ext, w0_ref[...], b0_ref[...], p0)
        return carry

    jax.lax.fori_loop(0, NS, layer0_strip, 0)

    # ---- 15 middle layers: Conv3x3(F -> F) + ReLU, ping-pong act buffers ------
    def mid_layer(l, carry):
        src = jax.lax.rem(l, 2)
        dst = 1 - src
        w = wm_ref[l]                                                   # (F, 9F)
        b = bm_ref[l]                                                   # (F, 1)

        def strip(s, c2):
            p0 = s * SM
            ext = act_ref[src, :, pl.ds(G + p0 - halo, EXT)]            # (F, EXT)
            act_ref[dst, :, pl.ds(G + p0, SM)] = conv3x3_strip(ext, w, b, p0)
            return c2

        jax.lax.fori_loop(0, NS, strip, 0)
        return carry

    jax.lax.fori_loop(0, n_mid, mid_layer, 0)

    # ---- final layer: Conv1x1(F -> C), no activation; lane-dense output -------
    fbuf = n_mid % 2   # static: buffer holding the last activation

    def last_strip(s, carry):
        p0 = s * SM
        a = act_ref[fbuf, :, pl.ds(G + p0, SM)]                         # (F, SM)
        y = jnp.dot(wl_ref[...], a, preferred_element_type=jnp.float32) + bl_ref[...]
        o_ref[0, :, pl.ds(p0, SM)] = y.astype(o_ref.dtype)              # (C, SM)
        return carry

    jax.lax.fori_loop(0, NS, last_strip, 0)


# ----------------------------------------------------------------------------
# Wrapper
# ----------------------------------------------------------------------------
def _plan_strips(H, W, target_lanes=2048):
    Hp, Wp = H + 2, W + 2
    Mp = Hp * Wp                                       # flat padded-frame size
    SM = min(_round_up(Mp, 128), _round_up(target_lanes, 128))
    NS = pl.cdiv(Mp, SM)
    Mp_r = NS * SM                                     # rounded to whole strips
    G = _round_up(Wp + 1, 128)                         # guard so halo reads stay in-bounds
    return Hp, Wp, Mp, SM, NS, Mp_r, G


def genclean_forward(x_nchw, packed):
    """x_nchw: (N, C, H, W) f32 -> (N, C, H, W) f32, matching GenClean.forward."""
    N, C, H, W = x_nchw.shape
    F = packed["wm"].shape[1]
    L = packed["wm"].shape[0]
    CP = packed["cin_pad"]
    cdtype = packed["w0"].dtype

    Hp, Wp, Mp, SM, NS, Mp_r, G = _plan_strips(H, W)
    Wtot = G + Mp_r + G

    # Channels-first in, channels-first out: no NCHW<->NHWC transpose anywhere.
    # Cast BEFORE padding so the pre-pass moves half the bytes when bf16 is used.
    x = x_nchw.astype(cdtype)
    x = jnp.pad(x, ((0, 0), (0, CP - C), (1, 1), (1, 1)))     # channel + 1-px halo pad
    x = x.reshape(N, CP, Mp)
    x = jnp.pad(x, ((0, 0), (0, 0), (G, (Mp_r - Mp) + G)))    # guards + strip-round pad

    # Interior mask over the flat padded frame (1 = real pixel, 0 = ring / pad).
    p = jnp.arange(Mp_r, dtype=jnp.int32)
    row, col = p // Wp, p % Wp
    interior = (p < Mp) & (row >= 1) & (row <= Hp - 2) & (col >= 1) & (col <= Wp - 2)
    mask = interior.astype(jnp.float32)[None, :]

    kernel = functools.partial(_genclean_fused_kernel, Wp=Wp, SM=SM, NS=NS, G=G)

    out_flat = pl.pallas_call(
        kernel,
        out_shape=jax.ShapeDtypeStruct((N, C, Mp_r), jnp.float32),
        grid=(N,),
        in_specs=[
            pl.BlockSpec((1, CP, Wtot), lambda n: (n, 0, 0)),
            pl.BlockSpec((F, 9 * CP), lambda n: (0, 0)),
            pl.BlockSpec((F, 1), lambda n: (0, 0)),
            pl.BlockSpec((L, F, 9 * F), lambda n: (0, 0, 0)),
            pl.BlockSpec((L, F, 1), lambda n: (0, 0, 0)),
            pl.BlockSpec((C, F), lambda n: (0, 0)),
            pl.BlockSpec((C, 1), lambda n: (0, 0)),
            pl.BlockSpec((1, Mp_r), lambda n: (0, 0)),
        ],
        out_specs=pl.BlockSpec((1, C, Mp_r), lambda n: (n, 0, 0)),
        scratch_shapes=[pltpu.VMEM((2, F, Wtot), cdtype)],
        compiler_params=pltpu.CompilerParams(
            dimension_semantics=("parallel",),
            vmem_limit_bytes=_vmem_limit_bytes()),
    )(x, packed["w0"], packed["b0"], packed["wm"], packed["bm"],
      packed["wl"], packed["bl"], mask)

    # Drop the strip-rounding pad and the 1-px halo ring.
    out = out_flat[:, :, :Mp].reshape(N, C, Hp, Wp)[:, :, 1:Hp - 1, 1:Wp - 1]
    return out


# ----------------------------------------------------------------------------
# Parameter construction (mirrors GenClean.__init__) + kernel-layout packing
# ----------------------------------------------------------------------------
def _xavier_uniform(key, shape, fan_in, fan_out):
    bound = (6.0 / (fan_in + fan_out)) ** 0.5
    return jax.random.uniform(key, shape, jnp.float32, -bound, bound)


def init_genclean_params(key, channels=3, num_of_layers=17, features=64):
    """Xavier-uniform weights, zero biases; 3x3 convs stored HWIO (kH, kW, Cin, Cout)."""
    assert num_of_layers >= 3
    keys = jax.random.split(key, num_of_layers)
    k = 3
    w_first = _xavier_uniform(keys[0], (k, k, channels, features),
                              fan_in=channels * k * k, fan_out=features * k * k)
    w_mid = [_xavier_uniform(keys[1 + i], (k, k, features, features),
                             fan_in=features * k * k, fan_out=features * k * k)
             for i in range(num_of_layers - 2)]
    w_last = _xavier_uniform(keys[-1], (features, channels),
                             fan_in=features, fan_out=channels)
    return {
        "w_first": w_first, "b_first": jnp.zeros((features,), jnp.float32),
        "w_mid": w_mid, "b_mid": [jnp.zeros((features,), jnp.float32)] * (num_of_layers - 2),
        "w_last": w_last, "b_last": jnp.zeros((channels,), jnp.float32),
        "channels": channels, "features": features,
    }


def pack_params(params, cdtype, cin_pad=CIN_PAD):
    """Kernel layout: (F_out, 9*F_in) im2col^T weights (tap-major, cin-minor)."""
    C, F = params["channels"], params["features"]
    CP = max(cin_pad, C)

    def pack3x3(w_hwio, cin_total):
        cin = w_hwio.shape[2]
        w = jnp.pad(w_hwio, ((0, 0), (0, 0), (0, cin_total - cin), (0, 0)))
        # (3,3,cin,F) -> (F, ky, kx, cin) -> (F, 9*cin): K index = tap*cin + c
        return jnp.transpose(w, (3, 0, 1, 2)).reshape(F, 9 * cin_total).astype(cdtype)

    w0 = pack3x3(params["w_first"], CP)
    wm = jnp.stack([pack3x3(w, F) for w in params["w_mid"]])
    b0 = params["b_first"].reshape(F, 1).astype(jnp.float32)
    bm = jnp.stack([b.reshape(F, 1) for b in params["b_mid"]]).astype(jnp.float32)
    wl = jnp.transpose(params["w_last"]).astype(cdtype)            # (C, F)
    bl = params["b_last"].reshape(C, 1).astype(jnp.float32)
    return {"w0": w0, "b0": b0, "wm": wm, "bm": bm, "wl": wl, "bl": bl, "cin_pad": CP}


# ----------------------------------------------------------------------------
# Pure-JAX reference (same semantics as the PyTorch module), for validation
# ----------------------------------------------------------------------------
def genclean_reference(x_nchw, params):
    def conv(x, w_hwio, b):
        y = jax.lax.conv_general_dilated(
            x, w_hwio, window_strides=(1, 1), padding="SAME",
            dimension_numbers=("NCHW", "HWIO", "NCHW"))
        return y + b.reshape(1, -1, 1, 1)

    x = x_nchw.astype(jnp.float32)
    x = jax.nn.relu(conv(x, params["w_first"], params["b_first"]))
    for w, b in zip(params["w_mid"], params["b_mid"]):
        x = jax.nn.relu(conv(x, w, b))
    wl = params["w_last"][None, None]                              # (1,1,F,C) HWIO
    return conv(x, wl, params["b_last"])


if __name__ == "__main__":
    key = jax.random.PRNGKey(0)
    k_param, k_input = jax.random.split(key)

    channels, num_of_layers = 3, 17
    cdtype = _compute_dtype()
    params = init_genclean_params(k_param, channels=channels,
                                  num_of_layers=num_of_layers, features=FEATURES)
    packed = pack_params(params, cdtype)

    # small deterministic NCHW input, as the PyTorch module consumes
    x = jax.random.normal(k_input, (2, channels, 16, 16), jnp.float32)

    fwd = jax.jit(lambda xx: genclean_forward(xx, packed))
    out = jax.block_until_ready(fwd(x))

    assert out.shape == (2, channels, 16, 16)
    assert bool(jnp.all(jnp.isfinite(out)))

    # validate vs. pure-JAX reference (tolerance depends on the compute dtype)
    ref = genclean_reference(x, params)
    tol = 0.15 if cdtype == jnp.bfloat16 else 2e-3
    rel_err = float(jnp.max(jnp.abs(out - ref)) / (jnp.max(jnp.abs(ref)) + 1e-8))
    assert rel_err < tol, f"kernel/reference mismatch: rel-to-max err = {rel_err}"

    print("KERNEL_OK")
</pallas_src>

<mosaic_0001>
module attributes {stable_mosaic.version = 11 : i64} {
  func.func @_genclean_fused_kernel(%arg0: i32, %arg1: memref<1x8x640xf32, #tpu.memory_space<vmem>>, %arg2: memref<64x72xf32, #tpu.memory_space<vmem>>, %arg3: memref<64x1xf32, #tpu.memory_space<vmem>>, %arg4: memref<15x64x576xf32, #tpu.memory_space<vmem>>, %arg5: memref<15x64x1xf32, #tpu.memory_space<vmem>>, %arg6: memref<3x64xf32, #tpu.memory_space<vmem>>, %arg7: memref<3x1xf32, #tpu.memory_space<vmem>>, %arg8: memref<1x384xf32, #tpu.memory_space<vmem>>, %arg9: memref<1x3x384xf32, #tpu.memory_space<vmem>>, %arg10: memref<2x64x640xf32, #tpu.memory_space<vmem>>) attributes {dimension_semantics = [#tpu.dimension_semantics<parallel>], iteration_bounds = array<i64: 2>, scalar_prefetch = 0 : i64, scratch_operands = 1 : i64, tpu.core_type = #tpu.core_type<tc>, window_params = [{transform_indices = @transform_0, window_bounds = array<i64: 1, 8, 640>}, {pipeline_mode = #tpu.pipeline_mode<synchronous>, transform_indices = @transform_1, window_bounds = array<i64: 64, 72>}, {pipeline_mode = #tpu.pipeline_mode<synchronous>, transform_indices = @transform_2, window_bounds = array<i64: 64, 1>}, {pipeline_mode = #tpu.pipeline_mode<synchronous>, transform_indices = @transform_3, window_bounds = array<i64: 15, 64, 576>}, {pipeline_mode = #tpu.pipeline_mode<synchronous>, transform_indices = @transform_4, window_bounds = array<i64: 15, 64, 1>}, {pipeline_mode = #tpu.pipeline_mode<synchronous>, transform_indices = @transform_5, window_bounds = array<i64: 3, 64>}, {pipeline_mode = #tpu.pipeline_mode<synchronous>, transform_indices = @transform_6, window_bounds = array<i64: 3, 1>}, {pipeline_mode = #tpu.pipeline_mode<synchronous>, transform_indices = @transform_7, window_bounds = array<i64: 1, 384>}, {transform_indices = @transform_8, window_bounds = array<i64: 1, 3, 384>}]} {
    %cst = arith.constant 0.000000e+00 : f32
    %0 = vector.broadcast %cst : f32 to vector<2x64x128xf32>
    %c0 = arith.constant 0 : index
    %c0_0 = arith.constant 0 : index
    %c0_1 = arith.constant 0 : index
    %1 = vector.load %arg10[%c0, %c0_0, %c0_1] : memref<2x64x640xf32, #tpu.memory_space<vmem>>, vector<2x64x128xf32>
    tpu.vector_store %arg10[%c0, %c0_0, %c0_1], %0 {strides = array<i32>} : memref<2x64x640xf32, #tpu.memory_space<vmem>>, vector<2x64x128xf32>,
    %cst_2 = arith.constant 0.000000e+00 : f32
    %2 = vector.broadcast %cst_2 : f32 to vector<2x64x128xf32>
    %c0_3 = arith.constant 0 : index
    %c0_4 = arith.constant 0 : index
    %c512 = arith.constant 512 : index
    %3 = vector.load %arg10[%c0_3, %c0_4, %c512] : memref<2x64x640xf32, #tpu.memory_space<vmem>>, vector<2x64x128xf32>
    tpu.vector_store %arg10[%c0_3, %c0_4, %c512], %2 {strides = array<i32>} : memref<2x64x640xf32, #tpu.memory_space<vmem>>, vector<2x64x128xf32>,
    %c0_i32 = arith.constant 0 : i32
    %c384_i32 = arith.constant 384 : i32
    %4 = arith.muli %c0_i32, %c384_i32 : i32
    %c128_i32 = arith.constant 128 : i32
    %5 = arith.addi %c128_i32, %4 : i32
    %c19_i32 = arith.constant 19 : i32
    %6 = arith.subi %5, %c19_i32 : i32
    %c0_5 = arith.constant 0 : index
    %c0_6 = arith.constant 0 : index
    %7 = arith.index_cast %6 : i32 to index
    %8 = vector.load %arg1[%c0_5, %c0_6, %7] : memref<1x8x640xf32, #tpu.memory_space<vmem>>, vector<1x8x422xf32>
    %9 = vector.shape_cast %8 : vector<1x8x422xf32> to vector<8x422xf32>
    %c0_7 = arith.constant 0 : index
    %c0_8 = arith.constant 0 : index
    %10 = vector.load %arg2[%c0_7, %c0_8] : memref<64x72xf32, #tpu.memory_space<vmem>>, vector<64x72xf32>
    %c0_9 = arith.constant 0 : index
    %c0_10 = arith.constant 0 : index
    %11 = vector.load %arg3[%c0_9, %c0_10] : memref<64x1xf32, #tpu.memory_space<vmem>>, vector<64x1xf32>
    %12 = vector.extract_strided_slice %9 {offsets = [0, 0], sizes = [8, 384], strides = [1, 1]} : vector<8x422xf32> to vector<8x384xf32>
    %13 = vector.extract_strided_slice %9 {offsets = [0, 1], sizes = [8, 384], strides = [1, 1]} : vector<8x422xf32> to vector<8x384xf32>
    %14 = vector.extract_strided_slice %9 {offsets = [0, 2], sizes = [8, 384], strides = [1, 1]} : vector<8x422xf32> to vector<8x384xf32>
    %15 = vector.extract_strided_slice %9 {offsets = [0, 18], sizes = [8, 384], strides = [1, 1]} : vector<8x422xf32> to vector<8x384xf32>
    %16 = vector.extract_strided_slice %9 {offsets = [0, 19], sizes = [8, 384], strides = [1, 1]} : vector<8x422xf32> to vector<8x384xf32>
    %17 = vector.extract_strided_slice %9 {offsets = [0, 20], sizes = [8, 384], strides = [1, 1]} : vector<8x422xf32> to vector<8x384xf32>
    %18 = vector.extract_strided_slice %9 {offsets = [0, 36], sizes = [8, 384], strides = [1, 1]} : vector<8x422xf32> to vector<8x384xf32>
    %19 = vector.extract_strided_slice %9 {offsets = [0, 37], sizes = [8, 384], strides = [1, 1]} : vector<8x422xf32> to vector<8x384xf32>
    %20 = vector.extract_strided_slice %9 {offsets = [0, 38], sizes = [8, 384], strides = [1, 1]} : vector<8x422xf32> to vector<8x384xf32>
    %21 = tpu.concatenate %12, %13, %14, %15, %16, %17, %18, %19, %20 in 0 : vector<8x384xf32>, vector<8x384xf32>, vector<8x384xf32>, vector<8x384xf32>, vector<8x384xf32>, vector<8x384xf32>, vector<8x384xf32>, vector<8x384xf32>, vector<8x384xf32> -> vector<72x384xf32>
    %cst_11 = arith.constant dense<0.000000e+00> : vector<64x384xf32>
    %22 = tpu.matmul %10, %21, %cst_11 {dimension_numbers = #tpu.dot_dimension_numbers<[1], [0], [0], [1], [0, 0, 1, 1], [], []>} : vector<64x72xf32>, vector<72x384xf32>, vector<64x384xf32> -> vector<64x384xf32>
    %23 = vector.broadcast %11 : vector<64x1xf32> to vector<64x384xf32>
    %24 = arith.addf %22, %23 : vector<64x384xf32>
    %cst_12 = arith.constant 0.000000e+00 : f32
    %25 = vector.broadcast %cst_12 : f32 to vector<64x384xf32>
    %26 = arith.maximumf %24, %25 : vector<64x384xf32>
    %c0_13 = arith.constant 0 : index
    %27 = arith.index_cast %4 : i32 to index
    %28 = vector.load %arg8[%c0_13, %27] : memref<1x384xf32, #tpu.memory_space<vmem>>, vector<1x384xf32>
    %cst_14 = arith.constant 5.000000e-01 : f32
    %29 = vector.broadcast %cst_14 : f32 to vector<1x384xf32>
    %30 = arith.cmpf ogt, %28, %29 : vector<1x384xf32>
    %cst_15 = arith.constant 0.000000e+00 : f32
    %31 = vector.shape_cast %30 : vector<1x384xi1> to vector<1x384xi1>
    %32 = vector.broadcast %31 : vector<1x384xi1> to vector<64x384xi1>
    %33 = vector.broadcast %cst_15 : f32 to vector<64x384xf32>
    %34 = arith.select %32, %26, %33 : vector<64x384xi1>, vector<64x384xf32>
    %c128_i32_16 = arith.constant 128 : i32
    %35 = arith.addi %c128_i32_16, %4 : i32
    %c0_17 = arith.constant 0 : index
    %c0_18 = arith.constant 0 : index
    %36 = arith.index_cast %35 : i32 to index
    %37 = vector.load %arg10[%c0_17, %c0_18, %36] : memref<2x64x640xf32, #tpu.memory_space<vmem>>, vector<1x64x384xf32>
    %38 = vector.shape_cast %37 : vector<1x64x384xf32> to vector<64x384xf32>
    %39 = vector.shape_cast %34 : vector<64x384xf32> to vector<1x64x384xf32>
    tpu.vector_store %arg10[%c0_17, %c0_18, %36], %39 {strides = array<i32>} : memref<2x64x640xf32, #tpu.memory_space<vmem>>, vector<1x64x384xf32>,
    %c1_i32 = arith.constant 1 : i32
    %c0_i32_19 = arith.constant 0 : i32
    %c15_i32 = arith.constant 15 : i32
    %40 = arith.addi %c0_i32_19, %c15_i32 : i32
    %c1_i32_20 = arith.constant 1 : i32
    scf.for %arg11 = %c0_i32_19 to %40 step %c1_i32_20  : i32 {
      %c2_i32 = arith.constant 2 : i32
      %55 = arith.remsi %arg11, %c2_i32 : i32
      %c1_i32_34 = arith.constant 1 : i32
      %56 = arith.subi %c1_i32_34, %55 : i32
      %57 = arith.index_cast %arg11 : i32 to index
      %c0_35 = arith.constant 0 : index
      %c0_36 = arith.constant 0 : index
      %58 = vector.load %arg4[%57, %c0_35, %c0_36] : memref<15x64x576xf32, #tpu.memory_space<vmem>>, vector<1x64x576xf32>
      %59 = vector.shape_cast %58 : vector<1x64x576xf32> to vector<64x576xf32>
      %60 = arith.index_cast %arg11 : i32 to index
      %c0_37 = arith.constant 0 : index
      %c0_38 = arith.constant 0 : index
      %61 = vector.load %arg5[%60, %c0_37, %c0_38] : memref<15x64x1xf32, #tpu.memory_space<vmem>>, vector<1x64x1xf32>
      %62 = vector.shape_cast %61 : vector<1x64x1xf32> to vector<64x1xf32>
      %c0_i32_39 = arith.constant 0 : i32
      %c384_i32_40 = arith.constant 384 : i32
      %63 = arith.muli %c0_i32_39, %c384_i32_40 : i32
      %c128_i32_41 = arith.constant 128 : i32
      %64 = arith.addi %c128_i32_41, %63 : i32
      %c19_i32_42 = arith.constant 19 : i32
      %65 = arith.subi %64, %c19_i32_42 : i32
      %66 = arith.index_cast %55 : i32 to index
      %c0_43 = arith.constant 0 : index
      %67 = arith.index_cast %65 : i32 to index
      %68 = vector.load %arg10[%66, %c0_43, %67] : memref<2x64x640xf32, #tpu.memory_space<vmem>>, vector<1x64x422xf32>
      %69 = vector.shape_cast %68 : vector<1x64x422xf32> to vector<64x422xf32>
      %70 = vector.extract_strided_slice %69 {offsets = [0, 0], sizes = [64, 384], strides = [1, 1]} : vector<64x422xf32> to vector<64x384xf32>
      %71 = vector.extract_strided_slice %69 {offsets = [0, 1], sizes = [64, 384], strides = [1, 1]} : vector<64x422xf32> to vector<64x384xf32>
      %72 = vector.extract_strided_slice %69 {offsets = [0, 2], sizes = [64, 384], strides = [1, 1]} : vector<64x422xf32> to vector<64x384xf32>
      %73 = vector.extract_strided_slice %69 {offsets = [0, 18], sizes = [64, 384], strides = [1, 1]} : vector<64x422xf32> to vector<64x384xf32>
      %74 = vector.extract_strided_slice %69 {offsets = [0, 19], sizes = [64, 384], strides = [1, 1]} : vector<64x422xf32> to vector<64x384xf32>
      %75 = vector.extract_strided_slice %69 {offsets = [0, 20], sizes = [64, 384], strides = [1, 1]} : vector<64x422xf32> to vector<64x384xf32>
      %76 = vector.extract_strided_slice %69 {offsets = [0, 36], sizes = [64, 384], strides = [1, 1]} : vector<64x422xf32> to vector<64x384xf32>
      %77 = vector.extract_strided_slice %69 {offsets = [0, 37], sizes = [64, 384], strides = [1, 1]} : vector<64x422xf32> to vector<64x384xf32>
      %78 = vector.extract_strided_slice %69 {offsets = [0, 38], sizes = [64, 384], strides = [1, 1]} : vector<64x422xf32> to vector<64x384xf32>
      %79 = tpu.concatenate %70, %71, %72, %73, %74, %75, %76, %77, %78 in 0 : vector<64x384xf32>, vector<64x384xf32>, vector<64x384xf32>, vector<64x384xf32>, vector<64x384xf32>, vector<64x384xf32>, vector<64x384xf32>, vector<64x384xf32>, vector<64x384xf32> -> vector<576x384xf32>
      %cst_44 = arith.constant dense<0.000000e+00> : vector<64x384xf32>
      %80 = tpu.matmul %59, %79, %cst_44 {dimension_numbers = #tpu.dot_dimension_numbers<[1], [0], [0], [1], [0, 0, 1, 1], [], []>} : vector<64x576xf32>, vector<576x384xf32>, vector<64x384xf32> -> vector<64x384xf32>
      %81 = vector.broadcast %62 : vector<64x1xf32> to vector<64x384xf32>
      %82 = arith.addf %80, %81 : vector<64x384xf32>
      %cst_45 = arith.constant 0.000000e+00 : f32
      %83 = vector.broadcast %cst_45 : f32 to vector<64x384xf32>
      %84 = arith.maximumf %82, %83 : vector<64x384xf32>
      %c0_46 = arith.constant 0 : index
      %85 = arith.index_cast %63 : i32 to index
      %86 = vector.load %arg8[%c0_46, %85] : memref<1x384xf32, #tpu.memory_space<vmem>>, vector<1x384xf32>
      %cst_47 = arith.constant 5.000000e-01 : f32
      %87 = vector.broadcast %cst_47 : f32 to vector<1x384xf32>
      %88 = arith.cmpf ogt, %86, %87 : vector<1x384xf32>
      %cst_48 = arith.constant 0.000000e+00 : f32
      %89 = vector.shape_cast %88 : vector<1x384xi1> to vector<1x384xi1>
      %90 = vector.broadcast %89 : vector<1x384xi1> to vector<64x384xi1>
      %91 = vector.broadcast %cst_48 : f32 to vector<64x384xf32>
      %92 = arith.select %90, %84, %91 : vector<64x384xi1>, vector<64x384xf32>
      %c128_i32_49 = arith.constant 128 : i32
      %93 = arith.addi %c128_i32_49, %63 : i32
      %94 = arith.index_cast %56 : i32 to index
      %c0_50 = arith.constant 0 : index
      %95 = arith.index_cast %93 : i32 to index
      %96 = vector.load %arg10[%94, %c0_50, %95] : memref<2x64x640xf32, #tpu.memory_space<vmem>>, vector<1x64x384xf32>
      %97 = vector.shape_cast %96 : vector<1x64x384xf32> to vector<64x384xf32>
      %98 = vector.shape_cast %92 : vector<64x384xf32> to vector<1x64x384xf32>
      tpu.vector_store %arg10[%94, %c0_50, %95], %98 {strides = array<i32>} : memref<2x64x640xf32, #tpu.memory_space<vmem>>, vector<1x64x384xf32>,
      %c1_i32_51 = arith.constant 1 : i32
    }
    %c15_i32_21 = arith.constant 15 : i32
    %c0_i32_22 = arith.constant 0 : i32
    %c384_i32_23 = arith.constant 384 : i32
    %41 = arith.muli %c0_i32_22, %c384_i32_23 : i32
    %c128_i32_24 = arith.constant 128 : i32
    %42 = arith.addi %c128_i32_24, %41 : i32
    %c1 = arith.constant 1 : index
    %c0_25 = arith.constant 0 : index
    %43 = arith.index_cast %42 : i32 to index
    %44 = vector.load %arg10[%c1, %c0_25, %43] : memref<2x64x640xf32, #tpu.memory_space<vmem>>, vector<1x64x384xf32>
    %45 = vector.shape_cast %44 : vector<1x64x384xf32> to vector<64x384xf32>
    %c0_26 = arith.constant 0 : index
    %c0_27 = arith.constant 0 : index
    %46 = vector.load %arg6[%c0_26, %c0_27] : memref<3x64xf32, #tpu.memory_space<vmem>>, vector<3x64xf32>
    %cst_28 = arith.constant dense<0.000000e+00> : vector<3x384xf32>
    %47 = tpu.matmul %46, %45, %cst_28 {dimension_numbers = #tpu.dot_dimension_numbers<[1], [0], [0], [1], [0, 0, 1, 1], [], []>} : vector<3x64xf32>, vector<64x384xf32>, vector<3x384xf32> -> vector<3x384xf32>
    %c0_29 = arith.constant 0 : index
    %c0_30 = arith.constant 0 : index
    %48 = vector.load %arg7[%c0_29, %c0_30] : memref<3x1xf32, #tpu.memory_space<vmem>>, vector<3x1xf32>
    %49 = vector.broadcast %48 : vector<3x1xf32> to vector<3x384xf32>
    %50 = arith.addf %47, %49 : vector<3x384xf32>
    %c0_31 = arith.constant 0 : index
    %c0_32 = arith.constant 0 : index
    %51 = arith.index_cast %41 : i32 to index
    %52 = vector.load %arg9[%c0_31, %c0_32, %51] : memref<1x3x384xf32, #tpu.memory_space<vmem>>, vector<1x3x384xf32>
    %53 = vector.shape_cast %52 : vector<1x3x384xf32> to vector<3x384xf32>
    %54 = vector.shape_cast %50 : vector<3x384xf32> to vector<1x3x384xf32>
    tpu.vector_store %arg9[%c0_31, %c0_32, %51], %54 {strides = array<i32>} : memref<1x3x384xf32, #tpu.memory_space<vmem>>, vector<1x3x384xf32>,
    %c1_i32_33 = arith.constant 1 : i32
    return
  }
  func.func @transform_0(%arg0: i32) -> (i32, i32, i32) {
    %c0_i32 = arith.constant 0 : i32
    %c0_i32_0 = arith.constant 0 : i32
    %c0_i32_1 = arith.constant 0 : i32
    return %arg0, %c0_i32, %c0_i32_0 : i32, i32, i32
  }
  func.func @transform_1(%arg0: i32) -> (i32, i32) {
    %c0_i32 = arith.constant 0 : i32
    %c0_i32_0 = arith.constant 0 : i32
    %c0_i32_1 = arith.constant 0 : i32
    return %c0_i32, %c0_i32_0 : i32, i32
  }
  func.func @transform_2(%arg0: i32) -> (i32, i32) {
    %c0_i32 = arith.constant 0 : i32
    %c0_i32_0 = arith.constant 0 : i32
    %c0_i32_1 = arith.constant 0 : i32
    return %c0_i32, %c0_i32_0 : i32, i32
  }
  func.func @transform_3(%arg0: i32) -> (i32, i32, i32) {
    %c0_i32 = arith.constant 0 : i32
    %c0_i32_0 = arith.constant 0 : i32
    %c0_i32_1 = arith.constant 0 : i32
    %c0_i32_2 = arith.constant 0 : i32
    return %c0_i32, %c0_i32_0, %c0_i32_1 : i32, i32, i32
  }
  func.func @transform_4(%arg0: i32) -> (i32, i32, i32) {
    %c0_i32 = arith.constant 0 : i32
    %c0_i32_0 = arith.constant 0 : i32
    %c0_i32_1 = arith.constant 0 : i32
    %c0_i32_2 = arith.constant 0 : i32
    return %c0_i32, %c0_i32_0, %c0_i32_1 : i32, i32, i32
  }
  func.func @transform_5(%arg0: i32) -> (i32, i32) {
    %c0_i32 = arith.constant 0 : i32
    %c0_i32_0 = arith.constant 0 : i32
    %c0_i32_1 = arith.constant 0 : i32
    return %c0_i32, %c0_i32_0 : i32, i32
  }
  func.func @transform_6(%arg0: i32) -> (i32, i32) {
    %c0_i32 = arith.constant 0 : i32
    %c0_i32_0 = arith.constant 0 : i32
    %c0_i32_1 = arith.constant 0 : i32
    return %c0_i32, %c0_i32_0 : i32, i32
  }
  func.func @transform_7(%arg0: i32) -> (i32, i32) {
    %c0_i32 = arith.constant 0 : i32
    %c0_i32_0 = arith.constant 0 : i32
    %c0_i32_1 = arith.constant 0 : i32
    return %c0_i32, %c0_i32_0 : i32, i32
  }
  func.func @transform_8(%arg0: i32) -> (i32, i32, i32) {
    %c0_i32 = arith.constant 0 : i32
    %c0_i32_0 = arith.constant 0 : i32
    %c0_i32_1 = arith.constant 0 : i32
    return %arg0, %c0_i32, %c0_i32_0 : i32, i32, i32
  }
}

</mosaic_0001>

<bundles_post_ra>
// kernel: _lambda_.1
= control target key start
LH: loop header
LB: loop body
LE: loop exit
PB: predicated region body
PF: predicated region fallthrough
CT: control target
= control target key end

     0   :  { %13 = vsyncpa [#allocation4], 0  ;;  %s9484_s0 = inlined_call_operand.vmem [shape: f32[2,8,640], index: 0, kind: input, shape index: {}]   ;;  %s9485_s1 = inlined_call_operand.hbm [shape: f32[64,72], index: 1, kind: input, shape index: {}]   ;;  %s9486_s2 = inlined_call_operand.vmem [shape: f32[64,1], index: 2, kind: input, shape index: {}]   ;;  %s9487_s3 = inlined_call_operand.hbm [shape: f32[15,64,576], index: 3, kind: input, shape index: {}]   ;;  %s9488_s4 = inlined_call_operand.vmem [shape: f32[15,64,1], index: 4, kind: input, shape index: {}]   ;;  %s9489_s5 = inlined_call_operand.hbm [shape: f32[3,64], index: 5, kind: input, shape index: {}]   ;;  %s9490_s6 = inlined_call_operand.vmem [shape: f32[3,1], index: 6, kind: input, shape index: {}]   ;;  %s9491_s7 = inlined_call_operand.vmem [shape: f32[1,384], index: 7, kind: input, shape index: {}]   ;;  %s9492_s8 = inlined_call_operand.vmem [shape: f32[2,3,384], index: 8, kind: output, shape index: {}]  }
   0x1   :  { %14 = vsyncpa [#allocation6], 0  ;;  %s5629_s27 = smov 0  }
   0x2 LB: > { %s252_s30 = sshll.u32 %s9487_s3, 4  ;;  %s5638_s9 = sadd.s32 4294967295, %s5550_s27   ;;  %s5550_s27 = sphi %s5629_s27, %s20_s27   ;;  %s253_s30 = int_to_ptr.hbm [resolvable:$true] %s252_s30 }
   0x3   : > { %p3707_p0 = scmp.ge.s32.totalorder %s5550_s27, 1  ;;  %p224_p1 = scmp.lt.s32.totalorder %s5550_s27, 3 }
   0x4   : > { %p3862_p2 = scmp.eq.s32.totalorder %s5638_s9, 0  ;;  %s5556_s11 = smov [#allocation5]  }
   0x5   : > { %p5643_p3 = pnand %p3707_p0, %p224_p1  ;;  %s254_s12 = sshll.u32 %s5556_s11, 4  ;;  %s255_s12 = int_to_ptr.vmem [resolvable:$true] %s254_s12 }
   0x6   : > { %s235_s15 = sshll.u32 %s9485_s1, 4  ;;  %s5557_s17 = smov [#allocation3]   ;;  %s236_s15 = int_to_ptr.hbm [resolvable:$true] %s235_s15 }
   0x7   : > { %p3852_p4 = pneg %p5643_p3  ;;  %s237_s18 = sshll.u32 %s5557_s17, 4  ;;  %s238_s18 = int_to_ptr.vmem [resolvable:$true] %s237_s18 }
   0x8   : > { %s5558_s19 = smov 640   ;;  %s5559_s20 = smov 40  }
   0x9   : > { %p5654_p5 = pnand %p3862_p2, %p3852_p4  ;;  %s270_s23 = sshll.u32 %s9489_s5, 4  ;;  %s271_s23 = int_to_ptr.hbm [resolvable:$true] %s270_s23 }
   0xa   : > { %s5560_s24 = smov 128   ;;  %s5561_s25 = smov 8  }
   0xb   : > { %3858 = dma.hbm_to_vmem [thread:$0]  (!%p5654_p5), %s253_s30, 76800, %s255_s12, [#allocation6], %s5558_s19, %s5558_s19, %s5559_s20  }
   0xc   : > { %3855 = dma.hbm_to_vmem [thread:$0]  (!%p5654_p5), %s236_s15, 1024, %s238_s18, [#allocation4], %s5560_s24, %s5560_s24, %s5561_s25  }
   0xd   : > { %s5562_s26 = smov [#allocation7]   ;;  %299 = sbr.rel (%p5643_p3) target bundleno = 1774 (0x6ee), region = 52 }
   0xe   : > { %s272_s28 = sshll.u32 %s5562_s26, 4  ;;  %s273_s28 = int_to_ptr.vmem [resolvable:$true] %s272_s28 }
   0xf   : > { %3861 = dma.hbm_to_vmem [thread:$0]  (!%p5654_p5), %s271_s23, 64, %s273_s28, [#allocation6]  }
  0x12   : > { %5541 = dma.done.wait (%p3862_p2), [#allocation4], 1024  }
  0x13   : > { %5543 = vsyncadd (%p3862_p2), [#allocation4], 4294966272 }
  0x14   : > { %5545 = dma.done.wait (%p3862_p2), [#allocation6], 76864  }
  0x15   : > { %5547 = vsyncadd (%p3862_p2), [#allocation6], 4294890432  ;;  %p344_p6 = scmp.lt.s32.totalorder %s5638_s9, 1  ;;  %v5563_v0 = vmov 0.0   ;;  %s5565_s16 = smov 90   ;;  %vm477_vm0 = vcmask 752640  }
  0x16   : > { %354 = vst [vmem:[#allocation2] sm:$0xff] %v5563_v0  ;;  %s5566_s17 = smov 92   ;;  %s5567_s18 = smov 108   ;;  %vm489_vm1 = vcmask 744448   ;;  %vm501_vm2 = vcmask 736256   ;;  %vm453_vm3 = vcmask 891904  }
  0x17   : > { %355 = vst [vmem:[#allocation2 + $0x28] sm:$0xff] %v5563_v0  ;;  %s10428_s9 = smov (!%p344_p6, %s5638_s9), 1  ;;  %s5568_s19 = smov 109   ;;  %vm465_vm4 = vcmask 883712   ;;  %vm419_vm5 = vcmask 1039360   ;;  %vm431_vm6 = vcmask 1031168  }
  0x18   : > { %356 = vst [vmem:[#allocation2 + $0x50] sm:$0xff] %v5563_v0  ;;  %s3838_s29 = smul.u32 40, %s10428_s9  ;;  %s5569_s20 = smov 126   ;;  %vm443_vm7 = vcmask 900096   ;;  %vm617_vm8 = vcmask 154624   ;;  %vm672_vm9 = vcmask 588800  }
  0x19   : > { %357 = vst [vmem:[#allocation2 + $0x78] sm:$0xff] %v5563_v0  ;;  %s3839_s30 = smul.u32 12, %s10428_s9  ;;  %s5564_s9 = smov 91  }
  0x1a   : > { %358 = vst [vmem:[#allocation2 + $0xa0] sm:$0xff] %v5563_v0  ;;  %s5682_s12 = scalar_lea.vmem %s9484_s0, %s3838_s29  ;;  %s5570_s21 = smov 110  }
  0x1b   : > { %359 = vst [vmem:[#allocation2 + $0xc8] sm:$0xff] %v5563_v0  ;;  %s5687_s15 = scalar_lea.vmem %s9492_s8, %s3839_s30  ;;  %v388_v1 = vld [vmem:[%s5682_s12 + $0x10] sm:$0xff]  ;;  %v389_v2 = vld [vmem:[%s5682_s12 + $0x18] sm:$0xff]  ;;  %v387_v4 = vld [vmem:[%s5682_s12 + $0x8] sm:$0xff]  ;;  %s5571_s22 = smov 127  }
  0x1c   : > { %360 = vst [vmem:[#allocation2 + $0xf0] sm:$0xff] %v5563_v0  ;;  %v3922_v3 = vpack.i.bf16 %v389_v2, %v388_v1  ;;  %v390_v5 = vld [vmem:[%s5682_s12 + $0x20] sm:$0xff]  ;;  %s5572_s23 = smov 19  }
  0x1d   : > { %361 = vst [vmem:[#allocation2 + $0x118] sm:$0xff] %v5563_v0  ;;  %v3927_v6 = vpack.i.bf16 %v387_v4, %v390_v5  ;;  %v386_v7 = vld [vmem:[%s5682_s12] sm:$0xff] }
  0x1e   : > { %362 = vst [vmem:[#allocation2 + $0x140] sm:$0xff] %v5563_v0  ;;  %3923 = vrot.lane.b32.xlu1 %v3922_v3, %s5564_s9  ;;  %3913 = vrot.lane.b32.xlu0 %v3922_v3, %s5565_s16  ;;  %v5694_v8 = vpack.i.bf16 %v387_v4, %v386_v7 }
  0x1f   : > { %363 = vst [vmem:[#allocation2 + $0x168] sm:$0xff] %v5563_v0  ;;  %3933 = vrot.lane.b32.xlu2 %v3922_v3, %s5566_s17 }
  0x20   : > { %364 = vst [vmem:[#allocation2 + $0x190] sm:$0xff] %v5563_v0 }
  0x21   : > { %365 = vst [vmem:[#allocation2 + $0x1b8] sm:$0xff] %v5563_v0 }
  0x22   : > { %366 = vst [vmem:[#allocation2 + $0x1e0] sm:$0xff] %v5563_v0 }
  0x23   : > { %367 = vst [vmem:[#allocation2 + $0x208] sm:$0xff] %v5563_v0 }
  0x24   : > { %368 = vst [vmem:[#allocation2 + $0x230] sm:$0xff] %v5563_v0 }
  0x25   : > { %369 = vst [vmem:[#allocation2 + $0x258] sm:$0xff] %v5563_v0 }
  0x26   : > { %370 = vst [vmem:[#allocation2 + $0x20] sm:$0xff] %v5563_v0  ;;  %3928 = vrot.lane.b32.xlu1 %v3927_v6, %s5564_s9  ;;  %3918 = vrot.lane.b32.xlu0 %v3927_v6, %s5565_s16 }
  0x27   : > { %371 = vst [vmem:[#allocation2 + $0x48] sm:$0xff] %v5563_v0  ;;  %3938 = vrot.lane.b32.xlu2 %v3927_v6, %s5566_s17 }
  0x28   : > { %372 = vst [vmem:[#allocation2 + $0x70] sm:$0xff] %v5563_v0 }
  0x29   : > { %373 = vst [vmem:[#allocation2 + $0x98] sm:$0xff] %v5563_v0 }
  0x2a   : > { %374 = vst [vmem:[#allocation2 + $0xc0] sm:$0xff] %v5563_v0 }
  0x2b   : > { %375 = vst [vmem:[#allocation2 + $0xe8] sm:$0xff] %v5563_v0 }
  0x2c   : > { %376 = vst [vmem:[#allocation2 + $0x110] sm:$0xff] %v5563_v0 }
  0x2d   : > { %377 = vst [vmem:[#allocation2 + $0x138] sm:$0xff] %v5563_v0 }
  0x2e   : > { %378 = vst [vmem:[#allocation2 + $0x160] sm:$0xff] %v5563_v0  ;;  %3948 = vrot.lane.b32.xlu1 %v3927_v6, %s5567_s18  ;;  %3943 = vrot.lane.b32.xlu0 %v3922_v3, %s5567_s18 }
  0x2f   : > { %379 = vst [vmem:[#allocation2 + $0x188] sm:$0xff] %v5563_v0  ;;  %3953 = vrot.lane.b32.xlu2 %v3922_v3, %s5568_s19 }
  0x30   : > { %380 = vst [vmem:[#allocation2 + $0x1b0] sm:$0xff] %v5563_v0 }
  0x31   : > { %381 = vst [vmem:[#allocation2 + $0x1d8] sm:$0xff] %v5563_v0 }
  0x32   : > { %382 = vst [vmem:[#allocation2 + $0x200] sm:$0xff] %v5563_v0 }
  0x33   : > { %383 = vst [vmem:[#allocation2 + $0x228] sm:$0xff] %v5563_v0 }
  0x34   : > { %384 = vst [vmem:[#allocation2 + $0x250] sm:$0xff] %v5563_v0 }
  0x35   : > { %385 = vst [vmem:[#allocation2 + $0x278] sm:$0xff] %v5563_v0 }
  0x36   : > { %3963 = vrot.lane.b32.xlu1 %v3922_v3, %s5569_s20  ;;  %3958 = vrot.lane.b32.xlu0 %v3922_v3, %s5570_s21 }
  0x37   : > { %3968 = vrot.lane.b32.xlu2 %v3922_v3, %s5571_s22 }
  0x3e   : > { %3973 = vrot.lane.b32.xlu1 %v5694_v8, %s5570_s21  ;;  %447 = vrot.lane.b32.xlu0 %v387_v4, %s5568_s19 }
  0x3f   : > { %3978 = vrot.lane.b32.xlu2 %v5694_v8, %s5569_s20 }
  0x46   : > { %3983 = vrot.lane.b32.xlu0 %v5694_v8, %s5571_s22  ;;  %3988 = vrot.lane.b32.xlu1 %v3922_v3, %s5572_s23  ;;  %s6052_s22 = smov 0  }
  0x79   : > { %v5700_v9 = vpop.permute.xlu2 %3933 }
  0x7a   : > { %v3936_v10 = vunpack.i.h.bf16 %v5700_v9  ;;  %v3935_v11 = vunpack.i.l.bf16 %v5700_v9 }
  0x7c   : > { %v479_v14 = vsel %vm477_vm0, %v3935_v11, %v3936_v10 }
  0x81   : > { %v5704_v12 = vpop.permute.xlu2 %3938 }
  0x82   : > { %v3940_v13 = vunpack.i.l.bf16 %v5704_v12  ;;  %v3941_v7 = vunpack.i.h.bf16 %v5704_v12 }
  0x84   : > { %v480_v15 = vsel %vm477_vm0, %v3936_v10, %v3940_v13 }
  0x85   : > { %v4002_v16 = vpack.i.bf16 %v480_v15, %v479_v14  ;;  %v478_v15 = vsel %vm477_vm0, %v3941_v7, %v3935_v11 }
  0x87   : > { %4003 = vrot.lane.b32.xlu0 %v4002_v16, %s5572_s23 }
  0x89   : > { %v5718_v21 = vpop.permute.xlu2 %3953 }
  0x8a   : > { %v3956_v29 = vunpack.i.h.bf16 %v5718_v21  ;;  %v3955_v33 = vunpack.i.l.bf16 %v5718_v21 }
  0x8c   : > { %v455_v36 = vsel %vm453_vm3, %v3955_v33, %v3956_v29 }
  0x8d   : > { %v4012_v43 = vpack.i.bf16 %v3956_v29, %v455_v36 }
  0x90   : > { %v5712_v17 = vpop.permute.xlu1 %3923  ;;  %v5714_v18 = vpop.permute.xlu0 %3913 }
  0x91   : > { %v3926_v19 = vunpack.i.h.bf16 %v5712_v17  ;;  %v3925_v20 = vunpack.i.l.bf16 %v5712_v17  ;;  %v3916_v22 = vunpack.i.h.bf16 %v5714_v18  ;;  %v3915_v23 = vunpack.i.l.bf16 %v5714_v18  ;;  %v5731_v37 = vpop.permute.xlu2 %3968 }
  0x92   : > { %v3971_v46 = vunpack.i.h.bf16 %v5731_v37  ;;  %v3970_v47 = vunpack.i.l.bf16 %v5731_v37 }
  0x93   : > { %v491_v28 = vsel %vm489_vm1, %v3925_v20, %v3926_v19  ;;  %v503_v31 = vsel %vm501_vm2, %v3915_v23, %v3916_v22 }
  0x94   : > { %v422_v49 = vsel %vm419_vm5, %v3970_v47, %v3971_v46 }
  0x95   : > { %v4027_v56 = vpack.i.bf16 %v3971_v46, %v422_v49 }
  0x98   : > { %v3929_v24 = vpop.permute.xlu1 %3928  ;;  %v3919_v25 = vpop.permute.xlu0 %3918 }
  0x99   : > { %v3930_v26 = vunpack.i.l.bf16 %v3929_v24  ;;  %v3920_v27 = vunpack.i.l.bf16 %v3919_v25  ;;  %v3931_v61 = vunpack.i.h.bf16 %v3929_v24  ;;  %v3921_v62 = vunpack.i.h.bf16 %v3919_v25  ;;  %v3979_v3 = vpop.permute.xlu2 %3978 }
  0x9a   : > { %v3981_v10 = vunpack.i.h.bf16 %v3979_v3  ;;  %v3980_v13 = vunpack.i.l.bf16 %v3979_v3 }
  0x9b   : > { %v492_v30 = vsel %vm489_vm1, %v3926_v19, %v3930_v26  ;;  %v504_v32 = vsel %vm501_vm2, %v3916_v22, %v3920_v27  ;;  %v490_v1 = vsel %vm489_vm1, %v3931_v61, %v3925_v20  ;;  %v502_v2 = vsel %vm501_vm2, %v3921_v62, %v3915_v23 }
  0x9c   : > { %v3997_v34 = vpack.i.bf16 %v492_v30, %v491_v28  ;;  %v3992_v35 = vpack.i.bf16 %v504_v32, %v503_v31  ;;  %v4037_v5 = vpack.i.bf16 %v490_v1, %v3931_v61  ;;  %v4032_v6 = vpack.i.bf16 %v502_v2, %v3921_v62 }
  0x9d   : > { %v432_v17 = vsel %vm431_vm6, %v3980_v13, %v3981_v10  ;;  %v4042_v20 = vpack.i.bf16 %v478_v15, %v3941_v7  ;;  %v9493_v2 = vmov 0  }
  0x9e   : > { %3998 = vrot.lane.b32.xlu2 %v3997_v34, %s5572_s23  ;;  %3993 = vrot.lane.b32.xlu1 %v3992_v35, %s5572_s23 }
  0x9f   : > { %4077 = vset.pattern.permute.xlu1 %v9493_v2  ;;  %4079 = vset.pattern.permute.xlu0 %v9493_v2 }
  0xa0   : > { %v3949_v38 = vpop.permute.xlu1 %3948  ;;  %v3944_v39 = vpop.permute.xlu0 %3943  ;;  %4078 = vset.pattern.permute.xlu2 %v9493_v2 }
  0xa1   : > { %v3950_v40 = vunpack.i.l.bf16 %v3949_v38  ;;  %v3946_v41 = vunpack.i.h.bf16 %v3944_v39  ;;  %v3945_v42 = vunpack.i.l.bf16 %v3944_v39  ;;  %v3951_v63 = vunpack.i.h.bf16 %v3949_v38 }
  0xa3   : > { %v467_v44 = vsel %vm465_vm4, %v3945_v42, %v3946_v41  ;;  %v468_v45 = vsel %vm465_vm4, %v3946_v41, %v3950_v40  ;;  %v466_v4 = vsel %vm465_vm4, %v3951_v63, %v3945_v42 }
  0xa4   : > { %v4007_v48 = vpack.i.bf16 %v468_v45, %v467_v44  ;;  %v4047_v14 = vpack.i.bf16 %v466_v4, %v3951_v63 }
  0xa6   : > { %4013 = vrot.lane.b32.xlu2 %v4012_v43, %s5572_s23  ;;  %4008 = vrot.lane.b32.xlu1 %v4007_v48, %s5572_s23 }
  0xa8   : > { %v3964_v50 = vpop.permute.xlu1 %3963  ;;  %v3959_v51 = vpop.permute.xlu0 %3958 }
  0xa9   : > { %v3966_v52 = vunpack.i.h.bf16 %v3964_v50  ;;  %v3965_v53 = vunpack.i.l.bf16 %v3964_v50  ;;  %v3961_v54 = vunpack.i.h.bf16 %v3959_v51  ;;  %v3960_v55 = vunpack.i.l.bf16 %v3959_v51 }
  0xab   : > { %v434_v57 = vsel %vm431_vm6, %v3965_v53, %v3966_v52  ;;  %v446_v58 = vsel %vm443_vm7, %v3960_v55, %v3961_v54  ;;  %v433_v18 = vsel %vm431_vm6, %v3981_v10, %v3965_v53 }
  0xac   : > { %v4022_v59 = vpack.i.bf16 %v3966_v52, %v434_v57  ;;  %v4017_v60 = vpack.i.bf16 %v3961_v54, %v446_v58  ;;  %v4062_v22 = vpack.i.bf16 %v433_v18, %v432_v17 }
  0xae   : > { %4018 = vrot.lane.b32.xlu0 %v4017_v60, %s5572_s23  ;;  %4028 = vrot.lane.b32.xlu2 %v4027_v56, %s5572_s23 }
  0xaf   : > { %4023 = vrot.lane.b32.xlu1 %v4022_v59, %s5572_s23 }
  0xb0   : > { %v448_v0 = vpop.permute.xlu0 %447  ;;  %v3974_v12 = vpop.permute.xlu1 %3973 }
  0xb1   : > { %v454_v16 = vsel %vm453_vm3, %v448_v0, %v3955_v33  ;;  %v3976_v23 = vunpack.i.h.bf16 %v3974_v12  ;;  %v3975_v24 = vunpack.i.l.bf16 %v3974_v12 }
  0xb2   : > { %v4052_v21 = vpack.i.bf16 %v454_v16, %v448_v0 }
  0xb3   : > { %v444_v27 = vsel %vm443_vm7, %v3975_v24, %v3976_v23  ;;  %v445_v28 = vsel %vm443_vm7, %v3976_v23, %v3960_v55 }
  0xb4   : > { %v4057_v30 = vpack.i.bf16 %v445_v28, %v444_v27 }
  0xb6   : > { %4033 = vrot.lane.b32.xlu0 %v4032_v6, %s5572_s23  ;;  %4038 = vrot.lane.b32.xlu2 %v4037_v5, %s5572_s23  ;;  %v5854_v5 = vld [vmem:[#allocation3] sm:$0xff] }
  0xb7   : > { %4048 = vrot.lane.b32.xlu1 %v4047_v14, %s5572_s23  ;;  %v399_v6 = vld [vmem:[%s9486_s2] sm:$0xff] }
  0xb8   : > { %v3984_v19 = vpop.permute.xlu0 %3983  ;;  %v5771_v32 = vpop.permute.xlu1 %3988 }
  0xb9   : > { %v3986_v25 = vunpack.i.h.bf16 %v3984_v19  ;;  %v3985_v26 = vunpack.i.l.bf16 %v3984_v19  ;;  %v3991_v61 = vunpack.i.h.bf16 %v5771_v32  ;;  %v3990_v62 = vunpack.i.l.bf16 %v5771_v32  ;;  %v403_v32 = vld [vmem:[%s9486_s2 + $0x20] sm:$0xff] }
  0xbb   : > { %v420_v9 = vsel %vm419_vm5, %v3985_v26, %v3986_v25  ;;  %v421_v11 = vsel %vm419_vm5, %v3986_v25, %v3970_v47  ;;  %v5852_v4 = vsel %vm617_vm8, %v3990_v62, %v3991_v61 }
  0xbc   : > { %v4067_v29 = vpack.i.bf16 %v421_v11, %v420_v9 }
  0xbe   : > { %4043 = vrot.lane.b32.xlu0 %v4042_v20, %s5572_s23  ;;  %4053 = vrot.lane.b32.xlu2 %v4052_v21, %s5572_s23  ;;  %v5875_v21 = vld [vmem:[#allocation3 + $0x8] sm:$0xff] }
  0xbf   : > { %4063 = vrot.lane.b32.xlu1 %v4062_v22, %s5572_s23 }
  0xc6   : > { %4068 = vrot.lane.b32.xlu2 %v4067_v29, %s5572_s23  ;;  %4058 = vrot.lane.b32.xlu0 %v4057_v30, %s5572_s23 }
  0xc7   : > { %507 = vperm.xlu1 %4077, %v399_v6   ;;  %v397_v6 = vld [vmem:[#allocation3 + $0x30] sm:$0xff] }
  0xce   : > { %4073 = vrot.lane.b32.xlu0 %v5694_v8, %s5572_s23 }
  0xf8   : > { %v5769_v31 = vpop.permute.xlu2 %3998 }
  0xf9   : > { %v5773_v33 = vpop.permute.xlu0 %4003  ;;  %v4001_v36 = vunpack.i.h.bf16 %v5769_v31  ;;  %v4000_v37 = vunpack.i.l.bf16 %v5769_v31 }
  0xfa   : > { %v4006_v40 = vunpack.i.h.bf16 %v5773_v33  ;;  %v4005_v8 = vunpack.i.l.bf16 %v5773_v33 }
  0xfb   : > { %v5788_v42 = vsel %vm617_vm8, %v4000_v37, %v4001_v36 }
  0xfc   : > { %v5794_v43 = vsel %vm617_vm8, %v4005_v8, %v4006_v40 }
 0x100   : > { %v5775_v34 = vpop.permute.xlu2 %4013 }
 0x101   : > { %v4016_v45 = vunpack.i.h.bf16 %v5775_v34  ;;  %v4015_v46 = vunpack.i.l.bf16 %v5775_v34 }
 0x103   : > { %v5814_v51 = vsel %vm617_vm8, %v4015_v46, %v4016_v45 }
 0x108   : > { %v5803_v49 = vpop.permute.xlu2 %4028 }
 0x109   : > { %v4031_v58 = vunpack.i.h.bf16 %v5803_v49  ;;  %v4030_v59 = vunpack.i.l.bf16 %v5803_v49 }
 0x10b   : > { %v5844_v1 = vsel %vm617_vm8, %v4030_v59, %v4031_v58  ;;  %v394_v58 = vld [vmem:[#allocation3 + $0x18] sm:$0xff] }
 0x110   : > { %v3994_v35 = vpop.permute.xlu1 %3993  ;;  %v4039_v63 = vpop.permute.xlu2 %4038 }
 0x111   : > { %v3996_v38 = vunpack.i.h.bf16 %v3994_v35  ;;  %v3995_v39 = vunpack.i.l.bf16 %v3994_v35  ;;  %v4041_v7 = vunpack.i.h.bf16 %v4039_v63  ;;  %v4040_v10 = vunpack.i.l.bf16 %v4039_v63 }
 0x113   : > { %v5782_v41 = vsel %vm617_vm8, %v3995_v39, %v3996_v38  ;;  %v639_v18 = vsel %vm617_vm8, %v4040_v10, %v4041_v7  ;;  %v5872_v19 = vsel %vm617_vm8, %v4041_v7, %v4000_v37  ;;  %v5897_v37 = vld [vmem:[#allocation3 + $0x10] sm:$0xff]  ;;  %v395_v7 = vld [vmem:[#allocation3 + $0x20] sm:$0xff] }
 0x114   : > { %786 = vmatpush.msra.mxu2 %v5782_v41  ;;  %v401_v38 = vld [vmem:[%s9486_s2 + $0x10] sm:$0xff] }
 0x115   : > { %517 = vperm.xlu0 %4079, %v401_v38   ;;  %v405_v10 = vld [vmem:[%s9486_s2 + $0x30] sm:$0xff] }
 0x116   : > { %787 = vmatpush.msra.mxu2 %v5788_v42 }
 0x118   : > { %v5796_v44 = vpop.permute.xlu1 %4008  ;;  %788 = vmatpush.msra.mxu2 %v5794_v43  ;;  %v4054_v12 = vpop.permute.xlu2 %4053 }
 0x119   : > { %v4011_v47 = vunpack.i.h.bf16 %v5796_v44  ;;  %v4010_v48 = vunpack.i.l.bf16 %v5796_v44  ;;  %v4056_v26 = vunpack.i.h.bf16 %v4054_v12  ;;  %v4055_v9 = vunpack.i.l.bf16 %v4054_v12 }
 0x11b   : > { %v5808_v50 = vsel %vm617_vm8, %v4010_v48, %v4011_v47  ;;  %v630_v31 = vsel %vm617_vm8, %v4055_v9, %v4056_v26  ;;  %v631_v35 = vsel %vm617_vm8, %v4056_v26, %v4015_v46 }
 0x11c   : > { %789 = vmatpush.msra.mxu2 %v5808_v50 }
 0x11e   : > { %790 = vmatpush.msra.mxu2 %v5814_v51 }
 0x120   : > { %v5817_v52 = vpop.permute.xlu0 %4018  ;;  %v4069_v33 = vpop.permute.xlu2 %4068 }
 0x121   : > { %v4021_v53 = vunpack.i.h.bf16 %v5817_v52  ;;  %v4020_v54 = vunpack.i.l.bf16 %v5817_v52  ;;  %v5821_v55 = vpop.permute.xlu1 %4023  ;;  %v4071_v45 = vunpack.i.h.bf16 %v4069_v33  ;;  %v4070_v47 = vunpack.i.l.bf16 %v4069_v33 }
 0x122   : > { %v4026_v56 = vunpack.i.h.bf16 %v5821_v55  ;;  %v4025_v57 = vunpack.i.l.bf16 %v5821_v55  ;;  %v402_v55 = vld [vmem:[%s9486_s2 + $0x18] sm:$0xff] }
 0x123   : > { %v5830_v60 = vsel %vm617_vm8, %v4020_v54, %v4021_v53  ;;  %v622_v52 = vsel %vm617_vm8, %v4071_v45, %v4030_v59  ;;  %522 = vperm.xlu1 %4077, %v402_v55  }
 0x124   : > { %791 = vmatpush.msra.mxu2 %v5830_v60  ;;  %v5838_v0 = vsel %vm617_vm8, %v4025_v57, %v4026_v56  ;;  %v621_v56 = vsel %vm617_vm8, %v4070_v47, %v4071_v45 }
 0x126   : > { %792 = vmatpush.msra.mxu2 %v5838_v0 }
 0x128   : > { %v4034_v3 = vpop.permute.xlu0 %4033  ;;  %793 = vmatpush.msra.mxu2 %v5844_v1 }
 0x129   : > { %v4036_v13 = vunpack.i.h.bf16 %v4034_v3  ;;  %v4035_v14 = vunpack.i.l.bf16 %v4034_v3  ;;  %v4049_v17 = vpop.permute.xlu1 %4048 }
 0x12a   : > { %794 = vmatpush.msra.mxu2 %v5852_v4  ;;  %v4051_v22 = vunpack.i.h.bf16 %v4049_v17  ;;  %v4050_v23 = vunpack.i.l.bf16 %v4049_v17 }
 0x12b   : > { %3734 = vmatmul.msk.f32.vlgmr.msra.gmra.mxu2 %vm672_vm9, %v5854_v5  ;;  %v642_v15 = vsel %vm617_vm8, %v4035_v14, %v4036_v13  ;;  %v5865_v16 = vsel %vm617_vm8, %v4036_v13, %v3995_v39  ;;  %v396_v13 = vld [vmem:[#allocation3 + $0x28] sm:$0xff] }
 0x12c   : > { %704 = vmatpush.msra.mxu0 %v642_v15  ;;  %3779 = vmatpush.msra.mxu3 %v642_v15  ;;  %v633_v28 = vsel %vm617_vm8, %v4050_v23, %v4051_v22  ;;  %v5890_v30 = vsel %vm617_vm8, %v4051_v22, %v4010_v48 }
 0x12d   : > { %745 = vmatpush.msra.mxu1 %v5865_v16 }
 0x12e   : > { %705 = vmatpush.msra.mxu0 %v639_v18  ;;  %3780 = vmatpush.msra.mxu3 %v639_v18 }
 0x12f   : > { %746 = vmatpush.msra.mxu1 %v5872_v19 }
 0x130   : > { %v4044_v20 = vpop.permute.xlu0 %4043 }
 0x131   : > { %v4046_v24 = vunpack.i.h.bf16 %v4044_v20  ;;  %v4045_v25 = vunpack.i.l.bf16 %v4044_v20  ;;  %v4064_v29 = vpop.permute.xlu1 %4063 }
 0x132   : > { %v4066_v39 = vunpack.i.h.bf16 %v4064_v29  ;;  %v4065_v40 = vunpack.i.l.bf16 %v4064_v29 }
 0x133   : > { %3735 = vmatmul.msk.f32.gmra.mxu2 %vm672_vm9, %v5875_v21  ;;  %v636_v11 = vsel %vm617_vm8, %v4045_v25, %v4046_v24  ;;  %v5883_v27 = vsel %vm617_vm8, %v4046_v24, %v4005_v8 }
 0x134   : > { %706 = vmatpush.msra.mxu0 %v636_v11  ;;  %3781 = vmatpush.msra.mxu3 %v636_v11  ;;  %v624_v48 = vsel %vm617_vm8, %v4065_v40, %v4066_v39  ;;  %v625_v53 = vsel %vm617_vm8, %v4066_v39, %v4025_v57  ;;  %v406_v57 = vld [vmem:[%s9486_s2 + $0x38] sm:$0xff] }
 0x135   : > { %747 = vmatpush.msra.mxu1 %v5883_v27  ;;  %542 = vperm.xlu0 %4079, %v406_v57  }
 0x136   : > { %707 = vmatpush.msra.mxu0 %v633_v28  ;;  %3782 = vmatpush.msra.mxu3 %v633_v28 }
 0x137   : > { %748 = vmatpush.msra.mxu1 %v5890_v30 }
 0x138   : > { %708 = vmatpush.msra.mxu0 %v630_v31  ;;  %3783 = vmatpush.msra.mxu3 %v630_v31  ;;  %v4059_v36 = vpop.permute.xlu0 %4058 }
 0x139   : > { %749 = vmatpush.msra.mxu1 %v631_v35  ;;  %v4061_v8 = vunpack.i.h.bf16 %v4059_v36  ;;  %v4060_v44 = vunpack.i.l.bf16 %v4059_v36 }
 0x13b   : > { %3736 = vmatmul.msk.f32.gmra.mxu2 %vm672_vm9, %v5897_v37  ;;  %v627_v34 = vsel %vm617_vm8, %v4060_v44, %v4061_v8  ;;  %v628_v46 = vsel %vm617_vm8, %v4061_v8, %v4020_v54  ;;  %v400_v54 = vld [vmem:[%s9486_s2 + $0x8] sm:$0xff] }
 0x13c   : > { %709 = vmatpush.msra.mxu0 %v627_v34  ;;  %3784 = vmatpush.msra.mxu3 %v627_v34 }
 0x13d   : > { %750 = vmatpush.msra.mxu1 %v628_v46  ;;  %512 = vperm.xlu2 %4078, %v400_v54  }
 0x13e   : > { %710 = vmatpush.msra.mxu0 %v624_v48  ;;  %3785 = vmatpush.msra.mxu3 %v624_v48 }
 0x13f   : > { %751 = vmatpush.msra.mxu1 %v625_v53 }
 0x140   : > { %v4074_v61 = vpop.permute.xlu0 %4073  ;;  %711 = vmatpush.msra.mxu0 %v621_v56  ;;  %3786 = vmatpush.msra.mxu3 %v621_v56 }
 0x141   : > { %v4076_v63 = vunpack.i.h.bf16 %v4074_v61  ;;  %v4075_v3 = vunpack.i.l.bf16 %v4074_v61  ;;  %752 = vmatpush.msra.mxu1 %v622_v52 }
 0x143   : > { %3737 = vmatmul.msk.f32.gmra.mxu2 %vm672_vm9, %v394_v58  ;;  %v618_v49 = vsel %vm617_vm8, %v4075_v3, %v4076_v63  ;;  %v619_v59 = vsel %vm617_vm8, %v4076_v63, %v3990_v62  ;;  %v404_v62 = vld [vmem:[%s9486_s2 + $0x28] sm:$0xff] }
 0x144   : > { %712 = vmatpush.msra.mxu0 %v618_v49  ;;  %3787 = vmatpush.msra.mxu3 %v618_v49 }
 0x145   : > { %753 = vmatpush.msra.mxu1 %v619_v59  ;;  %3718 = vmatmul.msk.f32.vlgmr.msra.gmra.mxu0 %vm672_vm9, %v5854_v5 }
 0x146   : > { %3788 = vmatpush.msrb.mxu3 %v5865_v16  ;;  %3726 = vmatmul.msk.f32.vlgmr.msra.gmra.mxu1 %vm672_vm9, %v5854_v5  ;;  %v398_v5 = vld [vmem:[#allocation3 + $0x38] sm:$0xff] }
 0x147   : > { %3724 = vmatmul.msk.f32.vlgmr.msra.gmra.mxu3 %vm672_vm9, %v397_v6  ;;  %527 = vperm.xlu2 %4078, %v403_v32  }
 0x148   : > { %3789 = vmatpush.msrb.mxu3 %v5872_v19  ;;  %532 = vperm.xlu1 %4077, %v404_v62  }
 0x14a   : > { %3790 = vmatpush.msrb.mxu3 %v5883_v27 }
 0x14b   : > { %3738 = vmatmul.msk.f32.gmra.mxu2 %vm672_vm9, %v395_v7 }
 0x14c   : > { %3791 = vmatpush.msrb.mxu3 %v5890_v30 }
 0x14d   : > { %3719 = vmatmul.msk.f32.gmra.mxu0 %vm672_vm9, %v5875_v21 }
 0x14e   : > { %3792 = vmatpush.msrb.mxu3 %v631_v35  ;;  %3727 = vmatmul.msk.f32.gmra.mxu1 %vm672_vm9, %v5875_v21 }
 0x14f   : > { %3725 = vmatmul.msk.f32.gmra.mxu3 %vm672_vm9, %v398_v5  ;;  %537 = vperm.xlu2 %4078, %v405_v10  }
 0x150   : > { %3793 = vmatpush.msrb.mxu3 %v628_v46 }
 0x152   : > { %3794 = vmatpush.msrb.mxu3 %v625_v53 }
 0x153   : > { %3739 = vmatmul.msk.f32.gmra.mxu2 %vm672_vm9, %v396_v13 }
 0x154   : > { %3795 = vmatpush.msrb.mxu3 %v622_v52 }
 0x155   : > { %3720 = vmatmul.msk.f32.gmra.mxu0 %vm672_vm9, %v5897_v37 }
 0x156   : > { %3796 = vmatpush.msrb.mxu3 %v619_v59  ;;  %3728 = vmatmul.msk.f32.gmra.mxu1 %vm672_vm9, %v5897_v37 }
 0x157   : > { %3732 = vmatmul.msk.f32.vlgmr.msrb.gmra.mxu3 %vm672_vm9, %v397_v6 }
 0x158   : > { %3797 = vmatpush.msra.mxu3 %v5782_v41  ;;  %v844_v41 = vld [vmem:[%s9491_s7] sm:$0x7] }
 0x159   : > { %vm845_vm10 = vcmp.gt.f32.partialorder %v844_v41, 0.5 }
 0x15a   : > { %3798 = vmatpush.msra.mxu3 %v5788_v42  ;;  %v846_v42 = vsel %vm845_vm10, 1, %v9493_v2 }
 0x15b   : > { %3740 = vmatmul.msk.f32.gmra.mxu2 %vm672_vm9, %v397_v6  ;;  %v847_v22 = vperm.slane %v846_v42, 0  ;;  %v848_v23 = vperm.slane %v846_v42, 1 }
 0x15c   : > { %3799 = vmatpush.msra.mxu3 %v5794_v43  ;;  %v849_v43 = vperm.slane %v846_v42, 2 }
 0x15d   : > { %3721 = vmatmul.msk.f32.gmra.mxu0 %vm672_vm9, %v394_v58  ;;  %vm5994_vm12 = vcmp.eq.s32.totalorder %v847_v22, 1  ;;  %vm5998_vm13 = vcmp.eq.s32.totalorder %v848_v23, 1 }
 0x15e   : > { %3800 = vmatpush.msra.mxu3 %v5808_v50  ;;  %3729 = vmatmul.msk.f32.gmra.mxu1 %vm672_vm9, %v394_v58  ;;  %v508_v50 = vpop.permute.xlu1 %507  ;;  %vm5982_vm11 = vcmp.eq.s32.totalorder %v849_v43, 1 }
 0x15f   : > { %3733 = vmatmul.msk.f32.gmra.mxu3 %vm672_vm9, %v398_v5 }
 0x160   : > { %3801 = vmatpush.msra.mxu3 %v5814_v51 }
 0x162   : > { %3802 = vmatpush.msra.mxu3 %v5830_v60 }
 0x164   : > { %3803 = vmatpush.msra.mxu3 %v5838_v0 }
 0x165   : > { %3722 = vmatmul.msk.f32.gmra.mxu0 %vm672_vm9, %v395_v7 }
 0x166   : > { %3804 = vmatpush.msra.mxu3 %v5844_v1  ;;  %3730 = vmatmul.msk.f32.gmra.mxu1 %vm672_vm9, %v395_v7 }
 0x168   : > { %3805 = vmatpush.msra.mxu3 %v5852_v4 }
 0x169   : > { %3741 = vmatmul.msk.f32.vlgmr.msra.gmra.mxu3 %vm672_vm9, %v398_v5 }
 0x16d   : > { %3723 = vmatmul.msk.f32.gmra.mxu0 %vm672_vm9, %v396_v13 }
 0x16e   : > { %3731 = vmatmul.msk.f32.gmra.mxu1 %vm672_vm9, %v396_v13 }
 0x187   : > { %v518_v12 = vpop.permute.xlu0 %517 }
 0x195   : > { %v523_v29 = vpop.permute.xlu1 %522 }
 0x197   : > { %v513_v14 = vpop.permute.xlu2 %512 }
 0x1a1   : > { %v5990_v20 = vpop.permute.xlu2 %527 }
 0x1a7   : > { %v6015_v63 = vpop.permute.xlu0 %542 }
 0x1a9   : > { %v538_v39 = vpop.permute.xlu2 %537 }
 0x1ae   : > { %v796_v51 = vpop.f32.mrf.mxu2 }
 0x1af   : > { %v797_v60 = vadd.f32 %v796_v51, %v508_v50 }
 0x1b1   : > { %v822_v1 = vmax.f32 %v797_v60, 0.0 }
 0x1b3   : > { %v855_v4 = vsel %vm5982_vm11, %v822_v1, 0.0 }
 0x1b4   : > { %879 = vst [vmem:[#allocation2 + $0x18] sm:$0xff] %v855_v4 }
 0x1b6   : > { %v799_v15 = vpop.f32.mrf.mxu2 }
 0x1b7   : > { %v800_v16 = vadd.f32 %v799_v15, %v513_v14 }
 0x1b9   : > { %v825_v17 = vmax.f32 %v800_v16, 0.0 }
 0x1ba   : > { %v533_v10 = vpop.permute.xlu1 %532 }
 0x1bb   : > { %v858_v18 = vsel %vm5982_vm11, %v825_v17, 0.0 }
 0x1bc   : > { %882 = vst [vmem:[#allocation2 + $0x40] sm:$0xff] %v858_v18 }
 0x1be   : > { %v802_v19 = vpop.f32.mrf.mxu2 }
 0x1bf   : > { %v803_v21 = vadd.f32 %v802_v19, %v518_v12 }
 0x1c1   : > { %v828_v24 = vmax.f32 %v803_v21, 0.0 }
 0x1c2   : > { %v714_v25 = vpop.f32.mrf.mxu0 }
 0x1c3   : > { %v715_v26 = vadd.f32 %v714_v25, %v508_v50  ;;  %v755_v9 = vpop.f32.mrf.mxu1  ;;  %v861_v11 = vsel %vm5982_vm11, %v828_v24, 0.0 }
 0x1c4   : > { %v756_v28 = vadd.f32 %v755_v9, %v508_v50  ;;  %885 = vst [vmem:[#allocation2 + $0x68] sm:$0xff] %v861_v11 }
 0x1c5   : > { %v820_v31 = vmax.f32 %v715_v26, 0.0 }
 0x1c6   : > { %v821_v33 = vmax.f32 %v756_v28, 0.0  ;;  %v805_v35 = vpop.f32.mrf.mxu2 }
 0x1c7   : > { %v853_v36 = vsel %vm5994_vm12, %v820_v31, 0.0  ;;  %v806_v37 = vadd.f32 %v805_v35, %v523_v29 }
 0x1c8   : > { %877 = vst [vmem:[#allocation2 + $0x8] sm:$0xff] %v853_v36  ;;  %v854_v38 = vsel %vm5998_vm13, %v821_v33, 0.0 }
 0x1c9   : > { %878 = vst [vmem:[#allocation2 + $0x10] sm:$0xff] %v854_v38  ;;  %v831_v40 = vmax.f32 %v806_v37, 0.0 }
 0x1ca   : > { %v717_v8 = vpop.f32.mrf.mxu0  ;;  %v732_v44 = vpop.f32.mrf.mxu3 }
 0x1cb   : > { %v718_v45 = vadd.f32 %v717_v8, %v513_v14  ;;  %v733_v47 = vadd.f32 %v732_v44, %v538_v39  ;;  %v758_v34 = vpop.f32.mrf.mxu1  ;;  %v864_v46 = vsel %vm5982_vm11, %v831_v40, 0.0 }
 0x1cc   : > { %v759_v48 = vadd.f32 %v758_v34, %v513_v14  ;;  %888 = vst [vmem:[#allocation2 + $0x90] sm:$0xff] %v864_v46 }
 0x1cd   : > { %v823_v53 = vmax.f32 %v718_v45, 0.0  ;;  %v838_v56 = vmax.f32 %v733_v47, 0.0 }
 0x1ce   : > { %v824_v58 = vmax.f32 %v759_v48, 0.0  ;;  %v808_v61 = vpop.f32.mrf.mxu2 }
 0x1cf   : > { %v856_v52 = vsel %vm5994_vm12, %v823_v53, 0.0  ;;  %v871_v54 = vsel %vm5994_vm12, %v838_v56, 0.0  ;;  %v809_v55 = vadd.f32 %v808_v61, %v5990_v20 }
 0x1d0   : > { %880 = vst [vmem:[#allocation2 + $0x30] sm:$0xff] %v856_v52  ;;  %v857_v57 = vsel %vm5998_vm13, %v824_v58, 0.0 }
 0x1d1   : > { %895 = vst [vmem:[#allocation2 + $0xf8] sm:$0xff] %v871_v54  ;;  %v834_v3 = vmax.f32 %v809_v55, 0.0 }
 0x1d2   : > { %881 = vst [vmem:[#allocation2 + $0x38] sm:$0xff] %v857_v57  ;;  %v720_v49 = vpop.f32.mrf.mxu0  ;;  %v735_v59 = vpop.f32.mrf.mxu3 }
 0x1d3   : > { %v867_v6 = vsel %vm5982_vm11, %v834_v3, 0.0  ;;  %v721_v7 = vadd.f32 %v720_v49, %v518_v12  ;;  %v736_v32 = vadd.f32 %v735_v59, %v6015_v63  ;;  %v761_v62 = vpop.f32.mrf.mxu1 }
 0x1d4   : > { %891 = vst [vmem:[#allocation2 + $0xb8] sm:$0xff] %v867_v6  ;;  %v762_v5 = vadd.f32 %v761_v62, %v518_v12 }
 0x1d5   : > { %v826_v13 = vmax.f32 %v721_v7, 0.0  ;;  %v841_v41 = vmax.f32 %v736_v32, 0.0 }
 0x1d6   : > { %v827_v42 = vmax.f32 %v762_v5, 0.0  ;;  %v811_v43 = vpop.f32.mrf.mxu2 }
 0x1d7   : > { %v859_v50 = vsel %vm5994_vm12, %v826_v13, 0.0  ;;  %v874_v51 = vsel %vm5994_vm12, %v841_v41, 0.0  ;;  %v812_v60 = vadd.f32 %v811_v43, %v533_v10 }
 0x1d8   : > { %883 = vst [vmem:[#allocation2 + $0x58] sm:$0xff] %v859_v50  ;;  %v860_v1 = vsel %vm5998_vm13, %v827_v42, 0.0 }
 0x1d9   : > { %898 = vst [vmem:[#allocation2 + $0x120] sm:$0xff] %v874_v51  ;;  %v837_v4 = vmax.f32 %v812_v60, 0.0 }
 0x1da   : > { %884 = vst [vmem:[#allocation2 + $0x60] sm:$0xff] %v860_v1  ;;  %v723_v14 = vpop.f32.mrf.mxu0  ;;  %v773_v18 = vpop.f32.mrf.mxu3 }
 0x1db   : > { %v870_v15 = vsel %vm5982_vm11, %v837_v4, 0.0  ;;  %v724_v16 = vadd.f32 %v723_v14, %v523_v29  ;;  %v764_v17 = vpop.f32.mrf.mxu1  ;;  %v774_v19 = vadd.f32 %v773_v18, %v538_v39 }
 0x1dc   : > { %894 = vst [vmem:[#allocation2 + $0xe0] sm:$0xff] %v870_v15  ;;  %v765_v12 = vadd.f32 %v764_v17, %v523_v29 }
 0x1dd   : > { %v829_v21 = vmax.f32 %v724_v16, 0.0  ;;  %v839_v23 = vmax.f32 %v774_v19, 0.0 }
 0x1de   : > { %v830_v22 = vmax.f32 %v765_v12, 0.0  ;;  %v814_v24 = vpop.f32.mrf.mxu2 }
 0x1df   : > { %v862_v25 = vsel %vm5994_vm12, %v829_v21, 0.0  ;;  %v815_v26 = vadd.f32 %v814_v24, %v538_v39  ;;  %v872_v11 = vsel %vm5998_vm13, %v839_v23, 0.0 }
 0x1e0   : > { %886 = vst [vmem:[#allocation2 + $0x80] sm:$0xff] %v862_v25  ;;  %v863_v9 = vsel %vm5998_vm13, %v830_v22, 0.0 }
 0x1e1   : > { %887 = vst [vmem:[#allocation2 + $0x88] sm:$0xff] %v863_v9  ;;  %v840_v28 = vmax.f32 %v815_v26, 0.0 }
 0x1e2   : > { %896 = vst [vmem:[#allocation2 + $0x100] sm:$0xff] %v872_v11  ;;  %v726_v29 = vpop.f32.mrf.mxu0  ;;  %v776_v36 = vpop.f32.mrf.mxu3 }
 0x1e3   : > { %v873_v31 = vsel %vm5982_vm11, %v840_v28, 0.0  ;;  %v727_v33 = vadd.f32 %v726_v29, %v5990_v20  ;;  %v767_v35 = vpop.f32.mrf.mxu1  ;;  %v777_v38 = vadd.f32 %v776_v36, %v6015_v63 }
 0x1e4   : > { %897 = vst [vmem:[#allocation2 + $0x108] sm:$0xff] %v873_v31  ;;  %v768_v37 = vadd.f32 %v767_v35, %v5990_v20 }
 0x1e5   : > { %v832_v39 = vmax.f32 %v727_v33, 0.0  ;;  %v842_v8 = vmax.f32 %v777_v38, 0.0 }
 0x1e6   : > { %v833_v40 = vmax.f32 %v768_v37, 0.0 }
 0x1e7   : > { %v865_v44 = vsel %vm5994_vm12, %v832_v39, 0.0  ;;  %v875_v47 = vsel %vm5998_vm13, %v842_v8, 0.0 }
 0x1e8   : > { %889 = vst [vmem:[#allocation2 + $0xa8] sm:$0xff] %v865_v44  ;;  %v866_v45 = vsel %vm5998_vm13, %v833_v40, 0.0 }
 0x1e9   : > { %890 = vst [vmem:[#allocation2 + $0xb0] sm:$0xff] %v866_v45 }
 0x1ea   : > { %899 = vst [vmem:[#allocation2 + $0x128] sm:$0xff] %v875_v47  ;;  %v729_v34 = vpop.f32.mrf.mxu0 }
 0x1eb   : > { %v730_v46 = vadd.f32 %v729_v34, %v533_v10  ;;  %v770_v20 = vpop.f32.mrf.mxu1 }
 0x1ec   : > { %v817_v48 = vpop.f32.mrf.mxu3  ;;  %v771_v53 = vadd.f32 %v770_v20, %v533_v10 }
 0x1ed   : > { %v818_v56 = vadd.f32 %v817_v48, %v6015_v63  ;;  %v835_v58 = vmax.f32 %v730_v46, 0.0 }
 0x1ee   : > { %v836_v61 = vmax.f32 %v771_v53, 0.0 }
 0x1ef   : > { %v843_v52 = vmax.f32 %v818_v56, 0.0  ;;  %v868_v54 = vsel %vm5994_vm12, %v835_v58, 0.0 }
 0x1f0   : > { %892 = vst [vmem:[#allocation2 + $0xd0] sm:$0xff] %v868_v54  ;;  %v869_v55 = vsel %vm5998_vm13, %v836_v61, 0.0 }
 0x1f1   : > { %v876_v57 = vsel %vm5982_vm11, %v843_v52, 0.0  ;;  %893 = vst [vmem:[#allocation2 + $0xd8] sm:$0xff] %v869_v55 }
 0x1f2   : > { %900 = vst [vmem:[#allocation2 + $0x130] sm:$0xff] %v876_v57 }
 0x1f3 LB: >> { %p907_p7 = scmp.lt.s32.totalorder %s5554_s22, 0  ;;  %s908_s23 = ssub.s32 0, %s5554_s22  ;;  %vm2778_vm14 = vcmask 523264   ;;  %s5554_s22 = sphi %s6052_s22, %s906_s22  }
 0x1f4   : >> { %s3742_s24 = smin.u32 %s5554_s22, %s908_s23  ;;  %s5574_s30 = smov 127  }
 0x1f5   : >> { %s910_s25 = sand.u32 1, %s3742_s24   ;;  %s5575_s10 = smov 126  }
 0x1f6   : >> { %s911_s26 = ssub.s32 0, %s910_s25  ;;  %s5576_s11 = smov 110  }
 0x1f7   : >> { %s10430_s26 = smov (!%p907_p7, %s911_s26), %s910_s25  ;;  %s5577_s12 = smov 109  }
 0x1f8   : >> { %s3777_s28 = smul.u32 320, %s10430_s26  ;;  %s5578_s13 = smov 108  }
 0x1f9   : >> { %s5579_s14 = smov 92   ;;  %s5580_s9 = smov 91  }
 0x1fa   : >> { %s6063_s29 = scalar_lea.vmem [#allocation2], %s3777_s28  ;;  %s5581_s16 = smov 90  }
 0x1fb   : >> { %v980_v0 = vld [vmem:[%s6063_s29 + $0x50] sm:$0xff]  ;;  %v6067_v27 = vld [vmem:[%s6063_s29 + $0x58] sm:$0xff]  ;;  %v975_v30 = vld [vmem:[%s6063_s29 + $0x28] sm:$0xff]  ;;  %s3744_s17 = sshll.u32 %s5554_s22, 6  ;;  %s5583_s21 = smov 19  }
 0x1fc   : >> { %v6071_v63 = vpack.i.bf16 %v6067_v27, %v980_v0  ;;  %v6074_v3 = vld [vmem:[%s6063_s29 + $0x30] sm:$0xff]  ;;  %v970_v49 = vld [vmem:[%s6063_s29] sm:$0xff]  ;;  %v6078_v59 = vld [vmem:[%s6063_s29 + $0x8] sm:$0xff]  ;;  %s958_s20 = scalar_lea.vmem %s9488_s4, %s3744_s17  ;;  %s3776_s23 = smul.u32 320, %s5554_s22 }
 0x1fd   : >> { %v6081_v6 = vpack.i.bf16 %v6074_v3, %v975_v30  ;;  %v6084_v7 = vpack.i.bf16 %v6078_v59, %v970_v49  ;;  %v6089_v32 = vld [vmem:[%s6063_s29 + $0x60] sm:$0xff]  ;;  %v6096_v62 = vld [vmem:[%s6063_s29 + $0x68] sm:$0xff]  ;;  %v6099_v5 = vld [vmem:[%s6063_s29 + $0x38] sm:$0xff]  ;;  %s906_s22 = sadd.s32 1, %s5554_s22  }
 0x1fe   : >> { %4101 = vrot.lane.b32.xlu2 %v6071_v63, %s5574_s30  ;;  %v6102_v10 = vld [vmem:[%s6063_s29 + $0x40] sm:$0xff]  ;;  %v6105_v13 = vld [vmem:[%s6063_s29 + $0x10] sm:$0xff]  ;;  %v6108_v41 = vld [vmem:[%s6063_s29 + $0x18] sm:$0xff]  ;;  %v6112_v42 = vpack.i.bf16 %v6096_v62, %v6089_v32  ;;  %v6301_v0 = vpack.i.bf16 %v6089_v32, %v6067_v27  ;;  %s7653_s24 = scalar_lea.vmem [#allocation5], %s3776_s23  ;;  %p903_p8 = scmp.ge.s32.totalorder %s906_s22, 15  }
 0x1ff   : >> { %4091 = vrot.lane.b32.xlu1 %v6081_v6, %s5574_s30  ;;  %4081 = vrot.lane.b32.xlu0 %v6084_v7, %s5574_s30  ;;  %v6116_v43 = vpack.i.bf16 %v6102_v10, %v6099_v5  ;;  %v6120_v50 = vpack.i.bf16 %v6108_v41, %v6105_v13  ;;  %v990_v51 = vld [vmem:[%s6063_s29 + $0xa0] sm:$0xff]  ;;  %v6130_v60 = vld [vmem:[%s6063_s29 + $0xa8] sm:$0xff]  ;;  %v4325_v58 = vpack.i.bf16 %v6074_v3, %v6108_v41 }
 0x200   : >> { %v6133_v1 = vld [vmem:[%s6063_s29 + $0x88] sm:$0xff]  ;;  %v6136_v4 = vld [vmem:[%s6063_s29 + $0x90] sm:$0xff]  ;;  %v985_v14 = vld [vmem:[%s6063_s29 + $0x78] sm:$0xff]  ;;  %v6143_v16 = vpack.i.bf16 %v6130_v60, %v990_v51  ;;  %v6287_v61 = vpack.i.bf16 %v6105_v13, %v6078_v59 }
 0x201   : >> { %v6140_v15 = vld [vmem:[%s6063_s29 + $0x80] sm:$0xff]  ;;  %v6147_v17 = vpack.i.bf16 %v6136_v4, %v6133_v1  ;;  %v6155_v12 = vld [vmem:[%s6063_s29 + $0xd8] sm:$0xff]  ;;  %v995_v21 = vld [vmem:[%s6063_s29 + $0xc8] sm:$0xff] }
 0x202   : >> { %v6150_v18 = vpack.i.bf16 %v6140_v15, %v985_v14  ;;  %v6162_v19 = vld [vmem:[%s6063_s29 + $0xe0] sm:$0xff]  ;;  %v6166_v22 = vld [vmem:[%s6063_s29 + $0xd0] sm:$0xff]  ;;  %v6172_v24 = vld [vmem:[%s6063_s29 + $0xb8] sm:$0xff]  ;;  %v4340_v57 = vpack.i.bf16 %v6140_v15, %v6096_v62 }
 0x203   : >> { %v6169_v23 = vld [vmem:[%s6063_s29 + $0xb0] sm:$0xff]  ;;  %v6176_v25 = vpack.i.bf16 %v6162_v19, %v6155_v12  ;;  %v6179_v26 = vpack.i.bf16 %v6166_v22, %v995_v21  ;;  %v1005_v11 = vld [vmem:[%s6063_s29 + $0x118] sm:$0xff]  ;;  %v6193_v28 = vld [vmem:[%s6063_s29 + $0x120] sm:$0xff]  ;;  %v4355_v13 = vpack.i.bf16 %v6166_v22, %v6172_v24 }
 0x204   : >> { %v6183_v9 = vpack.i.bf16 %v6172_v24, %v6169_v23  ;;  %v6196_v29 = vld [vmem:[%s6063_s29 + $0x100] sm:$0xff]  ;;  %v6199_v31 = vld [vmem:[%s6063_s29 + $0x108] sm:$0xff]  ;;  %v1000_v33 = vld [vmem:[%s6063_s29 + $0xf0] sm:$0xff]  ;;  %v6206_v36 = vpack.i.bf16 %v6193_v28, %v1005_v11  ;;  %v6315_v51 = vpack.i.bf16 %v6169_v23, %v6130_v60 }
 0x205   : >> { %v6203_v35 = vld [vmem:[%s6063_s29 + $0xf8] sm:$0xff]  ;;  %v6210_v37 = vpack.i.bf16 %v6199_v31, %v6196_v29  ;;  %v6222_v39 = vld [vmem:[%s6063_s29 + $0x128] sm:$0xff]  ;;  %v6225_v40 = vld [vmem:[%s6063_s29 + $0x130] sm:$0xff]  ;;  %v4370_v21 = vpack.i.bf16 %v6193_v28, %v6199_v31 }
 0x206   : >> { %4106 = vrot.lane.b32.xlu2 %v6112_v42, %s5574_s30  ;;  %v6213_v38 = vpack.i.bf16 %v6203_v35, %v1000_v33  ;;  %v6229_v8 = vpack.i.bf16 %v6225_v40, %v6222_v39  ;;  %v6329_v11 = vpack.i.bf16 %v6196_v29, %v6203_v35  ;;  %v974_v23 = vld [vmem:[%s6063_s29 + $0x20] sm:$0xff]  ;;  %v984_v35 = vld [vmem:[%s6063_s29 + $0x70] sm:$0xff] }
 0x207   : >> { %4096 = vrot.lane.b32.xlu1 %v6116_v43, %s5574_s30  ;;  %4086 = vrot.lane.b32.xlu0 %v6120_v50, %s5574_s30  ;;  %v6345_v29 = vpack.i.bf16 %v974_v23, %v6108_v41  ;;  %v6362_v41 = vpack.i.bf16 %v984_v35, %v6096_v62 }
 0x20e   : >> { %4121 = vrot.lane.b32.xlu2 %v6143_v16, %s5574_s30 }
 0x20f   : >> { %4116 = vrot.lane.b32.xlu1 %v6147_v17, %s5574_s30  ;;  %4111 = vrot.lane.b32.xlu0 %v6150_v18, %s5574_s30 }
 0x216   : >> { %4136 = vrot.lane.b32.xlu2 %v6176_v25, %s5574_s30 }
 0x217   : >> { %4131 = vrot.lane.b32.xlu1 %v6179_v26, %s5574_s30  ;;  %4126 = vrot.lane.b32.xlu0 %v6183_v9, %s5574_s30 }
 0x21e   : >> { %4151 = vrot.lane.b32.xlu2 %v6206_v36, %s5574_s30 }
 0x21f   : >> { %4146 = vrot.lane.b32.xlu1 %v6210_v37, %s5574_s30  ;;  %4141 = vrot.lane.b32.xlu0 %v6213_v38, %s5574_s30 }
 0x226   : >> { %4166 = vrot.lane.b32.xlu2 %v6120_v50, %s5575_s10 }
 0x227   : >> { %4161 = vrot.lane.b32.xlu1 %v6084_v7, %s5575_s10  ;;  %4156 = vrot.lane.b32.xlu0 %v6229_v8, %s5574_s30 }
 0x22e   : >> { %4181 = vrot.lane.b32.xlu2 %v6071_v63, %s5575_s10 }
 0x22f   : >> { %4176 = vrot.lane.b32.xlu1 %v6116_v43, %s5575_s10  ;;  %4171 = vrot.lane.b32.xlu0 %v6081_v6, %s5575_s10 }
 0x236   : >> { %4196 = vrot.lane.b32.xlu2 %v6147_v17, %s5575_s10 }
 0x237   : >> { %4191 = vrot.lane.b32.xlu1 %v6150_v18, %s5575_s10  ;;  %4186 = vrot.lane.b32.xlu0 %v6112_v42, %s5575_s10 }
 0x23e   : >> { %4211 = vrot.lane.b32.xlu2 %v6179_v26, %s5575_s10 }
 0x23f   : >> { %4206 = vrot.lane.b32.xlu1 %v6183_v9, %s5575_s10  ;;  %4201 = vrot.lane.b32.xlu0 %v6143_v16, %s5575_s10 }
 0x246   : >> { %4226 = vrot.lane.b32.xlu2 %v6210_v37, %s5575_s10 }
 0x247   : >> { %4221 = vrot.lane.b32.xlu1 %v6213_v38, %s5575_s10  ;;  %4216 = vrot.lane.b32.xlu0 %v6176_v25, %s5575_s10 }
 0x24e   : >> { %4241 = vrot.lane.b32.xlu2 %v6084_v7, %s5576_s11 }
 0x24f   : >> { %4236 = vrot.lane.b32.xlu1 %v6229_v8, %s5575_s10  ;;  %4231 = vrot.lane.b32.xlu0 %v6206_v36, %s5575_s10 }
 0x256   : >> { %4256 = vrot.lane.b32.xlu2 %v6116_v43, %s5576_s11 }
 0x257   : >> { %4251 = vrot.lane.b32.xlu1 %v6081_v6, %s5576_s11  ;;  %4246 = vrot.lane.b32.xlu0 %v6120_v50, %s5576_s11 }
 0x258   : >> { %v6253_v44 = vpop.permute.xlu2 %4101 }
 0x25e   : >> { %4271 = vrot.lane.b32.xlu2 %v6150_v18, %s5576_s11 }
 0x25f   : >> { %4266 = vrot.lane.b32.xlu1 %v6112_v42, %s5576_s11  ;;  %4261 = vrot.lane.b32.xlu0 %v6071_v63, %s5576_s11 }
 0x260   : >> { %v6258_v45 = vpop.permute.xlu2 %4106 }
 0x266   : >> { %4286 = vrot.lane.b32.xlu2 %v6183_v9, %s5576_s11 }
 0x267   : >> { %4281 = vrot.lane.b32.xlu1 %v6143_v16, %s5576_s11  ;;  %4276 = vrot.lane.b32.xlu0 %v6147_v17, %s5576_s11 }
 0x268   : >> { %v6263_v47 = vpop.permute.xlu2 %4121 }
 0x26e   : >> { %4301 = vrot.lane.b32.xlu2 %v6213_v38, %s5576_s11 }
 0x26f   : >> { %4296 = vrot.lane.b32.xlu1 %v6176_v25, %s5576_s11  ;;  %4291 = vrot.lane.b32.xlu0 %v6179_v26, %s5576_s11 }
 0x270   : >> { %v6268_v34 = vpop.permute.xlu2 %4136 }
 0x271   : >> { %v6270_v46 = vpop.permute.xlu1 %4091  ;;  %v6272_v20 = vpop.permute.xlu0 %4081 }
 0x276   : >> { %4316 = vrot.lane.b32.xlu2 %v6229_v8, %s5576_s11 }
 0x277   : >> { %4311 = vrot.lane.b32.xlu1 %v6206_v36, %s5576_s11  ;;  %4306 = vrot.lane.b32.xlu0 %v6210_v37, %s5576_s11 }
 0x278   : >> { %v6277_v48 = vpop.permute.xlu2 %4151 }
 0x279   : >> { %9800 = vst [vmem:[#allocation10_spill] sm:$0xff] %v6277_v48  ;;  %v6279_v53 = vpop.permute.xlu1 %4096  ;;  %v6281_v56 = vpop.permute.xlu0 %4086 }
 0x27e   : >> { %4331 = vrot.lane.b32.xlu2 %v6116_v43, %s5577_s12 }
 0x27f   : >> { %4326 = vrot.lane.b32.xlu1 %v4325_v58, %s5577_s12  ;;  %4321 = vrot.lane.b32.xlu0 %v6287_v61, %s5577_s12 }
 0x280   : >> { %v6291_v52 = vpop.permute.xlu2 %4166 }
 0x281   : >> { %v6293_v54 = vpop.permute.xlu1 %4116  ;;  %v6295_v55 = vpop.permute.xlu0 %4111 }
 0x286   : >> { %4346 = vrot.lane.b32.xlu2 %v6147_v17, %s5577_s12 }
 0x287   : >> { %4341 = vrot.lane.b32.xlu1 %v4340_v57, %s5577_s12  ;;  %4336 = vrot.lane.b32.xlu0 %v6301_v0, %s5577_s12  ;;  %v6342_v57 = vpack.i.bf16 %v6099_v5, %v6074_v3 }
 0x288   : >> { %v6305_v30 = vpop.permute.xlu2 %4181 }
 0x289   : >> { %9801 = vst [vmem:[#allocation11_spill] sm:$0xff] %v6305_v30  ;;  %v6307_v49 = vpop.permute.xlu1 %4131  ;;  %v6309_v59 = vpop.permute.xlu0 %4126  ;;  %v994_v30 = vld [vmem:[%s6063_s29 + $0xc0] sm:$0xff] }
 0x28e   : >> { %4361 = vrot.lane.b32.xlu2 %v6176_v25, %s5577_s12 }
 0x28f   : >> { %4356 = vrot.lane.b32.xlu1 %v4355_v13, %s5577_s12  ;;  %4351 = vrot.lane.b32.xlu0 %v6315_v51, %s5577_s12 }
 0x290   : >> { %v6319_v27 = vpop.permute.xlu2 %4196 }
 0x291   : >> { %9802 = vst [vmem:[#allocation12_spill] sm:$0xff] %v6319_v27  ;;  %v6321_v32 = vpop.permute.xlu1 %4146  ;;  %v6323_v14 = vpop.permute.xlu0 %4141 }
 0x296   : >> { %4376 = vrot.lane.b32.xlu2 %v6229_v8, %s5577_s12 }
 0x297   : >> { %4371 = vrot.lane.b32.xlu1 %v4370_v21, %s5577_s12  ;;  %4366 = vrot.lane.b32.xlu0 %v6329_v11, %s5577_s12  ;;  %v979_v21 = vld [vmem:[%s6063_s29 + $0x48] sm:$0xff] }
 0x298   : >> { %v6333_v60 = vpop.permute.xlu2 %4211  ;;  %v6365_v23 = vpack.i.bf16 %v979_v21, %v6102_v10  ;;  %v6385_v10 = vpack.i.bf16 %v6133_v1, %v6140_v15  ;;  %v999_v21 = vld [vmem:[%s6063_s29 + $0xe8] sm:$0xff]  ;;  %v6406_v15 = vpack.i.bf16 %v6155_v12, %v6166_v22  ;;  %v6426_v12 = vpack.i.bf16 %v6222_v39, %v6193_v28 }
 0x299   : >> { %9803 = vst [vmem:[#allocation13_spill] sm:$0xff] %v6333_v60  ;;  %v6336_v33 = vpop.permute.xlu1 %4161  ;;  %v6338_v58 = vpop.permute.xlu0 %4156  ;;  %v989_v60 = vld [vmem:[%s6063_s29 + $0x98] sm:$0xff]  ;;  %v6402_v1 = vpack.i.bf16 %v999_v21, %v6162_v19  ;;  %v1004_v19 = vld [vmem:[%s6063_s29 + $0x110] sm:$0xff] }
 0x29a   : >> { %9804 = vst [vmem:[#allocation14_spill] sm:$0xff] %v6336_v33  ;;  %v6381_v35 = vpack.i.bf16 %v989_v60, %v6136_v4  ;;  %v6429_v22 = vpack.i.bf16 %v1004_v19, %v6199_v31 }
 0x29b   : >> { %9805 = vst [vmem:[#allocation15_spill] sm:$0xff] %v6338_v58 }
 0x29e   : >> { %4391 = vrot.lane.b32.xlu2 %v6342_v57, %s5578_s13 }
 0x29f   : >> { %4386 = vrot.lane.b32.xlu1 %v6345_v29, %s5578_s13  ;;  %4381 = vrot.lane.b32.xlu0 %v6287_v61, %s5578_s13 }
 0x2a0   : >> { %v6354_v13 = vpop.permute.xlu2 %4226 }
 0x2a1   : >> { %9806 = vst [vmem:[#allocation16_spill] sm:$0xff] %v6354_v13  ;;  %v6357_v3 = vpop.permute.xlu1 %4176  ;;  %v6359_v5 = vpop.permute.xlu0 %4171 }
 0x2a2   : >> { %9807 = vst [vmem:[#allocation17_spill] sm:$0xff] %v6357_v3 }
 0x2a3   : >> { %9808 = vst [vmem:[#allocation18_spill] sm:$0xff] %v6359_v5 }
 0x2a6   : >> { %4406 = vrot.lane.b32.xlu2 %v6362_v41, %s5578_s13 }
 0x2a7   : >> { %4401 = vrot.lane.b32.xlu1 %v6301_v0, %s5578_s13  ;;  %4396 = vrot.lane.b32.xlu0 %v6365_v23, %s5578_s13 }
 0x2a8   : >> { %v6373_v2 = vpop.permute.xlu2 %4241 }
 0x2a9   : >> { %9809 = vst [vmem:[#allocation19_spill] sm:$0xff] %v6373_v2  ;;  %v6376_v13 = vpop.permute.xlu1 %4191  ;;  %v6378_v62 = vpop.permute.xlu0 %4186 }
 0x2aa   : >> { %9810 = vst [vmem:[#allocation20_spill] sm:$0xff] %v6376_v13 }
 0x2ab   : >> { %9811 = vst [vmem:[#allocation21_spill] sm:$0xff] %v6378_v62  ;;  %v6409_v62 = vpack.i.bf16 %v994_v30, %v6172_v24  ;;  %v1009_v30 = vld [vmem:[%s6063_s29 + $0x138] sm:$0xff]  ;;  %s913_s29 = ssub.s32 1, %s10430_s26 }
 0x2ac   : >> { %v6445_v28 = vpack.i.bf16 %v1009_v30, %v6225_v40  ;;  %s3778_s30 = smul.u32 320, %s913_s29 }
 0x2ae   : >> { %4421 = vrot.lane.b32.xlu2 %v6315_v51, %s5578_s13  ;;  %s9293_s26 = scalar_lea.vmem [#allocation2], %s3778_s30 }
 0x2af   : >> { %4416 = vrot.lane.b32.xlu1 %v6381_v35, %s5578_s13  ;;  %4411 = vrot.lane.b32.xlu0 %v6385_v10, %s5578_s13 }
 0x2b0   : >> { %v6394_v2 = vpop.permute.xlu2 %4256 }
 0x2b1   : >> { %9812 = vst [vmem:[#allocation22_spill] sm:$0xff] %v6394_v2  ;;  %v6397_v4 = vpop.permute.xlu1 %4206  ;;  %v6399_v60 = vpop.permute.xlu0 %4201 }
 0x2b2   : >> { %9813 = vst [vmem:[#allocation23_spill] sm:$0xff] %v6397_v4 }
 0x2b3   : >> { %9814 = vst [vmem:[#allocation24_spill] sm:$0xff] %v6399_v60 }
 0x2b6   : >> { %4436 = vrot.lane.b32.xlu2 %v6402_v1, %s5578_s13 }
 0x2b7   : >> { %4431 = vrot.lane.b32.xlu1 %v6406_v15, %s5578_s13  ;;  %4426 = vrot.lane.b32.xlu0 %v6409_v62, %s5578_s13 }
 0x2b8   : >> { %v6417_v2 = vpop.permute.xlu2 %4271 }
 0x2b9   : >> { %9815 = vst [vmem:[#allocation25_spill] sm:$0xff] %v6417_v2  ;;  %v6420_v21 = vpop.permute.xlu1 %4221  ;;  %v6422_v60 = vpop.permute.xlu0 %4216 }
 0x2ba   : >> { %9816 = vst [vmem:[#allocation26_spill] sm:$0xff] %v6420_v21 }
 0x2bb   : >> { %9817 = vst [vmem:[#allocation27_spill] sm:$0xff] %v6422_v60 }
 0x2be   : >> { %4451 = vrot.lane.b32.xlu2 %v6426_v12, %s5578_s13 }
 0x2bf   : >> { %4446 = vrot.lane.b32.xlu1 %v6429_v22, %s5578_s13  ;;  %4441 = vrot.lane.b32.xlu0 %v6329_v11, %s5578_s13 }
 0x2c0   : >> { %v6437_v24 = vpop.permute.xlu2 %4286 }
 0x2c1   : >> { %9818 = vst [vmem:[#allocation28_spill] sm:$0xff] %v6437_v24  ;;  %v6440_v2 = vpop.permute.xlu1 %4236  ;;  %v6442_v21 = vpop.permute.xlu0 %4231 }
 0x2c2   : >> { %9819 = vst [vmem:[#allocation29_spill] sm:$0xff] %v6440_v2 }
 0x2c3   : >> { %9820 = vst [vmem:[#allocation30_spill] sm:$0xff] %v6442_v21 }
 0x2c6   : >> { %4466 = vrot.lane.b32.xlu2 %v6345_v29, %s5579_s14 }
 0x2c7   : >> { %4461 = vrot.lane.b32.xlu1 %v6287_v61, %s5579_s14  ;;  %4456 = vrot.lane.b32.xlu0 %v6445_v28, %s5578_s13 }
 0x2c8   : >> { %v6453_v31 = vpop.permute.xlu2 %4301 }
 0x2c9   : >> { %9821 = vst [vmem:[#allocation31_spill] sm:$0xff] %v6453_v31  ;;  %v6455_v39 = vpop.permute.xlu1 %4251  ;;  %v6457_v19 = vpop.permute.xlu0 %4246 }
 0x2ca   : >> { %9822 = vst [vmem:[#allocation32_spill] sm:$0xff] %v6455_v39 }
 0x2cb   : >> { %9823 = vst [vmem:[#allocation33_spill] sm:$0xff] %v6457_v19 }
 0x2ce   : >> { %4481 = vrot.lane.b32.xlu2 %v6301_v0, %s5579_s14 }
 0x2cf   : >> { %4476 = vrot.lane.b32.xlu1 %v6365_v23, %s5579_s14  ;;  %4471 = vrot.lane.b32.xlu0 %v6342_v57, %s5579_s14 }
 0x2d0   : >> { %v6465_v40 = vpop.permute.xlu2 %4316 }
 0x2d1   : >> { %9824 = vst [vmem:[#allocation34_spill] sm:$0xff] %v6465_v40  ;;  %v6467_v30 = vpop.permute.xlu1 %4266  ;;  %v6469_v24 = vpop.permute.xlu0 %4261 }
 0x2d2   : >> { %9825 = vst [vmem:[#allocation35_spill] sm:$0xff] %v6467_v30 }
 0x2d3   : >> { %9826 = vst [vmem:[#allocation36_spill] sm:$0xff] %v6469_v24 }
 0x2d6   : >> { %4496 = vrot.lane.b32.xlu2 %v6381_v35, %s5579_s14 }
 0x2d7   : >> { %4491 = vrot.lane.b32.xlu1 %v6385_v10, %s5579_s14  ;;  %4486 = vrot.lane.b32.xlu0 %v6362_v41, %s5579_s14 }
 0x2d8   : >> { %v6477_v31 = vpop.permute.xlu2 %4331 }
 0x2d9   : >> { %9827 = vst [vmem:[#allocation37_spill] sm:$0xff] %v6477_v31  ;;  %v6479_v19 = vpop.permute.xlu1 %4281  ;;  %v6481_v39 = vpop.permute.xlu0 %4276 }
 0x2da   : >> { %9828 = vst [vmem:[#allocation38_spill] sm:$0xff] %v6479_v19 }
 0x2db   : >> { %9829 = vst [vmem:[#allocation39_spill] sm:$0xff] %v6481_v39 }
 0x2de   : >> { %4511 = vrot.lane.b32.xlu2 %v6406_v15, %s5579_s14 }
 0x2df   : >> { %4506 = vrot.lane.b32.xlu1 %v6409_v62, %s5579_s14  ;;  %4501 = vrot.lane.b32.xlu0 %v6315_v51, %s5579_s14 }
 0x2e0   : >> { %v6489_v40 = vpop.permute.xlu2 %4346 }
 0x2e1   : >> { %9830 = vst [vmem:[#allocation40_spill] sm:$0xff] %v6489_v40  ;;  %v6491_v24 = vpop.permute.xlu1 %4296  ;;  %v6493_v30 = vpop.permute.xlu0 %4291 }
 0x2e2   : >> { %9831 = vst [vmem:[#allocation41_spill] sm:$0xff] %v6491_v24 }
 0x2e3   : >> { %9832 = vst [vmem:[#allocation42_spill] sm:$0xff] %v6493_v30 }
 0x2e6   : >> { %4526 = vrot.lane.b32.xlu2 %v6429_v22, %s5579_s14 }
 0x2e7   : >> { %4521 = vrot.lane.b32.xlu1 %v6329_v11, %s5579_s14  ;;  %4516 = vrot.lane.b32.xlu0 %v6402_v1, %s5579_s14 }
 0x2e8   : >> { %v6501_v31 = vpop.permute.xlu2 %4361 }
 0x2e9   : >> { %9833 = vst [vmem:[#allocation43_spill] sm:$0xff] %v6501_v31  ;;  %v6503_v19 = vpop.permute.xlu1 %4311  ;;  %v6505_v39 = vpop.permute.xlu0 %4306 }
 0x2ea   : >> { %9834 = vst [vmem:[#allocation44_spill] sm:$0xff] %v6503_v19 }
 0x2eb   : >> { %9835 = vst [vmem:[#allocation45_spill] sm:$0xff] %v6505_v39 }
 0x2ee   : >> { %4541 = vrot.lane.b32.xlu2 %v6287_v61, %s5580_s9 }
 0x2ef   : >> { %4536 = vrot.lane.b32.xlu1 %v6445_v28, %s5579_s14  ;;  %4531 = vrot.lane.b32.xlu0 %v6426_v12, %s5579_s14 }
 0x2f0   : >> { %v6513_v30 = vpop.permute.xlu2 %4376 }
 0x2f1   : >> { %9836 = vst [vmem:[#allocation46_spill] sm:$0xff] %v6513_v30  ;;  %v6515_v24 = vpop.permute.xlu1 %4326  ;;  %v6517_v21 = vpop.permute.xlu0 %4321  ;;  %v9532_v60 = vunpack.i.h.bf16 %v6513_v30 }
 0x2f2   : >> { %9837 = vst [vmem:[#allocation47_spill] sm:$0xff] %v6515_v24 }
 0x2f3   : >> { %9838 = vst [vmem:[#allocation48_spill] sm:$0xff] %v6517_v21 }
 0x2f6   : >> { %4556 = vrot.lane.b32.xlu2 %v6365_v23, %s5580_s9 }
 0x2f7   : >> { %4551 = vrot.lane.b32.xlu1 %v6342_v57, %s5580_s9  ;;  %4546 = vrot.lane.b32.xlu0 %v6345_v29, %s5580_s9 }
 0x2f8   : >> { %v6525_v31 = vpop.permute.xlu2 %4391 }
 0x2f9   : >> { %v6527_v39 = vpop.permute.xlu1 %4341  ;;  %v6529_v19 = vpop.permute.xlu0 %4336 }
 0x2fa   : >> { %9839 = vst [vmem:[#allocation49_spill] sm:$0xff] %v6527_v39  ;;  %v9533_v39 = vunpack.i.l.bf16 %v6513_v30 }
 0x2fb   : >> { %9840 = vst [vmem:[#allocation50_spill] sm:$0xff] %v6529_v19 }
 0x2fe   : >> { %4571 = vrot.lane.b32.xlu2 %v6385_v10, %s5580_s9 }
 0x2ff   : >> { %4566 = vrot.lane.b32.xlu1 %v6362_v41, %s5580_s9  ;;  %4561 = vrot.lane.b32.xlu0 %v6301_v0, %s5580_s9 }
 0x300   : >> { %v6537_v24 = vpop.permute.xlu2 %4406 }
 0x301   : >> { %9841 = vst [vmem:[#allocation51_spill] sm:$0xff] %v6537_v24  ;;  %v6539_v21 = vpop.permute.xlu1 %4356  ;;  %v6541_v2 = vpop.permute.xlu0 %4351 }
 0x302   : >> { %9842 = vst [vmem:[#allocation52_spill] sm:$0xff] %v6539_v21 }
 0x303   : >> { %9843 = vst [vmem:[#allocation53_spill] sm:$0xff] %v6541_v2  ;;  %v6562_v2 = vsel %vm453_vm3, %v9533_v39, %v9532_v60 }
 0x304   : >> { %9846 = vst [vmem:[#allocation56_spill] sm:$0xff] %v6562_v2 }
 0x306   : >> { %4586 = vrot.lane.b32.xlu2 %v6409_v62, %s5580_s9 }
 0x307   : >> { %4581 = vrot.lane.b32.xlu1 %v6315_v51, %s5580_s9  ;;  %4576 = vrot.lane.b32.xlu0 %v6381_v35, %s5580_s9 }
 0x308   : >> { %v6551_v19 = vpop.permute.xlu2 %4421 }
 0x309   : >> { %v6553_v4 = vpop.permute.xlu1 %4371  ;;  %v6555_v21 = vpop.permute.xlu0 %4366 }
 0x30a   : >> { %9844 = vst [vmem:[#allocation54_spill] sm:$0xff] %v6553_v4  ;;  %v9536_v13 = vunpack.i.l.bf16 %v6553_v4  ;;  %v9537_v27 = vunpack.i.h.bf16 %v6555_v21 }
 0x30b   : >> { %9845 = vst [vmem:[#allocation55_spill] sm:$0xff] %v6555_v21  ;;  %v9552_v21 = vunpack.i.h.bf16 %v6525_v31 }
 0x30c   : >> { %v6571_v5 = vsel %vm453_vm3, %v9537_v27, %v9536_v13 }
 0x30d   : >> { %9847 = vst [vmem:[#allocation57_spill] sm:$0xff] %v6571_v5 }
 0x30e   : >> { %4601 = vrot.lane.b32.xlu2 %v6329_v11, %s5580_s9 }
 0x30f   : >> { %4596 = vrot.lane.b32.xlu1 %v6402_v1, %s5580_s9  ;;  %4591 = vrot.lane.b32.xlu0 %v6406_v15, %s5580_s9 }
 0x310   : >> { %v6581_v60 = vpop.permute.xlu2 %4436 }
 0x311   : >> { %9848 = vst [vmem:[#allocation58_spill] sm:$0xff] %v6581_v60  ;;  %v6583_v39 = vpop.permute.xlu1 %4386  ;;  %v6585_v30 = vpop.permute.xlu0 %4381 }
 0x312   : >> { %9849 = vst [vmem:[#allocation59_spill] sm:$0xff] %v6583_v39  ;;  %v9547_v13 = vunpack.i.l.bf16 %v6583_v39  ;;  %v9548_v3 = vunpack.i.h.bf16 %v6585_v30 }
 0x314   : >> { %v6608_v48 = vsel %vm465_vm4, %v9548_v3, %v9547_v13  ;;  %v9556_v13 = vunpack.i.l.bf16 %v6537_v24 }
 0x315   : >> { %9851 = vst [vmem:[#allocation61_spill] sm:$0xff] %v6608_v48 }
 0x316   : >> { %4616 = vrot.lane.b32.xlu2 %v6445_v28, %s5580_s9 }
 0x317   : >> { %4611 = vrot.lane.b32.xlu1 %v6426_v12, %s5580_s9  ;;  %4606 = vrot.lane.b32.xlu0 %v6429_v22, %s5580_s9 }
 0x318   : >> { %v6595_v27 = vpop.permute.xlu2 %4451 }
 0x319   : >> { %v6597_v2 = vpop.permute.xlu1 %4401  ;;  %v6599_v5 = vpop.permute.xlu0 %4396 }
 0x31a   : >> { %9850 = vst [vmem:[#allocation60_spill] sm:$0xff] %v6599_v5  ;;  %v9551_v4 = vunpack.i.l.bf16 %v6599_v5  ;;  %v9557_v3 = vunpack.i.h.bf16 %v6597_v2  ;;  %v9568_v5 = vunpack.i.h.bf16 %v6551_v19 }
 0x31c   : >> { %v6615_v58 = vsel %vm465_vm4, %v9552_v21, %v9551_v4 }
 0x31d   : >> { %9852 = vst [vmem:[#allocation62_spill] sm:$0xff] %v6615_v58  ;;  %v9929_v58 = vld [vmem:[#allocation30_spill] sm:$0xff] }
 0x31e   : >> { %4631 = vrot.lane.b32.xlu2 %v6342_v57, %s5581_s16 }
 0x31f   : >> { %4626 = vrot.lane.b32.xlu1 %v6345_v29, %s5581_s16  ;;  %4621 = vrot.lane.b32.xlu0 %v6287_v61, %s5581_s16  ;;  %v6640_v61 = vsel %vm465_vm4, %v9557_v3, %v9556_v13  ;;  %v9563_v13 = vunpack.i.l.bf16 %v6581_v60  ;;  %v962_v60 = vld [vmem:[%s958_s20 + $0x18] sm:$0xff] }
 0x320   : >> { %v6627_v39 = vpop.permute.xlu2 %4466  ;;  %9855 = vst [vmem:[#allocation65_spill] sm:$0xff] %v6640_v61 }
 0x321   : >> { %9853 = vst [vmem:[#allocation63_spill] sm:$0xff] %v6627_v39  ;;  %v6629_v4 = vpop.permute.xlu1 %4416  ;;  %v6631_v21 = vpop.permute.xlu0 %4411  ;;  %v9560_v39 = vmov 0  }
 0x322   : >> { %9854 = vst [vmem:[#allocation64_spill] sm:$0xff] %v6629_v4  ;;  %v9558_v33 = vunpack.i.l.bf16 %v6629_v4  ;;  %v9559_v57 = vunpack.i.h.bf16 %v6631_v21  ;;  %4700 = vset.pattern.permute.xlu1 %v9560_v39  ;;  %4701 = vset.pattern.permute.xlu2 %v9560_v39 }
 0x323   : >> { %4702 = vset.pattern.permute.xlu0 %v9560_v39 }
 0x324   : >> { %v6647_v29 = vsel %vm465_vm4, %v9559_v57, %v9558_v33 }
 0x325   : >> { %9856 = vst [vmem:[#allocation66_spill] sm:$0xff] %v6647_v29 }
 0x326   : >> { %4646 = vrot.lane.b32.xlu2 %v6362_v41, %s5581_s16 }
 0x327   : >> { %4641 = vrot.lane.b32.xlu1 %v6301_v0, %s5581_s16  ;;  %4636 = vrot.lane.b32.xlu0 %v6365_v23, %s5581_s16 }
 0x328   : >> { %v6659_v3 = vpop.permute.xlu2 %4481 }
 0x329   : >> { %v6663_v33 = vpop.permute.xlu1 %4431  ;;  %v6665_v41 = vpop.permute.xlu0 %4426 }
 0x32a   : >> { %9857 = vst [vmem:[#allocation67_spill] sm:$0xff] %v6665_v41  ;;  %v9564_v57 = vunpack.i.h.bf16 %v6663_v33  ;;  %v9567_v0 = vunpack.i.l.bf16 %v6665_v41  ;;  %v960_v41 = vld [vmem:[%s958_s20 + $0x8] sm:$0xff] }
 0x32c   : >> { %v6675_v23 = vsel %vm465_vm4, %v9564_v57, %v9563_v13  ;;  %v6682_v39 = vsel %vm465_vm4, %v9568_v5, %v9567_v0  ;;  %v9574_v5 = vunpack.i.h.bf16 %v6595_v27 }
 0x32d   : >> { %9858 = vst [vmem:[#allocation68_spill] sm:$0xff] %v6675_v23 }
 0x32e   : >> { %9859 = vst [vmem:[#allocation69_spill] sm:$0xff] %v6682_v39  ;;  %4661 = vrot.lane.b32.xlu2 %v6315_v51, %s5581_s16 }
 0x32f   : >> { %4656 = vrot.lane.b32.xlu1 %v6381_v35, %s5581_s16  ;;  %4651 = vrot.lane.b32.xlu0 %v6385_v10, %s5581_s16 }
 0x330   : >> { %v6692_v13 = vpop.permute.xlu2 %4496 }
 0x331   : >> { %9860 = vst [vmem:[#allocation70_spill] sm:$0xff] %v6692_v13  ;;  %v6694_v57 = vpop.permute.xlu1 %4446  ;;  %v6696_v24 = vpop.permute.xlu0 %4441 }
 0x332   : >> { %9861 = vst [vmem:[#allocation71_spill] sm:$0xff] %v6694_v57  ;;  %v9571_v51 = vunpack.i.l.bf16 %v6694_v57  ;;  %v9573_v35 = vunpack.i.h.bf16 %v6696_v24  ;;  %v963_v57 = vld [vmem:[%s958_s20 + $0x20] sm:$0xff] }
 0x336   : >> { %4676 = vrot.lane.b32.xlu2 %v6402_v1, %s5581_s16 }
 0x337   : >> { %4671 = vrot.lane.b32.xlu1 %v6406_v15, %s5581_s16  ;;  %4666 = vrot.lane.b32.xlu0 %v6409_v62, %s5581_s16  ;;  %v6719_v62 = vsel %vm465_vm4, %v9573_v35, %v9571_v51 }
 0x338   : >> { %v6706_v10 = vpop.permute.xlu2 %4511  ;;  %9863 = vst [vmem:[#allocation73_spill] sm:$0xff] %v6719_v62 }
 0x339   : >> { %v6708_v0 = vpop.permute.xlu1 %4461  ;;  %v6710_v4 = vpop.permute.xlu0 %4456 }
 0x33a   : >> { %9862 = vst [vmem:[#allocation72_spill] sm:$0xff] %v6710_v4  ;;  %v9572_v1 = vunpack.i.l.bf16 %v6710_v4  ;;  %v961_v4 = vld [vmem:[%s958_s20 + $0x10] sm:$0xff] }
 0x33c   : >> { %v6726_v15 = vsel %vm465_vm4, %v9574_v5, %v9572_v1  ;;  %v959_v5 = vld [vmem:[%s958_s20] sm:$0xff] }
 0x33d   : >> { %9864 = vst [vmem:[#allocation74_spill] sm:$0xff] %v6726_v15 }
 0x33e   : >> { %4691 = vrot.lane.b32.xlu2 %v6426_v12, %s5581_s16 }
 0x33f   : >> { %4686 = vrot.lane.b32.xlu1 %v6429_v22, %s5581_s16  ;;  %4681 = vrot.lane.b32.xlu0 %v6329_v11, %s5581_s16 }
 0x340   : >> { %v6737_v51 = vpop.permute.xlu2 %4526 }
 0x341   : >> { %9865 = vst [vmem:[#allocation75_spill] sm:$0xff] %v6737_v51  ;;  %v6742_v1 = vpop.permute.xlu1 %4476  ;;  %v6744_v35 = vpop.permute.xlu0 %4471  ;;  %v966_v51 = vld [vmem:[%s958_s20 + $0x38] sm:$0xff] }
 0x342   : >> { %9866 = vst [vmem:[#allocation76_spill] sm:$0xff] %v6742_v1 }
 0x346   : >> { %1737 = vperm.xlu2 %4701, %v960_v41   ;;  %v965_v41 = vld [vmem:[%s958_s20 + $0x30] sm:$0xff] }
 0x347   : >> { %1732 = vperm.xlu1 %4700, %v959_v5   ;;  %4696 = vrot.lane.b32.xlu0 %v6445_v28, %s5581_s16  ;;  %v964_v28 = vld [vmem:[%s958_s20 + $0x28] sm:$0xff] }
 0x348   : >> { %v6748_v12 = vpop.permute.xlu2 %4541 }
 0x349   : >> { %v6750_v11 = vpop.permute.xlu1 %4491  ;;  %v6752_v22 = vpop.permute.xlu0 %4486 }
 0x34a   : >> { %9867 = vst [vmem:[#allocation77_spill] sm:$0xff] %v6752_v22 }
 0x34e   : >> { %1752 = vperm.xlu2 %4701, %v963_v57  }
 0x34f   : >> { %1747 = vperm.xlu1 %4700, %v962_v60   ;;  %1742 = vperm.xlu0 %4702, %v961_v4  }
 0x350   : >> { %v6754_v1 = vpop.permute.xlu2 %4556 }
 0x351   : >> { %9868 = vst [vmem:[#allocation78_spill] sm:$0xff] %v6754_v1  ;;  %v6756_v13 = vpop.permute.xlu1 %4506  ;;  %v6758_v5 = vpop.permute.xlu0 %4501 }
 0x352   : >> { %9869 = vst [vmem:[#allocation79_spill] sm:$0xff] %v6756_v13 }
 0x356   : >> { %1762 = vperm.xlu2 %4701, %v965_v41  }
 0x357   : >> { %1757 = vperm.xlu1 %4700, %v964_v28   ;;  %1767 = vperm.xlu0 %4702, %v966_v51  }
 0x358   : >> { %v6760_v29 = vpop.permute.xlu2 %4571 }
 0x359   : >> { %v6762_v22 = vpop.permute.xlu1 %4521  ;;  %v6764_v61 = vpop.permute.xlu0 %4516 }
 0x35a   : >> { %9870 = vst [vmem:[#allocation80_spill] sm:$0xff] %v6764_v61  ;;  %v9886_v61 = vunpack.i.h.bf16 %v6489_v40 }
 0x35e   : >> { %4709 = vrot.lane.b32.xlu2 %v6120_v50, %s5583_s21 }
 0x35f   : >> { %4704 = vrot.lane.b32.xlu1 %v6084_v7, %s5583_s21  ;;  %4714 = vrot.lane.b32.xlu0 %v6081_v6, %s5583_s21 }
 0x360   : >> { %v6772_v4 = vpop.permute.xlu2 %4586 }
 0x361   : >> { %9871 = vst [vmem:[#allocation81_spill] sm:$0xff] %v6772_v4  ;;  %v6774_v60 = vpop.permute.xlu1 %4536  ;;  %v6776_v57 = vpop.permute.xlu0 %4531 }
 0x362   : >> { %9872 = vst [vmem:[#allocation82_spill] sm:$0xff] %v6774_v60  ;;  %v9588_v7 = vunpack.i.l.bf16 %v6774_v60  ;;  %v9589_v6 = vunpack.i.h.bf16 %v6776_v57 }
 0x366   : >> { %4724 = vrot.lane.b32.xlu2 %v6071_v63, %s5583_s21  ;;  %v9593_v63 = vunpack.i.h.bf16 %v6748_v12 }
 0x367   : >> { %4719 = vrot.lane.b32.xlu1 %v6116_v43, %s5583_s21  ;;  %4729 = vrot.lane.b32.xlu0 %v6112_v42, %s5583_s21  ;;  %v6799_v42 = vsel %vm477_vm0, %v9589_v6, %v9588_v7 }
 0x368   : >> { %v6784_v50 = vpop.permute.xlu2 %4601  ;;  %9874 = vst [vmem:[#allocation84_spill] sm:$0xff] %v6799_v42 }
 0x369   : >> { %v6788_v51 = vpop.permute.xlu1 %4551  ;;  %v6790_v41 = vpop.permute.xlu0 %4546 }
 0x36a   : >> { %9873 = vst [vmem:[#allocation83_spill] sm:$0xff] %v6790_v41  ;;  %v9592_v28 = vunpack.i.l.bf16 %v6790_v41  ;;  %v9597_v7 = vunpack.i.h.bf16 %v6788_v51 }
 0x36c   : >> { %v6806_v43 = vsel %vm489_vm1, %v9593_v63, %v9592_v28  ;;  %v9596_v63 = vunpack.i.l.bf16 %v6754_v1 }
 0x36d   : >> { %9875 = vst [vmem:[#allocation85_spill] sm:$0xff] %v6806_v43  ;;  %v4089_v43 = vunpack.i.h.bf16 %v6281_v56 }
 0x36e   : >> { %4739 = vrot.lane.b32.xlu2 %v6147_v17, %s5583_s21 }
 0x36f   : >> { %4734 = vrot.lane.b32.xlu1 %v6150_v18, %s5583_s21  ;;  %4744 = vrot.lane.b32.xlu0 %v6143_v16, %s5583_s21  ;;  %v6831_v16 = vsel %vm489_vm1, %v9597_v7, %v9596_v63 }
 0x370   : >> { %v6817_v6 = vpop.permute.xlu2 %4616  ;;  %9878 = vst [vmem:[#allocation88_spill] sm:$0xff] %v6831_v16  ;;  %v4118_v16 = vunpack.i.l.bf16 %v6293_v54 }
 0x371   : >> { %9876 = vst [vmem:[#allocation86_spill] sm:$0xff] %v6817_v6  ;;  %v6819_v41 = vpop.permute.xlu1 %4566  ;;  %v6821_v28 = vpop.permute.xlu0 %4561 }
 0x372   : >> { %9877 = vst [vmem:[#allocation87_spill] sm:$0xff] %v6819_v41  ;;  %v9600_v13 = vunpack.i.l.bf16 %v6819_v41  ;;  %v9601_v17 = vunpack.i.h.bf16 %v6821_v28 }
 0x374   : >> { %v6838_v18 = vsel %vm489_vm1, %v9601_v17, %v9600_v13  ;;  %v9606_v13 = vunpack.i.l.bf16 %v6772_v4 }
 0x375   : >> { %9879 = vst [vmem:[#allocation89_spill] sm:$0xff] %v6838_v18 }
 0x376   : >> { %4754 = vrot.lane.b32.xlu2 %v6179_v26, %s5583_s21  ;;  %v9609_v26 = vunpack.i.h.bf16 %v6760_v29 }
 0x377   : >> { %4749 = vrot.lane.b32.xlu1 %v6183_v9, %s5583_s21  ;;  %4759 = vrot.lane.b32.xlu0 %v6176_v25, %s5583_s21  ;;  %v4088_v9 = vunpack.i.l.bf16 %v6281_v56 }
 0x378   : >> { %v6848_v63 = vpop.permute.xlu2 %4631 }
 0x379   : >> { %9880 = vst [vmem:[#allocation90_spill] sm:$0xff] %v6848_v63  ;;  %v6850_v7 = vpop.permute.xlu1 %4581  ;;  %v6852_v1 = vpop.permute.xlu0 %4576 }
 0x37a   : >> { %9881 = vst [vmem:[#allocation91_spill] sm:$0xff] %v6852_v1  ;;  %v9607_v17 = vunpack.i.h.bf16 %v6850_v7  ;;  %v9608_v60 = vunpack.i.l.bf16 %v6852_v1 }
 0x37c   : >> { %v6863_v25 = vsel %vm489_vm1, %v9607_v17, %v9606_v13  ;;  %v6871_v41 = vsel %vm489_vm1, %v9609_v26, %v9608_v60  ;;  %v4084_v13 = vunpack.i.h.bf16 %v6272_v20  ;;  %v4083_v17 = vunpack.i.l.bf16 %v6272_v20 }
 0x37d   : >> { %9882 = vst [vmem:[#allocation92_spill] sm:$0xff] %v6863_v25  ;;  %v9621_v20 = vunpack.i.l.bf16 %v6489_v40  ;;  %v4103_v60 = vunpack.i.l.bf16 %v6253_v44  ;;  %v4108_v25 = vunpack.i.l.bf16 %v6258_v45 }
 0x37e   : >> { %9883 = vst [vmem:[#allocation93_spill] sm:$0xff] %v6871_v41  ;;  %4769 = vrot.lane.b32.xlu2 %v6210_v37, %s5583_s21  ;;  %v1107_v56 = vsel %vm419_vm5, %v4084_v13, %v4088_v9  ;;  %v1108_v37 = vsel %vm419_vm5, %v4088_v9, %v4089_v43 }
 0x37f   : >> { %4764 = vrot.lane.b32.xlu1 %v6213_v38, %s5583_s21  ;;  %4774 = vrot.lane.b32.xlu0 %v6206_v36, %s5583_s21  ;;  %v4104_v36 = vunpack.i.h.bf16 %v6253_v44  ;;  %v6905_v9 = vsel %vm453_vm3, %v9621_v20, %v9886_v61  ;;  %v4099_v44 = vunpack.i.h.bf16 %v6279_v53  ;;  %v4094_v61 = vunpack.i.h.bf16 %v6270_v46 }
 0x380   : >> { %v6885_v26 = vpop.permute.xlu2 %4646  ;;  %9887 = vst [vmem:[#allocation96_spill] sm:$0xff] %v6905_v9 }
 0x381   : >> { %9884 = vst [vmem:[#allocation94_spill] sm:$0xff] %v6885_v26  ;;  %v6888_v42 = vpop.permute.xlu1 %4596  ;;  %v6890_v1 = vpop.permute.xlu0 %4591  ;;  %v1106_v26 = vsel %vm419_vm5, %v4083_v17, %v4084_v13  ;;  %v4098_v13 = vunpack.i.l.bf16 %v6279_v53  ;;  %v4788_v17 = vpack.i.bf16 %v4089_v43, %v1108_v37  ;;  %v1113_v53 = vsel %vm419_vm5, %v4104_v36, %v4108_v25 }
 0x382   : >> { %9885 = vst [vmem:[#allocation95_spill] sm:$0xff] %v6888_v42  ;;  %v9619_v4 = vunpack.i.l.bf16 %v6888_v42  ;;  %v9620_v38 = vunpack.i.h.bf16 %v6890_v1  ;;  %v4783_v41 = vpack.i.bf16 %v1107_v56, %v1106_v26  ;;  %v4093_v56 = vunpack.i.l.bf16 %v6270_v46 }
 0x383   : >> { %v1111_v43 = vsel %vm419_vm5, %v4098_v13, %v4099_v44 }
 0x384   : >> { %v6912_v18 = vsel %vm489_vm1, %v9620_v38, %v9619_v4  ;;  %v1112_v38 = vsel %vm419_vm5, %v4103_v60, %v4104_v36  ;;  %v1109_v20 = vsel %vm419_vm5, %v4093_v56, %v4094_v61  ;;  %v4798_v46 = vpack.i.bf16 %v4099_v44, %v1111_v43 }
 0x385   : >> { %9888 = vst [vmem:[#allocation97_spill] sm:$0xff] %v6912_v18  ;;  %v4803_v26 = vpack.i.bf16 %v1113_v53, %v1112_v38  ;;  %v4114_v60 = vunpack.i.h.bf16 %v6295_v55  ;;  %v4113_v36 = vunpack.i.l.bf16 %v6295_v55  ;;  %v4119_v18 = vunpack.i.h.bf16 %v6293_v54 }
 0x386   : >> { %4784 = vrot.lane.b32.xlu2 %v4783_v41, %s5583_s21  ;;  %v4138_v56 = vunpack.i.l.bf16 %v6268_v34  ;;  %v4133_v43 = vunpack.i.l.bf16 %v6307_v49 }
 0x387   : >> { %4779 = vrot.lane.b32.xlu1 %v6229_v8, %s5583_s21  ;;  %4789 = vrot.lane.b32.xlu0 %v4788_v17, %s5583_s21  ;;  %v1110_v8 = vsel %vm419_vm5, %v4094_v61, %v4098_v13  ;;  %v4109_v17 = vunpack.i.h.bf16 %v6258_v45  ;;  %v1115_v44 = vsel %vm419_vm5, %v4113_v36, %v4114_v60  ;;  %v1117_v54 = vsel %vm419_vm5, %v4118_v16, %v4119_v18 }
 0x388   : >> { %v6924_v4 = vpop.permute.xlu2 %4661  ;;  %v4793_v42 = vpack.i.bf16 %v1110_v8, %v1109_v20  ;;  %v1116_v20 = vsel %vm419_vm5, %v4114_v60, %v4118_v16  ;;  %v4818_v53 = vpack.i.bf16 %v4119_v18, %v1117_v54  ;;  %v4128_v8 = vunpack.i.l.bf16 %v6309_v59 }
 0x389   : >> { %9889 = vst [vmem:[#allocation98_spill] sm:$0xff] %v6924_v4  ;;  %v6929_v37 = vpop.permute.xlu1 %4611  ;;  %v6931_v41 = vpop.permute.xlu0 %4606  ;;  %v1114_v38 = vsel %vm419_vm5, %v4108_v25, %v4109_v17  ;;  %v4129_v25 = vunpack.i.h.bf16 %v6309_v59  ;;  %v4124_v16 = vunpack.i.h.bf16 %v6263_v47 }
 0x38a   : >> { %9890 = vst [vmem:[#allocation99_spill] sm:$0xff] %v6931_v41  ;;  %v4808_v55 = vpack.i.bf16 %v4109_v17, %v1114_v38  ;;  %v4123_v17 = vunpack.i.l.bf16 %v6263_v47 }
 0x38b   : >> { %v1120_v60 = vsel %vm419_vm5, %v4128_v8, %v4129_v25  ;;  %v1119_v38 = vsel %vm419_vm5, %v4124_v16, %v4128_v8 }
 0x38c   : >> { %v4828_v47 = vpack.i.bf16 %v4129_v25, %v1120_v60 }
 0x38e   : >> { %4799 = vrot.lane.b32.xlu2 %v4798_v46, %s5583_s21 }
 0x38f   : >> { %4794 = vrot.lane.b32.xlu1 %v4793_v42, %s5583_s21  ;;  %4804 = vrot.lane.b32.xlu0 %v4803_v26, %s5583_s21  ;;  %v4813_v42 = vpack.i.bf16 %v1116_v20, %v1115_v44  ;;  %v4134_v26 = vunpack.i.h.bf16 %v6307_v49  ;;  %v1118_v20 = vsel %vm419_vm5, %v4123_v17, %v4124_v16  ;;  %v4139_v44 = vunpack.i.h.bf16 %v6268_v34 }
 0x390   : >> { %v6943_v45 = vpop.permute.xlu2 %4676 }
 0x391   : >> { %9891 = vst [vmem:[#allocation100_spill] sm:$0xff] %v6943_v45  ;;  %v6948_v13 = vpop.permute.xlu1 %4626  ;;  %v6950_v61 = vpop.permute.xlu0 %4621  ;;  %v1122_v18 = vsel %vm419_vm5, %v4134_v26, %v4138_v56  ;;  %v1121_v49 = vsel %vm419_vm5, %v4133_v43, %v4134_v26  ;;  %v4143_v26 = vunpack.i.l.bf16 %v6323_v14  ;;  %v4149_v43 = vunpack.i.h.bf16 %v6321_v32  ;;  %v9917_v45 = vld [vmem:[#allocation23_spill] sm:$0xff] }
 0x392   : >> { %9892 = vst [vmem:[#allocation101_spill] sm:$0xff] %v6948_v13  ;;  %v4833_v54 = vpack.i.bf16 %v1122_v18, %v1121_v49  ;;  %v1123_v34 = vsel %vm419_vm5, %v4138_v56, %v4139_v44  ;;  %v4168_v49 = vunpack.i.l.bf16 %v6291_v52  ;;  %v9901_v56 = vld [vmem:[#allocation15_spill] sm:$0xff]  ;;  %v4208_v9 = vunpack.i.l.bf16 %v9917_v45 }
 0x393   : >> { %9893 = vst [vmem:[#allocation102_spill] sm:$0xff] %v6950_v61 }
 0x396   : >> { %4814 = vrot.lane.b32.xlu2 %v4813_v42, %s5583_s21  ;;  %v4148_v42 = vunpack.i.l.bf16 %v6321_v32 }
 0x397   : >> { %4809 = vrot.lane.b32.xlu1 %v4808_v55, %s5583_s21  ;;  %4819 = vrot.lane.b32.xlu0 %v4818_v53, %s5583_s21  ;;  %v4823_v55 = vpack.i.bf16 %v1119_v38, %v1118_v20  ;;  %v4144_v53 = vunpack.i.h.bf16 %v6323_v14  ;;  %v4838_v14 = vpack.i.bf16 %v4139_v44, %v1123_v34  ;;  %v9900_v20 = vld [vmem:[#allocation14_spill] sm:$0xff] }
 0x398   : >> { %v6963_v46 = vpop.permute.xlu2 %4691  ;;  %v1126_v32 = vsel %vm419_vm5, %v4148_v42, %v4149_v43 }
 0x399   : >> { %9894 = vst [vmem:[#allocation103_spill] sm:$0xff] %v6963_v46  ;;  %v6968_v36 = vpop.permute.xlu1 %4641  ;;  %v6970_v59 = vpop.permute.xlu0 %4636  ;;  %v1125_v25 = vsel %vm419_vm5, %v4144_v53, %v4148_v42  ;;  %v1124_v16 = vsel %vm419_vm5, %v4143_v26, %v4144_v53  ;;  %v4848_v38 = vpack.i.bf16 %v4149_v43, %v1126_v32  ;;  %v9902_v42 = vld [vmem:[#allocation10_spill] sm:$0xff] }
 0x39a   : >> { %9895 = vst [vmem:[#allocation104_spill] sm:$0xff] %v6968_v36  ;;  %v4843_v60 = vpack.i.bf16 %v1125_v25, %v1124_v16  ;;  %v4154_v44 = vunpack.i.h.bf16 %v9902_v42  ;;  %v4153_v53 = vunpack.i.l.bf16 %v9902_v42  ;;  %v9906_v42 = vld [vmem:[#allocation17_spill] sm:$0xff] }
 0x39b   : >> { %9896 = vst [vmem:[#allocation105_spill] sm:$0xff] %v6970_v59  ;;  %v4178_v59 = vunpack.i.l.bf16 %v9906_v42 }
 0x39e   : >> { %4829 = vrot.lane.b32.xlu2 %v4828_v47, %s5583_s21  ;;  %v4163_v47 = vunpack.i.l.bf16 %v9900_v20 }
 0x39f   : >> { %4824 = vrot.lane.b32.xlu1 %v4823_v55, %s5583_s21  ;;  %4834 = vrot.lane.b32.xlu0 %v4833_v54, %s5583_s21  ;;  %v4164_v54 = vunpack.i.h.bf16 %v9900_v20  ;;  %v4159_v55 = vunpack.i.h.bf16 %v9901_v56 }
 0x3a0   : >> { %v6982_v8 = vpop.permute.xlu2 %1737 }
 0x3a1   : >> { %9897 = vst [vmem:[#allocation106_spill] sm:$0xff] %v6982_v8  ;;  %v6987_v17 = vpop.permute.xlu1 %4656  ;;  %v6989_v18 = vpop.permute.xlu0 %4651  ;;  %v4158_v8 = vunpack.i.l.bf16 %v9901_v56  ;;  %v1195_v43 = vsel %vm431_vm6, %v4164_v54, %v4168_v49  ;;  %v1194_v34 = vsel %vm431_vm6, %v4163_v47, %v4164_v54  ;;  %v4169_v54 = vunpack.i.h.bf16 %v6291_v52 }
 0x3a2   : >> { %9898 = vst [vmem:[#allocation107_spill] sm:$0xff] %v6987_v17  ;;  %v4179_v47 = vunpack.i.h.bf16 %v9906_v42 }
 0x3a3   : >> { %9899 = vst [vmem:[#allocation108_spill] sm:$0xff] %v6989_v18  ;;  %v1129_v25 = vsel %vm419_vm5, %v4158_v8, %v4159_v55  ;;  %v1196_v52 = vsel %vm431_vm6, %v4168_v49, %v4169_v54 }
 0x3a4   : >> { %v4858_v20 = vpack.i.bf16 %v4159_v55, %v1129_v25 }
 0x3a6   : >> { %4844 = vrot.lane.b32.xlu2 %v4843_v60, %s5583_s21  ;;  %v1127_v60 = vsel %vm419_vm5, %v4153_v53, %v4154_v44 }
 0x3a7   : >> { %4839 = vrot.lane.b32.xlu1 %v4838_v14, %s5583_s21  ;;  %4849 = vrot.lane.b32.xlu0 %v4848_v38, %s5583_s21  ;;  %v1128_v14 = vsel %vm419_vm5, %v4154_v44, %v4158_v8  ;;  %v4863_v38 = vpack.i.bf16 %v1195_v43, %v1194_v34  ;;  %v9910_v34 = vld [vmem:[#allocation12_spill] sm:$0xff] }
 0x3a8   : >> { %v7002_v26 = vpop.permute.xlu2 %1752  ;;  %v4853_v56 = vpack.i.bf16 %v1128_v14, %v1127_v60  ;;  %v4198_v25 = vunpack.i.l.bf16 %v9910_v34  ;;  %v9911_v60 = vld [vmem:[#allocation20_spill] sm:$0xff] }
 0x3a9   : >> { %9903 = vst [vmem:[#allocation14_spill] sm:$0xff] %v7002_v26  ;;  %v7007_v16 = vpop.permute.xlu1 %4671  ;;  %v7009_v32 = vpop.permute.xlu0 %4666  ;;  %v9907_v26 = vld [vmem:[#allocation18_spill] sm:$0xff]  ;;  %v4193_v42 = vunpack.i.l.bf16 %v9911_v60 }
 0x3aa   : >> { %9904 = vst [vmem:[#allocation15_spill] sm:$0xff] %v7007_v16  ;;  %v4174_v13 = vunpack.i.h.bf16 %v9907_v26  ;;  %v4173_v17 = vunpack.i.l.bf16 %v9907_v26  ;;  %v1199_v26 = vsel %vm431_vm6, %v4178_v59, %v4179_v47 }
 0x3ab   : >> { %9905 = vst [vmem:[#allocation10_spill] sm:$0xff] %v7009_v32 }
 0x3ac   : >> { %v1198_v55 = vsel %vm431_vm6, %v4174_v13, %v4178_v59  ;;  %v1197_v44 = vsel %vm431_vm6, %v4173_v17, %v4174_v13  ;;  %v9913_v59 = vld [vmem:[#allocation11_spill] sm:$0xff] }
 0x3ad   : >> { %v4873_v14 = vpack.i.bf16 %v1198_v55, %v1197_v44  ;;  %v4184_v17 = vunpack.i.h.bf16 %v9913_v59  ;;  %v4183_v49 = vunpack.i.l.bf16 %v9913_v59 }
 0x3ae   : >> { %4859 = vrot.lane.b32.xlu2 %v4858_v20, %s5583_s21  ;;  %v4194_v20 = vunpack.i.h.bf16 %v9911_v60 }
 0x3af   : >> { %4854 = vrot.lane.b32.xlu1 %v4853_v56, %s5583_s21  ;;  %4864 = vrot.lane.b32.xlu0 %v4863_v38, %s5583_s21  ;;  %v4868_v38 = vpack.i.bf16 %v4169_v54, %v1196_v52  ;;  %v4878_v56 = vpack.i.bf16 %v4179_v47, %v1199_v26 }
 0x3b0   : >> { %v7021_v8 = vpop.permute.xlu2 %1762  ;;  %v1204_v55 = vsel %vm431_vm6, %v4194_v20, %v4198_v25  ;;  %v1203_v47 = vsel %vm431_vm6, %v4193_v42, %v4194_v20 }
 0x3b1   : >> { %9908 = vst [vmem:[#allocation17_spill] sm:$0xff] %v7021_v8  ;;  %v7025_v53 = vpop.permute.xlu1 %4686  ;;  %v7027_v43 = vpop.permute.xlu0 %4681  ;;  %v9912_v8 = vld [vmem:[#allocation21_spill] sm:$0xff]  ;;  %v4893_v20 = vpack.i.bf16 %v1204_v55, %v1203_v47 }
 0x3b2   : >> { %9909 = vst [vmem:[#allocation18_spill] sm:$0xff] %v7025_v53  ;;  %v4189_v32 = vunpack.i.h.bf16 %v9912_v8  ;;  %v4188_v13 = vunpack.i.l.bf16 %v9912_v8  ;;  %v9918_v53 = vld [vmem:[#allocation24_spill] sm:$0xff] }
 0x3b3   : >> { %v4204_v6 = vunpack.i.h.bf16 %v9918_v53 }
 0x3b4   : >> { %v1202_v44 = vsel %vm431_vm6, %v4188_v13, %v4189_v32  ;;  %v1201_v60 = vsel %vm431_vm6, %v4184_v17, %v4188_v13  ;;  %v4209_v13 = vunpack.i.h.bf16 %v9917_v45 }
 0x3b5   : >> { %v4888_v42 = vpack.i.bf16 %v4189_v32, %v1202_v44  ;;  %v1207_v32 = vsel %vm431_vm6, %v4204_v6, %v4208_v9 }
 0x3b6   : >> { %4874 = vrot.lane.b32.xlu2 %v4873_v14, %s5583_s21  ;;  %v1208_v45 = vsel %vm431_vm6, %v4208_v9, %v4209_v13 }
 0x3b7   : >> { %4869 = vrot.lane.b32.xlu1 %v4868_v38, %s5583_s21  ;;  %4879 = vrot.lane.b32.xlu0 %v4878_v56, %s5583_s21  ;;  %v1200_v56 = vsel %vm431_vm6, %v4183_v49, %v4184_v17 }
 0x3b8   : >> { %v7042_v54 = vpop.permute.xlu2 %4709  ;;  %v4883_v59 = vpack.i.bf16 %v1201_v60, %v1200_v56  ;;  %v9921_v60 = vld [vmem:[#allocation27_spill] sm:$0xff] }
 0x3b9   : >> { %v4712_v8 = vunpack.i.h.bf16 %v7042_v54  ;;  %v9639_v52 = vunpack.i.l.bf16 %v7042_v54  ;;  %v7048_v26 = vpop.permute.xlu1 %1732  ;;  %v7050_v14 = vpop.permute.xlu0 %4696  ;;  %v4219_v56 = vunpack.i.h.bf16 %v9921_v60 }
 0x3ba   : >> { %9914 = vst [vmem:[#allocation12_spill] sm:$0xff] %v7048_v26  ;;  %v4203_v26 = vunpack.i.l.bf16 %v9918_v53 }
 0x3bb   : >> { %9915 = vst [vmem:[#allocation20_spill] sm:$0xff] %v7050_v14  ;;  %v7056_v38 = vsel %vm617_vm8, %v9639_v52, %v4712_v8  ;;  %v4199_v14 = vunpack.i.h.bf16 %v9910_v34  ;;  %v4908_v8 = vpack.i.bf16 %v4209_v13, %v1208_v45 }
 0x3bc   : >> { %9916 = vst [vmem:[#allocation21_spill] sm:$0xff] %v7056_v38  ;;  %v1206_v49 = vsel %vm431_vm6, %v4203_v26, %v4204_v6  ;;  %v4218_v6 = vunpack.i.l.bf16 %v9921_v60  ;;  %v9924_v26 = vld [vmem:[#allocation13_spill] sm:$0xff] }
 0x3bd   : >> { %v1205_v53 = vsel %vm431_vm6, %v4198_v25, %v4199_v14  ;;  %v4903_v34 = vpack.i.bf16 %v1207_v32, %v1206_v49  ;;  %v4213_v25 = vunpack.i.l.bf16 %v9924_v26 }
 0x3be   : >> { %4889 = vrot.lane.b32.xlu2 %v4888_v42, %s5583_s21  ;;  %v4898_v44 = vpack.i.bf16 %v4199_v14, %v1205_v53  ;;  %v1211_v14 = vsel %vm431_vm6, %v4218_v6, %v4219_v56 }
 0x3bf   : >> { %4884 = vrot.lane.b32.xlu1 %v4883_v59, %s5583_s21  ;;  %4894 = vrot.lane.b32.xlu0 %v4893_v20, %s5583_s21  ;;  %v9922_v20 = vld [vmem:[#allocation16_spill] sm:$0xff]  ;;  %v9923_v59 = vld [vmem:[#allocation26_spill] sm:$0xff] }
 0x3c0   : >> { %v7067_v17 = vpop.permute.xlu2 %4724  ;;  %v4228_v42 = vunpack.i.l.bf16 %v9922_v20  ;;  %v4224_v52 = vunpack.i.h.bf16 %v9923_v59  ;;  %v4223_v38 = vunpack.i.l.bf16 %v9923_v59  ;;  %v4918_v59 = vpack.i.bf16 %v4219_v56, %v1211_v14 }
 0x3c1   : >> { %v7071_v55 = vpop.permute.xlu1 %1747  ;;  %v7073_v47 = vpop.permute.xlu0 %1742 }
 0x3c2   : >> { %9919 = vst [vmem:[#allocation11_spill] sm:$0xff] %v7071_v55  ;;  %v4214_v55 = vunpack.i.h.bf16 %v9924_v26  ;;  %v1213_v45 = vsel %vm431_vm6, %v4224_v52, %v4228_v42  ;;  %v9928_v26 = vld [vmem:[#allocation29_spill] sm:$0xff] }
 0x3c3   : >> { %9920 = vst [vmem:[#allocation23_spill] sm:$0xff] %v7073_v47  ;;  %v4238_v47 = vunpack.i.l.bf16 %v9928_v26 }
 0x3c6   : >> { %4904 = vrot.lane.b32.xlu2 %v4903_v34, %s5583_s21  ;;  %v1212_v34 = vsel %vm431_vm6, %v4223_v38, %v4224_v52  ;;  %v4229_v52 = vunpack.i.h.bf16 %v9922_v20  ;;  %v4239_v38 = vunpack.i.h.bf16 %v9928_v26 }
 0x3c7   : >> { %4899 = vrot.lane.b32.xlu1 %v4898_v44, %s5583_s21  ;;  %4909 = vrot.lane.b32.xlu0 %v4908_v8, %s5583_s21  ;;  %v1210_v44 = vsel %vm431_vm6, %v4214_v55, %v4218_v6  ;;  %v1209_v8 = vsel %vm431_vm6, %v4213_v25, %v4214_v55  ;;  %v4923_v48 = vpack.i.bf16 %v1213_v45, %v1212_v34  ;;  %v9930_v45 = vld [vmem:[#allocation22_spill] sm:$0xff] }
 0x3c8   : >> { %v7087_v9 = vpop.permute.xlu2 %4739  ;;  %v4913_v23 = vpack.i.bf16 %v1210_v44, %v1209_v8  ;;  %v1214_v20 = vsel %vm431_vm6, %v4228_v42, %v4229_v52  ;;  %v1217_v14 = vsel %vm431_vm6, %v4238_v47, %v4239_v38 }
 0x3c9   : >> { %v4742_v13 = vunpack.i.h.bf16 %v7087_v9  ;;  %v9647_v32 = vunpack.i.l.bf16 %v7087_v9  ;;  %v7092_v49 = vpop.permute.xlu1 %1757  ;;  %v7094_v53 = vpop.permute.xlu0 %1767  ;;  %v4928_v42 = vpack.i.bf16 %v4229_v52, %v1214_v20  ;;  %v9949_v62 = vunpack.i.l.bf16 %v7087_v9 }
 0x3ca   : >> { %9925 = vst [vmem:[#allocation24_spill] sm:$0xff] %v7092_v49  ;;  %v4234_v49 = vunpack.i.h.bf16 %v9929_v58 }
 0x3cb   : >> { %9926 = vst [vmem:[#allocation27_spill] sm:$0xff] %v7094_v53  ;;  %v7103_v60 = vsel %vm617_vm8, %v9647_v32, %v4742_v13  ;;  %v4233_v53 = vunpack.i.l.bf16 %v9929_v58 }
 0x3cc   : >> { %9927 = vst [vmem:[#allocation16_spill] sm:$0xff] %v7103_v60  ;;  %v1216_v55 = vsel %vm431_vm6, %v4234_v49, %v4238_v47  ;;  %v4938_v47 = vpack.i.bf16 %v4239_v38, %v1217_v14  ;;  %v9937_v14 = vunpack.i.h.bf16 %v7067_v17 }
 0x3cd   : >> { %v1215_v56 = vsel %vm431_vm6, %v4233_v53, %v4234_v49  ;;  %v9932_v49 = vld [vmem:[#allocation33_spill] sm:$0xff] }
 0x3ce   : >> { %4919 = vrot.lane.b32.xlu2 %v4918_v59, %s5583_s21  ;;  %v4933_v34 = vpack.i.bf16 %v1216_v55, %v1215_v56  ;;  %v4249_v53 = vunpack.i.h.bf16 %v9932_v49  ;;  %v9933_v59 = vunpack.i.l.bf16 %v7042_v54  ;;  %v4248_v32 = vunpack.i.l.bf16 %v9932_v49  ;;  %v9935_v55 = vld [vmem:[#allocation19_spill] sm:$0xff] }
 0x3cf   : >> { %4914 = vrot.lane.b32.xlu1 %v4913_v23, %s5583_s21  ;;  %4924 = vrot.lane.b32.xlu0 %v4923_v48, %s5583_s21  ;;  %v4258_v23 = vunpack.i.l.bf16 %v9930_v45  ;;  %v9931_v48 = vld [vmem:[#allocation32_spill] sm:$0xff]  ;;  %v4244_v56 = vunpack.i.h.bf16 %v9935_v55  ;;  %v4243_v60 = vunpack.i.l.bf16 %v9935_v55 }
 0x3d0   : >> { %v7115_v6 = vpop.permute.xlu2 %4754  ;;  %v4254_v44 = vunpack.i.h.bf16 %v9931_v48  ;;  %v4253_v8 = vunpack.i.l.bf16 %v9931_v48 }
 0x3d1   : >> { %v7117_v25 = vpop.permute.xlu1 %4704  ;;  %v7119_v58 = vpop.permute.xlu0 %4714  ;;  %v1283_v20 = vsel %vm443_vm7, %v4244_v56, %v4248_v32 }
 0x3d2   : >> { %v9648_v13 = vunpack.i.h.bf16 %v7117_v25  ;;  %v1286_v54 = vsel %vm443_vm7, %v4254_v44, %v4258_v23  ;;  %v1285_v48 = vsel %vm443_vm7, %v4253_v8, %v4254_v44  ;;  %v1282_v8 = vsel %vm443_vm7, %v4243_v60, %v4244_v56  ;;  %v9943_v56 = vld [vmem:[#allocation35_spill] sm:$0xff] }
 0x3d3   : >> { %v4953_v39 = vpack.i.bf16 %v1286_v54, %v1285_v48  ;;  %v9939_v15 = vunpack.i.h.bf16 %v7119_v58  ;;  %v4268_v54 = vunpack.i.l.bf16 %v9943_v56  ;;  %v9944_v48 = vld [vmem:[#allocation36_spill] sm:$0xff] }
 0x3d4   : >> { %v7133_v26 = vsel %vm617_vm8, %v9648_v13, %v9933_v59  ;;  %v1284_v59 = vsel %vm443_vm7, %v4248_v32, %v4249_v53 }
 0x3d5   : >> { %9934 = vst [vmem:[#allocation26_spill] sm:$0xff] %v7133_v26  ;;  %v4948_v52 = vpack.i.bf16 %v4249_v53, %v1284_v59  ;;  %v4943_v53 = vpack.i.bf16 %v1283_v20, %v1282_v8  ;;  %v4264_v59 = vunpack.i.h.bf16 %v9944_v48  ;;  %v9945_v20 = vld [vmem:[#allocation39_spill] sm:$0xff] }
 0x3d6   : >> { %4934 = vrot.lane.b32.xlu2 %v4933_v34, %s5583_s21 }
 0x3d7   : >> { %4929 = vrot.lane.b32.xlu1 %v4928_v42, %s5583_s21  ;;  %4939 = vrot.lane.b32.xlu0 %v4938_v47, %s5583_s21 }
 0x3d8   : >> { %v7145_v38 = vpop.permute.xlu2 %4769 }
 0x3d9   : >> { %v4772_v34 = vunpack.i.h.bf16 %v7145_v38  ;;  %v9652_v49 = vunpack.i.l.bf16 %v7145_v38  ;;  %v4720_v42 = vpop.permute.xlu1 %4719  ;;  %v4730_v47 = vpop.permute.xlu0 %4729 }
 0x3da   : >> { %v4722_v55 = vunpack.i.h.bf16 %v4720_v42  ;;  %v4721_v13 = vunpack.i.l.bf16 %v4720_v42  ;;  %v4732_v26 = vunpack.i.h.bf16 %v4730_v47  ;;  %v4731_v44 = vunpack.i.l.bf16 %v4730_v47 }
 0x3db   : >> { %v7155_v32 = vsel %vm617_vm8, %v9652_v49, %v4772_v34  ;;  %v4263_v34 = vunpack.i.l.bf16 %v9944_v48  ;;  %v4269_v49 = vunpack.i.h.bf16 %v9943_v56  ;;  %v9946_v56 = vld [vmem:[#allocation25_spill] sm:$0xff] }
 0x3dc   : >> { %9936 = vst [vmem:[#allocation13_spill] sm:$0xff] %v7155_v32  ;;  %v7160_v41 = vsel %vm617_vm8, %v9937_v14, %v4731_v44  ;;  %v7165_v42 = vsel %vm617_vm8, %v9939_v15, %v4721_v13  ;;  %v7168_v47 = vsel %vm617_vm8, %v4731_v44, %v4732_v26  ;;  %v7171_v60 = vsel %vm617_vm8, %v4721_v13, %v4722_v55  ;;  %v9948_v32 = vld [vmem:[#allocation38_spill] sm:$0xff] }
 0x3dd   : >> { %9938 = vst [vmem:[#allocation29_spill] sm:$0xff] %v7160_v41  ;;  %v4259_v14 = vunpack.i.h.bf16 %v9930_v45  ;;  %v1289_v13 = vsel %vm443_vm7, %v4264_v59, %v4268_v54  ;;  %v1288_v26 = vsel %vm443_vm7, %v4263_v34, %v4264_v59  ;;  %v4279_v55 = vunpack.i.h.bf16 %v9945_v20 }
 0x3de   : >> { %9940 = vst [vmem:[#allocation30_spill] sm:$0xff] %v7165_v42  ;;  %4949 = vrot.lane.b32.xlu2 %v4948_v52, %s5583_s21  ;;  %v1290_v52 = vsel %vm443_vm7, %v4268_v54, %v4269_v49  ;;  %v4273_v48 = vunpack.i.l.bf16 %v9946_v56  ;;  %v4278_v59 = vunpack.i.l.bf16 %v9945_v20  ;;  %v4963_v34 = vpack.i.bf16 %v1289_v13, %v1288_v26 }
 0x3df   : >> { %9941 = vst [vmem:[#allocation22_spill] sm:$0xff] %v7168_v47  ;;  %4944 = vrot.lane.b32.xlu1 %v4943_v53, %s5583_s21  ;;  %4954 = vrot.lane.b32.xlu0 %v4953_v39, %s5583_s21  ;;  %v1287_v45 = vsel %vm443_vm7, %v4258_v23, %v4259_v14  ;;  %v4274_v39 = vunpack.i.h.bf16 %v9946_v56  ;;  %v4284_v42 = vunpack.i.h.bf16 %v9948_v32  ;;  %v4283_v41 = vunpack.i.l.bf16 %v9948_v32 }
 0x3e0   : >> { %9942 = vst [vmem:[#allocation32_spill] sm:$0xff] %v7171_v60  ;;  %v7181_v15 = vpop.permute.xlu2 %4784  ;;  %v9947_v60 = vld [vmem:[#allocation28_spill] sm:$0xff]  ;;  %v4958_v54 = vpack.i.bf16 %v4259_v14, %v1287_v45  ;;  %v4968_v63 = vpack.i.bf16 %v4269_v49, %v1290_v52  ;;  %v1293_v56 = vsel %vm443_vm7, %v4278_v59, %v4279_v55 }
 0x3e1   : >> { %v7186_v44 = vpop.permute.xlu1 %4734  ;;  %v7188_v8 = vpop.permute.xlu0 %4744  ;;  %v4288_v47 = vunpack.i.l.bf16 %v9947_v60  ;;  %v1291_v20 = vsel %vm443_vm7, %v4273_v48, %v4274_v39  ;;  %v1294_v9 = vsel %vm443_vm7, %v4283_v41, %v4284_v42  ;;  %v4978_v13 = vpack.i.bf16 %v4279_v55, %v1293_v56  ;;  %v9951_v41 = vld [vmem:[#allocation41_spill] sm:$0xff]  ;;  %v9952_v55 = vld [vmem:[#allocation42_spill] sm:$0xff] }
 0x3e2   : >> { %v9655_v53 = vunpack.i.h.bf16 %v7186_v44  ;;  %v1292_v49 = vsel %vm443_vm7, %v4274_v39, %v4278_v59  ;;  %v4294_v56 = vunpack.i.h.bf16 %v9952_v55  ;;  %v9954_v59 = vunpack.i.h.bf16 %v7115_v6 }
 0x3e3   : >> { %v1295_v32 = vsel %vm443_vm7, %v4284_v42, %v4288_v47  ;;  %v4298_v42 = vunpack.i.l.bf16 %v9951_v41  ;;  %v4973_v18 = vpack.i.bf16 %v1292_v49, %v1291_v20 }
 0x3e4   : >> { %v7204_v23 = vsel %vm617_vm8, %v9655_v53, %v9949_v62  ;;  %v4293_v62 = vunpack.i.l.bf16 %v9952_v55  ;;  %v4983_v36 = vpack.i.bf16 %v1295_v32, %v1294_v9 }
 0x3e5   : >> { %9950 = vst [vmem:[#allocation33_spill] sm:$0xff] %v7204_v23 }
 0x3e6   : >> { %4964 = vrot.lane.b32.xlu2 %v4963_v34, %s5583_s21 }
 0x3e7   : >> { %4959 = vrot.lane.b32.xlu1 %v4958_v54, %s5583_s21  ;;  %4969 = vrot.lane.b32.xlu0 %v4968_v63, %s5583_s21 }
 0x3e8   : >> { %v7214_v26 = vpop.permute.xlu2 %4799 }
 0x3e9   : >> { %v4750_v45 = vpop.permute.xlu1 %4749  ;;  %v4760_v52 = vpop.permute.xlu0 %4759  ;;  %v4802_v48 = vunpack.i.h.bf16 %v7214_v26  ;;  %v9659_v34 = vunpack.i.l.bf16 %v7214_v26 }
 0x3ea   : >> { %v4752_v63 = vunpack.i.h.bf16 %v4750_v45  ;;  %v4751_v54 = vunpack.i.l.bf16 %v4750_v45  ;;  %v4762_v53 = vunpack.i.h.bf16 %v4760_v52  ;;  %v4761_v23 = vunpack.i.l.bf16 %v4760_v52 }
 0x3eb   : >> { %v7226_v39 = vsel %vm617_vm8, %v9659_v34, %v4802_v48  ;;  %v9956_v45 = vunpack.i.h.bf16 %v7188_v8  ;;  %v4289_v48 = vunpack.i.h.bf16 %v9947_v60  ;;  %v4299_v34 = vunpack.i.h.bf16 %v9951_v41 }
 0x3ec   : >> { %9953 = vst [vmem:[#allocation19_spill] sm:$0xff] %v7226_v39  ;;  %v7231_v14 = vsel %vm617_vm8, %v9954_v59, %v4761_v23  ;;  %v7239_v61 = vsel %vm617_vm8, %v4761_v23, %v4762_v53  ;;  %v7242_v55 = vsel %vm617_vm8, %v4751_v54, %v4752_v63  ;;  %v1298_v59 = vsel %vm443_vm7, %v4294_v56, %v4298_v42  ;;  %v9965_v39 = vld [vmem:[#allocation31_spill] sm:$0xff] }
 0x3ed   : >> { %9955 = vst [vmem:[#allocation35_spill] sm:$0xff] %v7231_v14  ;;  %v7236_v52 = vsel %vm617_vm8, %v9956_v45, %v4751_v54  ;;  %v1297_v53 = vsel %vm443_vm7, %v4293_v62, %v4294_v56  ;;  %v1296_v60 = vsel %vm443_vm7, %v4288_v47, %v4289_v48  ;;  %v1299_v20 = vsel %vm443_vm7, %v4298_v42, %v4299_v34  ;;  %v9962_v62 = vld [vmem:[#allocation45_spill] sm:$0xff] }
 0x3ee   : >> { %9957 = vst [vmem:[#allocation36_spill] sm:$0xff] %v7236_v52  ;;  %4979 = vrot.lane.b32.xlu2 %v4978_v13, %s5583_s21  ;;  %v9960_v13 = vld [vmem:[#allocation34_spill] sm:$0xff]  ;;  %v4993_v49 = vpack.i.bf16 %v1298_v59, %v1297_v53  ;;  %v4309_v56 = vunpack.i.h.bf16 %v9962_v62  ;;  %v4308_v45 = vunpack.i.l.bf16 %v9962_v62  ;;  %v4988_v42 = vpack.i.bf16 %v4289_v48, %v1296_v60 }
 0x3ef   : >> { %9958 = vst [vmem:[#allocation39_spill] sm:$0xff] %v7239_v61  ;;  %4974 = vrot.lane.b32.xlu1 %v4973_v18, %s5583_s21  ;;  %4984 = vrot.lane.b32.xlu0 %v4983_v36, %s5583_s21  ;;  %v4318_v18 = vunpack.i.l.bf16 %v9960_v13  ;;  %v9961_v36 = vld [vmem:[#allocation44_spill] sm:$0xff]  ;;  %v4998_v61 = vpack.i.bf16 %v4299_v34, %v1299_v20  ;;  %v4304_v52 = vunpack.i.h.bf16 %v9965_v39  ;;  %v4303_v59 = vunpack.i.l.bf16 %v9965_v39 }
 0x3f0   : >> { %9959 = vst [vmem:[#allocation25_spill] sm:$0xff] %v7242_v55  ;;  %v7251_v23 = vpop.permute.xlu2 %4814  ;;  %v4314_v54 = vunpack.i.h.bf16 %v9961_v36  ;;  %v4313_v41 = vunpack.i.l.bf16 %v9961_v36  ;;  %v9963_v55 = vunpack.i.l.bf16 %v7145_v38  ;;  %v1302_v36 = vsel %vm443_vm7, %v4308_v45, %v4309_v56 }
 0x3f1   : >> { %v7253_v63 = vpop.permute.xlu1 %4764  ;;  %v7255_v32 = vpop.permute.xlu0 %4774  ;;  %v9663_v34 = vunpack.i.h.bf16 %v7181_v15  ;;  %v5008_v14 = vpack.i.bf16 %v4309_v56, %v1302_v36  ;;  %v9972_v36 = vld [vmem:[#allocation48_spill] sm:$0xff] }
 0x3f2   : >> { %v9660_v9 = vunpack.i.h.bf16 %v7253_v63  ;;  %v1304_v53 = vsel %vm443_vm7, %v4314_v54, %v4318_v18  ;;  %v1303_v38 = vsel %vm443_vm7, %v4313_v41, %v4314_v54  ;;  %v1300_v41 = vsel %vm443_vm7, %v4303_v59, %v4304_v52 }
 0x3f3   : >> { %v5013_v56 = vpack.i.bf16 %v1304_v53, %v1303_v38 }
 0x3f4   : >> { %v7270_v47 = vsel %vm617_vm8, %v9660_v9, %v9963_v55  ;;  %v1301_v55 = vsel %vm443_vm7, %v4304_v52, %v4308_v45 }
 0x3f5   : >> { %9964 = vst [vmem:[#allocation28_spill] sm:$0xff] %v7270_v47  ;;  %v9968_v47 = vunpack.i.h.bf16 %v7255_v32  ;;  %v5003_v59 = vpack.i.bf16 %v1301_v55, %v1300_v41 }
 0x3f6   : >> { %4994 = vrot.lane.b32.xlu2 %v4993_v49, %s5583_s21 }
 0x3f7   : >> { %4989 = vrot.lane.b32.xlu1 %v4988_v42, %s5583_s21  ;;  %4999 = vrot.lane.b32.xlu0 %v4998_v61, %s5583_s21 }
 0x3f8   : >> { %v7281_v48 = vpop.permute.xlu2 %4829 }
 0x3f9   : >> { %v4780_v20 = vpop.permute.xlu1 %4779  ;;  %v4790_v39 = vpop.permute.xlu0 %4789  ;;  %v4832_v49 = vunpack.i.h.bf16 %v7281_v48  ;;  %v9662_v61 = vunpack.i.l.bf16 %v7281_v48 }
 0x3fa   : >> { %v4782_v62 = vunpack.i.h.bf16 %v4780_v20  ;;  %v4781_v42 = vunpack.i.l.bf16 %v4780_v20  ;;  %v4792_v9 = vunpack.i.h.bf16 %v4790_v39  ;;  %v4791_v54 = vunpack.i.l.bf16 %v4790_v39 }
 0x3fb   : >> { %v7291_v45 = vsel %vm617_vm8, %v9662_v61, %v4832_v49  ;;  %v4323_v39 = vunpack.i.l.bf16 %v9972_v36  ;;  %v4319_v49 = vunpack.i.h.bf16 %v9960_v13  ;;  %v9973_v61 = vld [vmem:[#allocation47_spill] sm:$0xff] }
 0x3fc   : >> { %9966 = vst [vmem:[#allocation38_spill] sm:$0xff] %v7291_v45  ;;  %v7296_v60 = vsel %vm617_vm8, %v9663_v34, %v4791_v54  ;;  %v7301_v4 = vsel %vm617_vm8, %v9968_v47, %v4781_v42  ;;  %v7304_v20 = vsel %vm617_vm8, %v4791_v54, %v4792_v9  ;;  %v7307_v52 = vsel %vm617_vm8, %v4781_v42, %v4782_v62  ;;  %v9974_v42 = vld [vmem:[#allocation37_spill] sm:$0xff] }
 0x3fd   : >> { %9967 = vst [vmem:[#allocation41_spill] sm:$0xff] %v7296_v60  ;;  %v4328_v34 = vunpack.i.l.bf16 %v9973_v61  ;;  %v4324_v45 = vunpack.i.h.bf16 %v9972_v36  ;;  %v1305_v13 = vsel %vm443_vm7, %v4318_v18, %v4319_v49  ;;  %v4333_v54 = vunpack.i.l.bf16 %v9974_v42 }
 0x3fe   : >> { %9969 = vst [vmem:[#allocation42_spill] sm:$0xff] %v7301_v4  ;;  %5009 = vrot.lane.b32.xlu2 %v5008_v14, %s5583_s21  ;;  %v4334_v14 = vunpack.i.h.bf16 %v9974_v42  ;;  %v4329_v41 = vunpack.i.h.bf16 %v9973_v61  ;;  %v5018_v18 = vpack.i.bf16 %v4319_v49, %v1305_v13 }
 0x3ff   : >> { %9970 = vst [vmem:[#allocation34_spill] sm:$0xff] %v7304_v20  ;;  %5004 = vrot.lane.b32.xlu1 %v5003_v59, %s5583_s21  ;;  %5014 = vrot.lane.b32.xlu0 %v5013_v56, %s5583_s21  ;;  %v1354_v47 = vsel %vm453_vm3, %v4323_v39, %v4324_v45  ;;  %v1355_v55 = vsel %vm453_vm3, %v4324_v45, %v4328_v34  ;;  %v9975_v59 = vld [vmem:[#allocation50_spill] sm:$0xff] }
 0x400   : >> { %9971 = vst [vmem:[#allocation44_spill] sm:$0xff] %v7307_v52  ;;  %v7316_v9 = vpop.permute.xlu2 %4844  ;;  %v5023_v56 = vpack.i.bf16 %v1354_v47, %v4323_v39  ;;  %v4338_v36 = vunpack.i.l.bf16 %v9975_v59  ;;  %v9976_v52 = vunpack.i.l.bf16 %v7214_v26  ;;  %v5028_v45 = vpack.i.bf16 %v4328_v34, %v1355_v55 }
 0x401   : >> { %v7319_v53 = vpop.permute.xlu1 %4794  ;;  %v7321_v38 = vpop.permute.xlu0 %4804  ;;  %v4339_v4 = vunpack.i.h.bf16 %v9975_v59  ;;  %v1357_v61 = vsel %vm453_vm3, %v4333_v54, %v4334_v14  ;;  %v1356_v39 = vsel %vm453_vm3, %v4329_v41, %v4333_v54  ;;  %v9978_v54 = vld [vmem:[#allocation49_spill] sm:$0xff] }
 0x402   : >> { %v9664_v62 = vunpack.i.h.bf16 %v7319_v53  ;;  %v4344_v60 = vunpack.i.h.bf16 %v9978_v54  ;;  %v9981_v16 = vunpack.i.h.bf16 %v7321_v38 }
 0x403   : >> { %v1358_v26 = vsel %vm453_vm3, %v4338_v36, %v4339_v4 }
 0x404   : >> { %v7335_v20 = vsel %vm617_vm8, %v9664_v62, %v9976_v52  ;;  %v9668_v52 = vunpack.i.h.bf16 %v7251_v23  ;;  %v5038_v62 = vpack.i.bf16 %v4334_v14, %v1357_v61  ;;  %v5033_v61 = vpack.i.bf16 %v1356_v39, %v4329_v41 }
 0x405   : >> { %9977 = vst [vmem:[#allocation45_spill] sm:$0xff] %v7335_v20  ;;  %v9986_v39 = vunpack.i.h.bf16 %v6595_v27 }
 0x406   : >> { %5024 = vrot.lane.b32.xlu2 %v5023_v56, %s5583_s21 }
 0x407   : >> { %5019 = vrot.lane.b32.xlu1 %v5018_v18, %s5583_s21  ;;  %5029 = vrot.lane.b32.xlu0 %v5028_v45, %s5583_s21 }
 0x408   : >> { %v7344_v47 = vpop.permute.xlu2 %4859 }
 0x409   : >> { %v4810_v49 = vpop.permute.xlu1 %4809  ;;  %v4820_v13 = vpop.permute.xlu0 %4819  ;;  %v4862_v55 = vunpack.i.h.bf16 %v7344_v47  ;;  %v9667_v42 = vunpack.i.l.bf16 %v7344_v47 }
 0x40a   : >> { %v4812_v56 = vunpack.i.h.bf16 %v4810_v49  ;;  %v4811_v59 = vunpack.i.l.bf16 %v4810_v49  ;;  %v4822_v18 = vunpack.i.h.bf16 %v4820_v13  ;;  %v4821_v45 = vunpack.i.l.bf16 %v4820_v13 }
 0x40b   : >> { %v7354_v20 = vsel %vm617_vm8, %v9667_v42, %v4862_v55  ;;  %v5043_v13 = vpack.i.bf16 %v1358_v26, %v4338_v36  ;;  %v4343_v55 = vunpack.i.l.bf16 %v9978_v54  ;;  %v4453_v42 = vunpack.i.l.bf16 %v6595_v27 }
 0x40c   : >> { %9979 = vst [vmem:[#allocation31_spill] sm:$0xff] %v7354_v20  ;;  %v7359_v34 = vsel %vm617_vm8, %v9668_v52, %v4821_v45  ;;  %v7364_v46 = vsel %vm617_vm8, %v9981_v16, %v4811_v59  ;;  %v7367_v49 = vsel %vm617_vm8, %v4821_v45, %v4822_v18  ;;  %v7370_v14 = vsel %vm617_vm8, %v4811_v59, %v4812_v56 }
 0x40d   : >> { %9980 = vst [vmem:[#allocation48_spill] sm:$0xff] %v7359_v34  ;;  %v9985_v16 = vunpack.i.l.bf16 %v6489_v40  ;;  %v1359_v36 = vsel %vm453_vm3, %v4339_v4, %v4343_v55  ;;  %v4443_v54 = vunpack.i.l.bf16 %v6696_v24  ;;  %v4613_v52 = vunpack.i.l.bf16 %v6929_v37 }
 0x40e   : >> { %9982 = vst [vmem:[#allocation47_spill] sm:$0xff] %v7364_v46  ;;  %5039 = vrot.lane.b32.xlu2 %v5038_v62, %s5583_s21  ;;  %v1463_v62 = vsel %vm465_vm4, %v4453_v42, %v9986_v39  ;;  %v5048_v4 = vpack.i.bf16 %v4343_v55, %v1359_v36 }
 0x40f   : >> { %9983 = vst [vmem:[#allocation37_spill] sm:$0xff] %v7367_v49  ;;  %5034 = vrot.lane.b32.xlu1 %v5033_v61, %s5583_s21  ;;  %5044 = vrot.lane.b32.xlu0 %v5043_v13, %s5583_s21  ;;  %v1360_v18 = vsel %vm453_vm3, %v4344_v60, %v9985_v16  ;;  %v9670_v61 = vunpack.i.h.bf16 %v6784_v50  ;;  %v4603_v13 = vunpack.i.l.bf16 %v6784_v50  ;;  %v9671_v16 = vunpack.i.h.bf16 %v6929_v37 }
 0x410   : >> { %9984 = vst [vmem:[#allocation50_spill] sm:$0xff] %v7370_v14  ;;  %v7380_v45 = vpop.permute.xlu2 %4874  ;;  %v5053_v59 = vpack.i.bf16 %v1360_v18, %v4344_v60  ;;  %v9987_v14 = vunpack.i.l.bf16 %v7281_v48  ;;  %v5058_v39 = vpack.i.bf16 %v1463_v62, %v4453_v42  ;;  %v9989_v60 = vunpack.i.h.bf16 %v6696_v24 }
 0x411   : >> { %v7382_v56 = vpop.permute.xlu1 %4824  ;;  %v7384_v41 = vpop.permute.xlu0 %4834  ;;  %v1636_v48 = vsel %vm489_vm1, %v4603_v13, %v9670_v61  ;;  %v4847_v42 = vunpack.i.h.bf16 %v7316_v9 }
 0x412   : >> { %v9669_v26 = vunpack.i.h.bf16 %v7382_v56  ;;  %v1460_v18 = vsel %vm465_vm4, %v4443_v54, %v9989_v60  ;;  %v4837_v36 = vunpack.i.h.bf16 %v7384_v41 }
 0x413   : >> { %v5068_v49 = vpack.i.bf16 %v1460_v18, %v4443_v54  ;;  %v4593_v54 = vunpack.i.l.bf16 %v6890_v1 }
 0x414   : >> { %v7401_v27 = vsel %vm617_vm8, %v9669_v26, %v9987_v14  ;;  %v1639_v14 = vsel %vm489_vm1, %v4613_v52, %v9671_v16 }
 0x415   : >> { %9988 = vst [vmem:[#allocation49_spill] sm:$0xff] %v7401_v27  ;;  %v5063_v18 = vpack.i.bf16 %v1639_v14, %v4613_v52  ;;  %v9994_v14 = vunpack.i.h.bf16 %v6551_v19 }
 0x416   : >> { %5054 = vrot.lane.b32.xlu2 %v5053_v59, %s5583_s21 }
 0x417   : >> { %5049 = vrot.lane.b32.xlu1 %v5048_v4, %s5583_s21  ;;  %5059 = vrot.lane.b32.xlu0 %v5058_v39, %s5583_s21 }
 0x418   : >> { %v7415_v55 = vpop.permute.xlu2 %4889 }
 0x419   : >> { %v4840_v62 = vpop.permute.xlu1 %4839  ;;  %v4850_v59 = vpop.permute.xlu0 %4849  ;;  %v4892_v24 = vunpack.i.h.bf16 %v7415_v55  ;;  %v9673_v4 = vunpack.i.l.bf16 %v7415_v55 }
 0x41a   : >> { %v4842_v39 = vunpack.i.h.bf16 %v4840_v62  ;;  %v4841_v60 = vunpack.i.l.bf16 %v4840_v62  ;;  %v4852_v26 = vunpack.i.h.bf16 %v4850_v59  ;;  %v4851_v61 = vunpack.i.l.bf16 %v4850_v59 }
 0x41b   : >> { %v7424_v16 = vsel %vm617_vm8, %v9673_v4, %v4892_v24  ;;  %v5073_v62 = vpack.i.bf16 %v1636_v48, %v4603_v13  ;;  %v4423_v59 = vunpack.i.l.bf16 %v6551_v19  ;;  %v4433_v24 = vunpack.i.l.bf16 %v6663_v33 }
 0x41c   : >> { %9990 = vst [vmem:[#allocation109_spill] sm:$0xff] %v7424_v16  ;;  %v7427_v20 = vsel %vm617_vm8, %v4847_v42, %v4851_v61  ;;  %v7430_v40 = vsel %vm617_vm8, %v4837_v36, %v4841_v60  ;;  %v7433_v46 = vsel %vm617_vm8, %v4851_v61, %v4852_v26  ;;  %v7436_v34 = vsel %vm617_vm8, %v4841_v60, %v4842_v39 }
 0x41d   : >> { %9991 = vst [vmem:[#allocation110_spill] sm:$0xff] %v7433_v46  ;;  %v4413_v4 = vunpack.i.l.bf16 %v6631_v21  ;;  %v9993_v61 = vunpack.i.h.bf16 %v6890_v1  ;;  %v1454_v39 = vsel %vm465_vm4, %v4423_v59, %v9994_v14  ;;  %v4573_v1 = vunpack.i.l.bf16 %v6760_v29 }
 0x41e   : >> { %9992 = vst [vmem:[#allocation111_spill] sm:$0xff] %v7436_v34  ;;  %5069 = vrot.lane.b32.xlu2 %v5068_v49, %s5583_s21  ;;  %v9995_v49 = vunpack.i.h.bf16 %v6663_v33  ;;  %v4583_v46 = vunpack.i.l.bf16 %v6850_v7  ;;  %v9997_v14 = vunpack.i.l.bf16 %v7344_v47  ;;  %v9998_v47 = vunpack.i.h.bf16 %v6760_v29 }
 0x41f   : >> { %5064 = vrot.lane.b32.xlu1 %v5063_v18, %s5583_s21  ;;  %5074 = vrot.lane.b32.xlu0 %v5073_v62, %s5583_s21  ;;  %v1633_v13 = vsel %vm489_vm1, %v4593_v54, %v9993_v61  ;;  %v9996_v62 = vunpack.i.h.bf16 %v6631_v21  ;;  %v4846_v61 = vunpack.i.l.bf16 %v7316_v9  ;;  %v4836_v21 = vunpack.i.l.bf16 %v7384_v41 }
 0x420   : >> { %v7445_v26 = vpop.permute.xlu2 %4904  ;;  %v1457_v60 = vsel %vm465_vm4, %v4433_v24, %v9995_v49  ;;  %v5083_v27 = vpack.i.bf16 %v1633_v13, %v4593_v54  ;;  %v5088_v49 = vpack.i.bf16 %v1454_v39, %v4423_v59  ;;  %v4826_v9 = vunpack.i.l.bf16 %v7382_v56 }
 0x421   : >> { %v4855_v48 = vpop.permute.xlu1 %4854  ;;  %v7450_v52 = vpop.permute.xlu0 %4864  ;;  %v1451_v34 = vsel %vm465_vm4, %v4413_v4, %v9996_v62  ;;  %v1627_v54 = vsel %vm489_vm1, %v4573_v1, %v9998_v47  ;;  %v9999_v59 = vunpack.i.h.bf16 %v6850_v7 }
 0x422   : >> { %v4857_v18 = vunpack.i.h.bf16 %v4855_v48  ;;  %v4856_v16 = vunpack.i.l.bf16 %v4855_v48  ;;  %v5078_v48 = vpack.i.bf16 %v1457_v60, %v4433_v24  ;;  %v5098_v62 = vpack.i.bf16 %v1451_v34, %v4413_v4 }
 0x423   : >> { %v1630_v41 = vsel %vm489_vm1, %v4583_v46, %v9999_v59  ;;  %v4816_v24 = vunpack.i.l.bf16 %v7251_v23  ;;  %v9675_v34 = vunpack.i.h.bf16 %v7380_v45  ;;  %v9674_v4 = vunpack.i.h.bf16 %v7450_v52 }
 0x424   : >> { %v2391_v19 = vsel %vm617_vm8, %v4856_v16, %v4857_v18  ;;  %v7468_v33 = vsel %vm617_vm8, %v4857_v18, %v9997_v14  ;;  %v2388_v16 = vsel %vm617_vm8, %v4846_v61, %v4847_v42  ;;  %v2385_v60 = vsel %vm617_vm8, %v4836_v21, %v4837_v36 }
 0x425   : >> { %2803 = vmatpush.msra.mxu0 %v2391_v19  ;;  %v5103_v14 = vpack.i.bf16 %v1627_v54, %v4573_v1  ;;  %v5093_v54 = vpack.i.bf16 %v1630_v41, %v4583_v46  ;;  %v4796_v59 = vunpack.i.l.bf16 %v7319_v53  ;;  %v10007_v46 = vunpack.i.h.bf16 %v7321_v38 }
 0x426   : >> { %5084 = vrot.lane.b32.xlu2 %v5083_v27, %s5583_s21 }
 0x427   : >> { %5079 = vrot.lane.b32.xlu1 %v5078_v48, %s5583_s21  ;;  %5089 = vrot.lane.b32.xlu0 %v5088_v49, %s5583_s21  ;;  %v4806_v49 = vunpack.i.l.bf16 %v7321_v38  ;;  %v10000_v48 = vunpack.i.h.bf16 %v7382_v56  ;;  %v10010_v38 = vunpack.i.h.bf16 %v6525_v31 }
 0x428   : >> { %2804 = vmatpush.msra.mxu0 %v2388_v16  ;;  %v7484_v27 = vpop.permute.xlu2 %4919 }
 0x429   : >> { %v4870_v13 = vpop.permute.xlu1 %4869  ;;  %v4880_v39 = vpop.permute.xlu0 %4879  ;;  %v4922_v42 = vunpack.i.h.bf16 %v7484_v27  ;;  %v4921_v29 = vunpack.i.l.bf16 %v7484_v27  ;;  %v2382_v16 = vsel %vm617_vm8, %v4826_v9, %v10000_v48  ;;  %v4563_v9 = vunpack.i.l.bf16 %v6821_v28 }
 0x42a   : >> { %v4872_v7 = vunpack.i.h.bf16 %v4870_v13  ;;  %v4871_v18 = vunpack.i.l.bf16 %v4870_v13  ;;  %v4882_v61 = vunpack.i.h.bf16 %v4880_v39  ;;  %v4881_v19 = vunpack.i.l.bf16 %v4880_v39  ;;  %2805 = vmatpush.msra.mxu0 %v2385_v60 }
 0x42b   : >> { %v7497_v47 = vsel %vm617_vm8, %v4921_v29, %v4922_v42  ;;  %v10006_v13 = vunpack.i.h.bf16 %v7251_v23  ;;  %v4393_v42 = vunpack.i.l.bf16 %v6525_v31  ;;  %v4403_v60 = vunpack.i.l.bf16 %v6597_v2 }
 0x42c   : >> { %10001 = vst [vmem:[#allocation112_spill] sm:$0xff] %v7497_v47  ;;  %2806 = vmatpush.msra.mxu0 %v2382_v16  ;;  %v7502_v36 = vsel %vm617_vm8, %v9675_v34, %v4881_v19  ;;  %v7507_v1 = vsel %vm617_vm8, %v9674_v4, %v4871_v18  ;;  %v7510_v56 = vsel %vm617_vm8, %v4881_v19, %v4882_v61  ;;  %v4383_v61 = vunpack.i.l.bf16 %v6585_v30 }
 0x42d   : >> { %10002 = vst [vmem:[#allocation113_spill] sm:$0xff] %v7502_v36  ;;  %v7513_v21 = vsel %vm617_vm8, %v4871_v18, %v4872_v7  ;;  %v2379_v39 = vsel %vm617_vm8, %v4816_v24, %v10006_v13  ;;  %v4786_v7 = vunpack.i.l.bf16 %v7181_v15  ;;  %v2376_v23 = vsel %vm617_vm8, %v4806_v49, %v10007_v46 }
 0x42e   : >> { %10003 = vst [vmem:[#allocation114_spill] sm:$0xff] %v7507_v1  ;;  %2807 = vmatpush.msra.mxu0 %v2379_v39  ;;  %5099 = vrot.lane.b32.xlu2 %v5098_v62, %s5583_s21  ;;  %v10008_v24 = vunpack.i.h.bf16 %v6821_v28  ;;  %v4776_v62 = vunpack.i.l.bf16 %v7255_v32  ;;  %v10009_v16 = vunpack.i.h.bf16 %v7319_v53  ;;  %v1445_v49 = vsel %vm465_vm4, %v4393_v42, %v10010_v38 }
 0x42f   : >> { %10004 = vst [vmem:[#allocation115_spill] sm:$0xff] %v7510_v56  ;;  %5094 = vrot.lane.b32.xlu1 %v5093_v54, %s5583_s21  ;;  %5104 = vrot.lane.b32.xlu0 %v5103_v14, %s5583_s21  ;;  %v10011_v54 = vunpack.i.h.bf16 %v6597_v2  ;;  %v10012_v39 = vunpack.i.h.bf16 %v6585_v30  ;;  %v4766_v53 = vunpack.i.l.bf16 %v7253_v63  ;;  %v5118_v38 = vpack.i.bf16 %v1445_v49, %v4393_v42 }
 0x430   : >> { %10005 = vst [vmem:[#allocation116_spill] sm:$0xff] %v7513_v21  ;;  %2808 = vmatpush.msra.mxu0 %v2376_v23  ;;  %v7530_v41 = vpop.permute.xlu2 %4934  ;;  %v1624_v18 = vsel %vm489_vm1, %v4563_v9, %v10008_v24  ;;  %v2373_v14 = vsel %vm617_vm8, %v4796_v59, %v10009_v16  ;;  %v4543_v23 = vunpack.i.l.bf16 %v6748_v12  ;;  %v10013_v59 = vunpack.i.h.bf16 %v7181_v15 }
 0x431   : >> { %v7536_v19 = vpop.permute.xlu1 %4884  ;;  %v7538_v48 = vpop.permute.xlu0 %4894  ;;  %v1448_v28 = vsel %vm465_vm4, %v4403_v60, %v10011_v54  ;;  %v1442_v46 = vsel %vm465_vm4, %v4383_v61, %v10012_v39  ;;  %v4553_v24 = vunpack.i.l.bf16 %v6788_v51  ;;  %v5113_v2 = vpack.i.bf16 %v1624_v18, %v4563_v9 }
 0x432   : >> { %v9676_v13 = vunpack.i.h.bf16 %v7536_v19  ;;  %2809 = vmatpush.msra.mxu0 %v2373_v14  ;;  %v2370_v31 = vsel %vm617_vm8, %v4786_v7, %v10013_v59  ;;  %v4756_v16 = vunpack.i.l.bf16 %v7115_v6  ;;  %v10014_v14 = vunpack.i.l.bf16 %v7415_v55 }
 0x433   : >> { %v5108_v54 = vpack.i.bf16 %v1448_v28, %v4403_v60  ;;  %v10016_v39 = vunpack.i.h.bf16 %v7255_v32  ;;  %v5128_v9 = vpack.i.bf16 %v1442_v46, %v4383_v61  ;;  %v4746_v7 = vunpack.i.l.bf16 %v7188_v8 }
 0x434   : >> { %2810 = vmatpush.msra.mxu0 %v2370_v31  ;;  %v7565_v30 = vsel %vm617_vm8, %v9676_v13, %v10014_v14  ;;  %v10017_v55 = vunpack.i.h.bf16 %v7253_v63  ;;  %v10018_v42 = vunpack.i.h.bf16 %v6748_v12  ;;  %v10019_v60 = vunpack.i.h.bf16 %v6788_v51 }
 0x435   : >> { %10015 = vst [vmem:[#allocation117_spill] sm:$0xff] %v7565_v30  ;;  %v2367_v15 = vsel %vm617_vm8, %v4776_v62, %v10016_v39  ;;  %v4736_v61 = vunpack.i.l.bf16 %v7186_v44  ;;  %v10020_v28 = vunpack.i.h.bf16 %v7115_v6  ;;  %v9680_v46 = vunpack.i.h.bf16 %v7445_v26  ;;  %v10061_v30 = vld [vmem:[#allocation104_spill] sm:$0xff] }
 0x436   : >> { %2811 = vmatpush.msra.mxu0 %v2367_v15  ;;  %5114 = vrot.lane.b32.xlu2 %v5113_v2, %s5583_s21  ;;  %v2364_v18 = vsel %vm617_vm8, %v4766_v53, %v10017_v55  ;;  %v1618_v32 = vsel %vm489_vm1, %v4543_v23, %v10018_v42  ;;  %v1621_v62 = vsel %vm489_vm1, %v4553_v24, %v10019_v60  ;;  %v9677_v12 = vunpack.i.h.bf16 %v7538_v48 }
 0x437   : >> { %5109 = vrot.lane.b32.xlu1 %v5108_v54, %s5583_s21  ;;  %5119 = vrot.lane.b32.xlu0 %v5118_v38, %s5583_s21  ;;  %v2361_v63 = vsel %vm617_vm8, %v4756_v16, %v10020_v28  ;;  %v5133_v39 = vpack.i.bf16 %v1618_v32, %v4543_v23  ;;  %v4726_v6 = vunpack.i.l.bf16 %v7067_v17  ;;  %v10021_v16 = vunpack.i.h.bf16 %v7188_v8 }
 0x438   : >> { %2812 = vmatpush.msra.mxu0 %v2364_v18  ;;  %v7584_v49 = vpop.permute.xlu2 %4949  ;;  %v4533_v42 = vunpack.i.l.bf16 %v6776_v57  ;;  %v5123_v32 = vpack.i.bf16 %v1621_v62, %v4553_v24  ;;  %v4716_v60 = vunpack.i.l.bf16 %v7119_v58  ;;  %v10027_v28 = vunpack.i.h.bf16 %v7186_v44 }
 0x439   : >> { %v4900_v53 = vpop.permute.xlu1 %4899  ;;  %v4910_v59 = vpop.permute.xlu0 %4909  ;;  %v4952_v51 = vunpack.i.h.bf16 %v7584_v49  ;;  %v9687_v31 = vunpack.i.l.bf16 %v7584_v49  ;;  %v2358_v15 = vsel %vm617_vm8, %v4746_v7, %v10021_v16  ;;  %v10030_v24 = vunpack.i.h.bf16 %v7067_v17  ;;  %v10034_v17 = vld [vmem:[#allocation46_spill] sm:$0xff] }
 0x43a   : >> { %v4902_v2 = vunpack.i.h.bf16 %v4900_v53  ;;  %v4901_v14 = vunpack.i.l.bf16 %v4900_v53  ;;  %v4912_v38 = vunpack.i.h.bf16 %v4910_v59  ;;  %v4911_v54 = vunpack.i.l.bf16 %v4910_v59  ;;  %2813 = vmatpush.msra.mxu0 %v2361_v63  ;;  %v10028_v53 = vld [vmem:[#allocation54_spill] sm:$0xff] }
 0x43b   : >> { %v7601_v55 = vsel %vm617_vm8, %v9687_v31, %v4952_v51  ;;  %v2355_v63 = vsel %vm617_vm8, %v4736_v61, %v10027_v28  ;;  %v4374_v59 = vunpack.i.h.bf16 %v10028_v53  ;;  %v10029_v51 = vld [vmem:[#allocation55_spill] sm:$0xff]  ;;  %v2352_v62 = vsel %vm617_vm8, %v4726_v6, %v10030_v24 }
 0x43c   : >> { %10022 = vst [vmem:[#allocation118_spill] sm:$0xff] %v7601_v55  ;;  %2814 = vmatpush.msra.mxu0 %v2358_v15  ;;  %v7606_v18 = vsel %vm617_vm8, %v9680_v46, %v4911_v54  ;;  %v7611_v23 = vsel %vm617_vm8, %v9677_v12, %v4901_v14  ;;  %v7614_v8 = vsel %vm617_vm8, %v4911_v54, %v4912_v38  ;;  %v4368_v16 = vunpack.i.l.bf16 %v10029_v51 }
 0x43d   : >> { %10023 = vst [vmem:[#allocation119_spill] sm:$0xff] %v7606_v18  ;;  %v7617_v7 = vsel %vm617_vm8, %v4901_v14, %v4902_v2  ;;  %v4706_v38 = vunpack.i.l.bf16 %v7117_v25  ;;  %v10031_v61 = vunpack.i.h.bf16 %v6776_v57  ;;  %v10032_v54 = vunpack.i.h.bf16 %v7119_v58  ;;  %v10037_v58 = vld [vmem:[#allocation52_spill] sm:$0xff] }
 0x43e   : >> { %10024 = vst [vmem:[#allocation120_spill] sm:$0xff] %v7611_v23  ;;  %2815 = vmatpush.msra.mxu0 %v2355_v63  ;;  %5129 = vrot.lane.b32.xlu2 %v5128_v9, %s5583_s21  ;;  %v10035_v28 = vunpack.i.l.bf16 %v10034_v17  ;;  %v10036_v63 = vunpack.i.h.bf16 %v10029_v51  ;;  %v10038_v4 = vunpack.i.h.bf16 %v7117_v25  ;;  %v9679_v51 = vunpack.i.h.bf16 %v6762_v22 }
 0x43f   : >> { %10025 = vst [vmem:[#allocation121_spill] sm:$0xff] %v7614_v8  ;;  %5124 = vrot.lane.b32.xlu1 %v5123_v32, %s5583_s21  ;;  %5134 = vrot.lane.b32.xlu0 %v5133_v39, %s5583_s21  ;;  %v1551_v2 = vsel %vm477_vm0, %v4533_v42, %v10031_v61  ;;  %v2349_v15 = vsel %vm617_vm8, %v4716_v60, %v10032_v54  ;;  %v10033_v39 = vld [vmem:[#allocation43_spill] sm:$0xff]  ;;  %v4359_v61 = vunpack.i.h.bf16 %v10037_v58  ;;  %v9678_v60 = vunpack.i.h.bf16 %v6706_v10  ;;  %v932_v8 = vld [vmem:[%s7653_s24 + $0x78] sm:$0xff] }
 0x440   : >> { %10026 = vst [vmem:[#allocation122_spill] sm:$0xff] %v7617_v7  ;;  %2816 = vmatpush.msra.mxu0 %v2352_v62  ;;  %v7633_v44 = vpop.permute.xlu2 %4964  ;;  %v9683_v32 = vunpack.i.l.bf16 %v10033_v39  ;;  %v1368_v6 = vsel %vm453_vm3, %v4374_v59, %v10035_v28  ;;  %v1366_v57 = vsel %vm453_vm3, %v4368_v16, %v10036_v63  ;;  %v917_v62 = vld [vmem:[%s7653_s24] sm:$0xff]  ;;  %v4513_v54 = vunpack.i.l.bf16 %v6706_v10 }
 0x441   : >> { %v7638_v14 = vpop.permute.xlu1 %4914  ;;  %v7640_v9 = vpop.permute.xlu0 %4924  ;;  %v2346_v28 = vsel %vm617_vm8, %v4706_v38, %v10038_v4  ;;  %v4523_v63 = vunpack.i.l.bf16 %v6762_v22  ;;  %v5143_v34 = vpack.i.bf16 %v1551_v2, %v4533_v42  ;;  %v5138_v13 = vpack.i.bf16 %v1368_v6, %v4374_v59 }
 0x442   : >> { %v9681_v24 = vunpack.i.h.bf16 %v7638_v14  ;;  %2817 = vmatpush.msra.mxu0 %v2349_v15  ;;  %v5148_v12 = vpack.i.bf16 %v1366_v57, %v4368_v16  ;;  %v1364_v25 = vsel %vm453_vm3, %v4359_v61, %v9683_v32  ;;  %v1545_v27 = vsel %vm477_vm0, %v4513_v54, %v9678_v60 }
 0x443   : >> { %v1548_v4 = vsel %vm477_vm0, %v4523_v63, %v9679_v51  ;;  %v9689_v32 = vunpack.i.h.bf16 %v6750_v11  ;;  %v4473_v31 = vunpack.i.l.bf16 %v6744_v35  ;;  %v4643_v23 = vunpack.i.l.bf16 %v10061_v30 }
 0x444   : >> { %2818 = vmatpush.msra.mxu0 %v2346_v28  ;;  %v7669_v15 = vsel %vm617_vm8, %v9681_v24, %v4921_v29  ;;  %v5158_v28 = vpack.i.bf16 %v1364_v25, %v4359_v61  ;;  %v5163_v25 = vpack.i.bf16 %v1545_v27, %v4513_v54  ;;  %v10045_v24 = vld [vmem:[#allocation53_spill] sm:$0xff] }
 0x445   : >> { %10039 = vst [vmem:[#allocation54_spill] sm:$0xff] %v7669_v15  ;;  %2819 = vmatmul.f32.vlgmr.msra.gmra.mxu0 %v917_v62  ;;  %v922_v62 = vld [vmem:[%s7653_s24 + $0x28] sm:$0xff]  ;;  %v9688_v54 = vunpack.i.h.bf16 %v10045_v24 }
 0x446   : >> { %5144 = vrot.lane.b32.xlu2 %v5143_v34, %s5583_s21  ;;  %v9682_v34 = vunpack.i.h.bf16 %v7530_v41 }
 0x447   : >> { %5139 = vrot.lane.b32.xlu1 %v5138_v13, %s5583_s21  ;;  %5149 = vrot.lane.b32.xlu0 %v5148_v12, %s5583_s21  ;;  %v9686_v13 = vunpack.i.h.bf16 %v7640_v9 }
 0x448   : >> { %v7683_v29 = vpop.permute.xlu2 %4979 }
 0x449   : >> { %v4930_v42 = vpop.permute.xlu1 %4929  ;;  %v4940_v12 = vpop.permute.xlu0 %4939  ;;  %v4982_v59 = vunpack.i.h.bf16 %v7683_v29  ;;  %v9684_v16 = vunpack.i.l.bf16 %v7683_v29  ;;  %v10059_v1 = vunpack.i.l.bf16 %v7683_v29 }
 0x44a   : >> { %v4932_v38 = vunpack.i.h.bf16 %v4930_v42  ;;  %v4931_v2 = vunpack.i.l.bf16 %v4930_v42  ;;  %v4942_v6 = vunpack.i.h.bf16 %v4940_v12  ;;  %v4941_v57 = vunpack.i.l.bf16 %v4940_v12 }
 0x44b   : >> { %v7693_v60 = vsel %vm617_vm8, %v9684_v16, %v4982_v59  ;;  %v4503_v12 = vunpack.i.l.bf16 %v6758_v5  ;;  %v5153_v59 = vpack.i.bf16 %v1548_v4, %v4523_v63  ;;  %v4493_v16 = vunpack.i.l.bf16 %v6750_v11 }
 0x44c   : >> { %10040 = vst [vmem:[#allocation55_spill] sm:$0xff] %v7693_v60  ;;  %v7698_v51 = vsel %vm617_vm8, %v9682_v34, %v4941_v57  ;;  %v7703_v46 = vsel %vm617_vm8, %v9686_v13, %v4931_v2  ;;  %v7706_v42 = vsel %vm617_vm8, %v4941_v57, %v4942_v6  ;;  %v7709_v61 = vsel %vm617_vm8, %v4931_v2, %v4932_v38  ;;  %v10056_v60 = vld [vmem:[#allocation15_spill] sm:$0xff] }
 0x44d   : >> { %10041 = vst [vmem:[#allocation43_spill] sm:$0xff] %v7698_v51  ;;  %2822 = vmatmul.f32.gmra.mxu0 %v922_v62  ;;  %v4353_v34 = vunpack.i.l.bf16 %v10045_v24  ;;  %v9685_v6 = vunpack.i.h.bf16 %v6758_v5  ;;  %v1539_v57 = vsel %vm477_vm0, %v4493_v16, %v9689_v32  ;;  %v4463_v13 = vunpack.i.l.bf16 %v6708_v0 }
 0x44e   : >> { %10042 = vst [vmem:[#allocation46_spill] sm:$0xff] %v7703_v46  ;;  %5159 = vrot.lane.b32.xlu2 %v5158_v28, %s5583_s21  ;;  %v927_v28 = vld [vmem:[%s7653_s24 + $0x50] sm:$0xff]  ;;  %v5178_v7 = vpack.i.bf16 %v1539_v57, %v4493_v16 }
 0x44f   : >> { %10043 = vst [vmem:[#allocation52_spill] sm:$0xff] %v7706_v42  ;;  %5154 = vrot.lane.b32.xlu1 %v5153_v59, %s5583_s21  ;;  %5164 = vrot.lane.b32.xlu0 %v5163_v25, %s5583_s21  ;;  %v1542_v63 = vsel %vm477_vm0, %v4503_v12, %v9685_v6  ;;  %v1362_v2 = vsel %vm453_vm3, %v4353_v34, %v9688_v54  ;;  %v4483_v59 = vunpack.i.l.bf16 %v6659_v3  ;;  %v9691_v6 = vunpack.i.h.bf16 %v6708_v0 }
 0x450   : >> { %10044 = vst [vmem:[#allocation123_spill] sm:$0xff] %v7709_v61  ;;  %v7720_v27 = vpop.permute.xlu2 %4994  ;;  %v5173_v21 = vpack.i.bf16 %v1542_v63, %v4503_v12  ;;  %v10046_v54 = vunpack.i.l.bf16 %v7584_v49  ;;  %v5168_v56 = vpack.i.bf16 %v1362_v2, %v4353_v34  ;;  %v9692_v25 = vunpack.i.h.bf16 %v6744_v35 }
 0x451   : >> { %v7725_v4 = vpop.permute.xlu1 %4944  ;;  %v7727_v38 = vpop.permute.xlu0 %4954  ;;  %v10048_v12 = vunpack.i.h.bf16 %v6659_v3 }
 0x452   : >> { %v9690_v62 = vunpack.i.h.bf16 %v7725_v4  ;;  %v1533_v34 = vsel %vm477_vm0, %v4473_v31, %v9692_v25  ;;  %v10051_v61 = vunpack.i.h.bf16 %v7727_v38 }
 0x453   : >> { %v1536_v49 = vsel %vm477_vm0, %v4483_v59, %v10048_v12  ;;  %v5188_v47 = vpack.i.bf16 %v1533_v34, %v4473_v31 }
 0x454   : >> { %v7747_v32 = vsel %vm617_vm8, %v9690_v62, %v10046_v54  ;;  %v1530_v54 = vsel %vm477_vm0, %v4463_v13, %v9691_v6  ;;  %v5183_v34 = vpack.i.bf16 %v1536_v49, %v4483_v59 }
 0x455   : >> { %10047 = vst [vmem:[#allocation53_spill] sm:$0xff] %v7747_v32  ;;  %2825 = vmatmul.f32.gmra.mxu0 %v927_v28 }
 0x456   : >> { %5174 = vrot.lane.b32.xlu2 %v5173_v21, %s5583_s21  ;;  %v9694_v21 = vunpack.i.h.bf16 %v7633_v44 }
 0x457   : >> { %5169 = vrot.lane.b32.xlu1 %v5168_v56, %s5583_s21  ;;  %5179 = vrot.lane.b32.xlu0 %v5178_v7, %s5583_s21 }
 0x458   : >> { %v7762_v16 = vpop.permute.xlu2 %5009 }
 0x459   : >> { %v4960_v63 = vpop.permute.xlu1 %4959  ;;  %v4970_v7 = vpop.permute.xlu0 %4969  ;;  %v5012_v2 = vunpack.i.h.bf16 %v7762_v16  ;;  %v9693_v57 = vunpack.i.l.bf16 %v7762_v16 }
 0x45a   : >> { %v4962_v28 = vunpack.i.h.bf16 %v4960_v63  ;;  %v4961_v12 = vunpack.i.l.bf16 %v4960_v63  ;;  %v4972_v62 = vunpack.i.h.bf16 %v4970_v7  ;;  %v4971_v6 = vunpack.i.l.bf16 %v4970_v7 }
 0x45b   : >> { %v7772_v25 = vsel %vm617_vm8, %v9693_v57, %v5012_v2  ;;  %v5193_v7 = vpack.i.bf16 %v1530_v54, %v4463_v13  ;;  %v4683_v2 = vunpack.i.l.bf16 %v7027_v43  ;;  %v10055_v57 = vld [vmem:[#allocation103_spill] sm:$0xff] }
 0x45c   : >> { %10049 = vst [vmem:[#allocation124_spill] sm:$0xff] %v7772_v25  ;;  %v7777_v56 = vsel %vm617_vm8, %v9694_v21, %v4971_v6  ;;  %v7782_v42 = vsel %vm617_vm8, %v10051_v61, %v4961_v12  ;;  %v7785_v63 = vsel %vm617_vm8, %v4971_v6, %v4972_v62  ;;  %v7788_v31 = vsel %vm617_vm8, %v4961_v12, %v4962_v28  ;;  %v937_v28 = vld [vmem:[%s7653_s24 + $0xa0] sm:$0xff] }
 0x45d   : >> { %10050 = vst [vmem:[#allocation125_spill] sm:$0xff] %v7777_v56  ;;  %2828 = vmatmul.f32.gmra.mxu0 %v932_v8  ;;  %v9696_v21 = vunpack.i.h.bf16 %v10055_v57  ;;  %v4693_v55 = vunpack.i.l.bf16 %v10055_v57  ;;  %v9697_v25 = vunpack.i.h.bf16 %v10056_v60  ;;  %v4673_v61 = vunpack.i.l.bf16 %v10056_v60  ;;  %v10057_v12 = vld [vmem:[#allocation98_spill] sm:$0xff] }
 0x45e   : >> { %10052 = vst [vmem:[#allocation126_spill] sm:$0xff] %v7782_v42  ;;  %5189 = vrot.lane.b32.xlu2 %v5188_v47, %s5583_s21  ;;  %v9695_v6 = vunpack.i.h.bf16 %v7027_v43  ;;  %v10063_v29 = vunpack.i.h.bf16 %v10057_v12  ;;  %v10067_v42 = vld [vmem:[#allocation102_spill] sm:$0xff] }
 0x45f   : >> { %10053 = vst [vmem:[#allocation127_spill] sm:$0xff] %v7785_v63  ;;  %5184 = vrot.lane.b32.xlu1 %v5183_v34, %s5583_s21  ;;  %5194 = vrot.lane.b32.xlu0 %v5193_v7, %s5583_s21  ;;  %v1727_v47 = vsel %vm501_vm2, %v4693_v55, %v9696_v21  ;;  %v1721_v49 = vsel %vm501_vm2, %v4673_v61, %v9697_v25  ;;  %v4663_v7 = vunpack.i.l.bf16 %v10057_v12  ;;  %v9700_v25 = vunpack.i.h.bf16 %v10061_v30 }
 0x460   : >> { %10054 = vst [vmem:[#allocation128_spill] sm:$0xff] %v7788_v31  ;;  %v7799_v13 = vpop.permute.xlu2 %5024  ;;  %v1724_v8 = vsel %vm501_vm2, %v4683_v2, %v9695_v6  ;;  %v10058_v6 = vld [vmem:[#allocation108_spill] sm:$0xff]  ;;  %v5198_v36 = vpack.i.bf16 %v1727_v47, %v4693_v55  ;;  %v5208_v18 = vpack.i.bf16 %v1721_v49, %v4673_v61  ;;  %v4623_v56 = vunpack.i.l.bf16 %v10067_v42 }
 0x461   : >> { %v7804_v62 = vpop.permute.xlu1 %4974  ;;  %v7806_v59 = vpop.permute.xlu0 %4984  ;;  %v4653_v31 = vunpack.i.l.bf16 %v10058_v6  ;;  %v5203_v63 = vpack.i.bf16 %v1724_v8, %v4683_v2  ;;  %v9698_v34 = vunpack.i.h.bf16 %v10058_v6  ;;  %v1718_v2 = vsel %vm501_vm2, %v4663_v7, %v10063_v29 }
 0x462   : >> { %v9699_v54 = vunpack.i.h.bf16 %v7804_v62  ;;  %v1712_v61 = vsel %vm501_vm2, %v4643_v23, %v9700_v25  ;;  %v5213_v32 = vpack.i.bf16 %v1718_v2, %v4663_v7 }
 0x464   : >> { %v7824_v21 = vsel %vm617_vm8, %v9699_v54, %v10059_v1  ;;  %v1715_v1 = vsel %vm501_vm2, %v4653_v31, %v9698_v34  ;;  %v942_v54 = vld [vmem:[%s7653_s24 + $0xc8] sm:$0xff] }
 0x465   : >> { %10060 = vst [vmem:[#allocation103_spill] sm:$0xff] %v7824_v21  ;;  %2831 = vmatmul.f32.gmra.mxu0 %v937_v28  ;;  %v5218_v15 = vpack.i.bf16 %v1715_v1, %v4653_v31  ;;  %v9701_v21 = vunpack.i.h.bf16 %v10067_v42 }
 0x466   : >> { %5204 = vrot.lane.b32.xlu2 %v5203_v63, %s5583_s21  ;;  %v4997_v63 = vunpack.i.h.bf16 %v7720_v27 }
 0x467   : >> { %5199 = vrot.lane.b32.xlu1 %v5198_v36, %s5583_s21  ;;  %5209 = vrot.lane.b32.xlu0 %v5208_v18, %s5583_s21  ;;  %v4987_v36 = vunpack.i.h.bf16 %v7806_v59 }
 0x468   : >> { %v7835_v55 = vpop.permute.xlu2 %5039 }
 0x469   : >> { %10062 = vst [vmem:[#allocation15_spill] sm:$0xff] %v7835_v55  ;;  %v4990_v8 = vpop.permute.xlu1 %4989  ;;  %v5000_v18 = vpop.permute.xlu0 %4999 }
 0x46a   : >> { %v4992_v47 = vunpack.i.h.bf16 %v4990_v8  ;;  %v4991_v49 = vunpack.i.l.bf16 %v4990_v8  ;;  %v5002_v28 = vunpack.i.h.bf16 %v5000_v18  ;;  %v5001_v34 = vunpack.i.l.bf16 %v5000_v18  ;;  %v10068_v18 = vld [vmem:[#allocation90_spill] sm:$0xff] }
 0x46b   : >> { %v5223_v8 = vpack.i.bf16 %v1712_v61, %v4643_v23  ;;  %v9704_v31 = vunpack.i.h.bf16 %v10068_v18  ;;  %v4633_v1 = vunpack.i.l.bf16 %v10068_v18  ;;  %v1706_v23 = vsel %vm501_vm2, %v4623_v56, %v9701_v21 }
 0x46c   : >> { %v7847_v46 = vsel %vm617_vm8, %v4997_v63, %v5001_v34  ;;  %v7850_v29 = vsel %vm617_vm8, %v4987_v36, %v4991_v49  ;;  %v7853_v25 = vsel %vm617_vm8, %v5001_v34, %v5002_v28  ;;  %v7856_v51 = vsel %vm617_vm8, %v4991_v49, %v4992_v47  ;;  %v947_v49 = vld [vmem:[%s7653_s24 + $0xf0] sm:$0xff] }
 0x46d   : >> { %10064 = vst [vmem:[#allocation98_spill] sm:$0xff] %v7850_v29  ;;  %2834 = vmatmul.f32.gmra.mxu0 %v942_v54  ;;  %v1709_v2 = vsel %vm501_vm2, %v4633_v1, %v9704_v31  ;;  %v4996_v29 = vunpack.i.l.bf16 %v7720_v27 }
 0x46e   : >> { %10065 = vst [vmem:[#allocation108_spill] sm:$0xff] %v7853_v25  ;;  %5219 = vrot.lane.b32.xlu2 %v5218_v15, %s5583_s21  ;;  %v5228_v21 = vpack.i.bf16 %v1709_v2, %v4633_v1 }
 0x46f   : >> { %10066 = vst [vmem:[#allocation104_spill] sm:$0xff] %v7856_v51  ;;  %5214 = vrot.lane.b32.xlu1 %v5213_v32, %s5583_s21  ;;  %5224 = vrot.lane.b32.xlu0 %v5223_v8, %s5583_s21  ;;  %v5233_v32 = vpack.i.bf16 %v1706_v23, %v4623_v56  ;;  %v10069_v51 = vunpack.i.l.bf16 %v7762_v16  ;;  %v10070_v56 = vld [vmem:[#allocation73_spill] sm:$0xff]  ;;  %v10071_v23 = vld [vmem:[#allocation74_spill] sm:$0xff]  ;;  %v4976_v16 = vunpack.i.l.bf16 %v7804_v62 }
 0x470   : >> { %v7865_v34 = vpop.permute.xlu2 %5054 }
 0x471   : >> { %v5005_v7 = vpop.permute.xlu1 %5004  ;;  %v5015_v54 = vpop.permute.xlu0 %5014 }
 0x472   : >> { %v5007_v61 = vunpack.i.h.bf16 %v5005_v7  ;;  %v5017_v15 = vunpack.i.h.bf16 %v5015_v54  ;;  %v5016_v47 = vunpack.i.l.bf16 %v5015_v54  ;;  %v5006_v28 = vunpack.i.l.bf16 %v5005_v7 }
 0x473   : >> { %v4986_v54 = vunpack.i.l.bf16 %v7806_v59  ;;  %v10072_v7 = vpack.i.bf16 %v10070_v56, %v10071_v23  ;;  %v2433_v59 = vsel %vm617_vm8, %v4996_v29, %v4997_v63  ;;  %v4956_v23 = vunpack.i.l.bf16 %v7727_v38 }
 0x474   : >> { %v2439_v8 = vsel %vm617_vm8, %v5016_v47, %v5017_v15  ;;  %v7878_v25 = vsel %vm617_vm8, %v5007_v61, %v10069_v51  ;;  %v2436_v51 = vsel %vm617_vm8, %v5006_v28, %v5007_v61  ;;  %v952_v61 = vld [vmem:[%s7653_s24 + $0x118] sm:$0xff]  ;;  %v4966_v28 = vunpack.i.l.bf16 %v7633_v44 }
 0x475   : >> { %2837 = vmatmul.f32.gmra.mxu0 %v947_v49  ;;  %3806 = vmatpush.msra.mxu1 %v2439_v8 }
 0x476   : >> { %2844 = vmatpush.msrb.mxu0 %v2439_v8  ;;  %5234 = vrot.lane.b32.xlu2 %v5233_v32, %s5583_s21  ;;  %v2430_v8 = vsel %vm617_vm8, %v4986_v54, %v4987_v36  ;;  %v10076_v36 = vunpack.i.h.bf16 %v7804_v62  ;;  %v10084_v62 = vunpack.i.h.bf16 %v7633_v44 }
 0x477   : >> { %5229 = vrot.lane.b32.xlu1 %v5228_v21, %s5583_s21  ;;  %5239 = vrot.lane.b32.xlu0 %v10072_v7, %s5583_s21  ;;  %v9703_v21 = vunpack.i.h.bf16 %v7799_v13 }
 0x478   : >> { %3807 = vmatpush.msra.mxu1 %v2436_v51  ;;  %2845 = vmatpush.msrb.mxu0 %v2436_v51  ;;  %v7889_v27 = vpop.permute.xlu2 %5069  ;;  %v2427_v54 = vsel %vm617_vm8, %v4976_v16, %v10076_v36  ;;  %v4946_v51 = vunpack.i.l.bf16 %v7725_v4  ;;  %v2424_v16 = vsel %vm617_vm8, %v4966_v28, %v10084_v62  ;;  %v10085_v36 = vld [vmem:[#allocation65_spill] sm:$0xff] }
 0x479   : >> { %v5020_v1 = vpop.permute.xlu1 %5019  ;;  %v7892_v2 = vpop.permute.xlu0 %5029 }
 0x47a   : >> { %10073 = vst [vmem:[#allocation102_spill] sm:$0xff] %v7892_v2  ;;  %v5022_v47 = vunpack.i.h.bf16 %v5020_v1  ;;  %v5021_v49 = vunpack.i.l.bf16 %v5020_v1  ;;  %v9702_v32 = vunpack.i.l.bf16 %v7892_v2  ;;  %2846 = vmatpush.msrb.mxu0 %v2433_v59  ;;  %3808 = vmatpush.msra.mxu1 %v2433_v59  ;;  %v10078_v1 = vld [vmem:[#allocation69_spill] sm:$0xff]  ;;  %v10079_v59 = vld [vmem:[#allocation68_spill] sm:$0xff] }
 0x47c   : >> { %2847 = vmatpush.msrb.mxu0 %v2430_v8  ;;  %3809 = vmatpush.msra.mxu1 %v2430_v8  ;;  %v7901_v56 = vsel %vm617_vm8, %v5017_v15, %v5021_v49  ;;  %v7908_v63 = vsel %vm617_vm8, %v9703_v21, %v9702_v32  ;;  %v7911_v29 = vsel %vm617_vm8, %v5021_v49, %v5022_v47  ;;  %v10077_v15 = vld [vmem:[#allocation99_spill] sm:$0xff]  ;;  %v10081_v47 = vld [vmem:[#allocation61_spill] sm:$0xff]  ;;  %v10082_v49 = vld [vmem:[#allocation62_spill] sm:$0xff] }
 0x47d   : >> { %10074 = vst [vmem:[#allocation90_spill] sm:$0xff] %v7908_v63  ;;  %2840 = vmatmul.f32.gmra.mxu0 %v952_v61  ;;  %v9707_v7 = vunpack.i.l.bf16 %v10077_v15  ;;  %v10080_v8 = vpack.i.bf16 %v10078_v1, %v10079_v59  ;;  %v10083_v32 = vpack.i.bf16 %v10081_v47, %v10082_v49  ;;  %v9709_v61 = vunpack.i.h.bf16 %v10033_v39  ;;  %v10089_v59 = vld [vmem:[#allocation86_spill] sm:$0xff]  ;;  %v10158_v63 = vld [vmem:[#allocation105_spill] sm:$0xff] }
 0x47e   : >> { %10075 = vst [vmem:[#allocation73_spill] sm:$0xff] %v7911_v29  ;;  %2848 = vmatpush.msrb.mxu0 %v2427_v54  ;;  %3810 = vmatpush.msra.mxu1 %v2427_v54  ;;  %v10086_v54 = vld [vmem:[#allocation66_spill] sm:$0xff]  ;;  %v10090_v47 = vunpack.i.h.bf16 %v7727_v38  ;;  %v10093_v38 = vunpack.i.h.bf16 %v7725_v4  ;;  %v10096_v4 = vunpack.i.l.bf16 %v10037_v58 }
 0x47f   : >> { %5244 = vrot.lane.b32.xlu1 %v10080_v8, %s5583_s21  ;;  %5254 = vrot.lane.b32.xlu0 %v10083_v32, %s5583_s21  ;;  %v10087_v21 = vpack.i.bf16 %v10085_v36, %v10086_v54  ;;  %v9708_v8 = vunpack.i.l.bf16 %v10089_v59  ;;  %v4936_v32 = vunpack.i.l.bf16 %v7530_v41  ;;  %v10091_v36 = vunpack.i.h.bf16 %v6929_v37 }
 0x480   : >> { %2849 = vmatpush.msrb.mxu0 %v2424_v16  ;;  %v7935_v31 = vpop.permute.xlu2 %5084  ;;  %3811 = vmatpush.msra.mxu1 %v2424_v16  ;;  %v2421_v49 = vsel %vm617_vm8, %v4956_v23, %v10090_v47  ;;  %v10092_v16 = vunpack.i.h.bf16 %v6784_v50  ;;  %v2418_v23 = vsel %vm617_vm8, %v4946_v51, %v10093_v38  ;;  %v4926_v47 = vunpack.i.l.bf16 %v7640_v9 }
 0x481   : >> { %5249 = vrot.lane.b32.xlu2 %v10087_v21, %s5583_s21  ;;  %10088 = vst [vmem:[#allocation74_spill] sm:$0xff] %v7935_v31  ;;  %v7940_v44 = vpop.permute.xlu1 %5034  ;;  %v7942_v28 = vpop.permute.xlu0 %5044  ;;  %v9705_v21 = vunpack.i.l.bf16 %v7835_v55  ;;  %v1640_v54 = vsel %vm489_vm1, %v10091_v36, %v9708_v8  ;;  %v10095_v50 = vunpack.i.l.bf16 %v10033_v39  ;;  %v10097_v51 = vunpack.i.h.bf16 %v10045_v24  ;;  %v10099_v8 = vld [vmem:[#allocation57_spill] sm:$0xff] }
 0x482   : >> { %v9706_v62 = vunpack.i.h.bf16 %v7940_v44  ;;  %2850 = vmatpush.msrb.mxu0 %v2421_v49  ;;  %v1637_v1 = vsel %vm489_vm1, %v10092_v16, %v9707_v7  ;;  %3812 = vmatpush.msra.mxu1 %v2421_v49  ;;  %v4916_v16 = vunpack.i.l.bf16 %v7638_v14  ;;  %v10098_v38 = vunpack.i.h.bf16 %v7530_v41 }
 0x483   : >> { %v1365_v49 = vsel %vm453_vm3, %v10095_v50, %v9709_v61  ;;  %v1363_v36 = vsel %vm453_vm3, %v10097_v51, %v10096_v4  ;;  %v10100_v50 = vld [vmem:[#allocation56_spill] sm:$0xff]  ;;  %v4906_v24 = vunpack.i.l.bf16 %v7445_v26  ;;  %v10105_v4 = vunpack.i.h.bf16 %v7445_v26 }
 0x484   : >> { %2851 = vmatpush.msrb.mxu0 %v2418_v23  ;;  %v7968_v37 = vsel %vm617_vm8, %v9706_v62, %v9705_v21  ;;  %3813 = vmatpush.msra.mxu1 %v2418_v23  ;;  %v2415_v21 = vsel %vm617_vm8, %v4936_v32, %v10098_v38  ;;  %v5263_v62 = vpack.i.bf16 %v1365_v49, %v1640_v54  ;;  %v10102_v23 = vunpack.i.h.bf16 %v7640_v9  ;;  %v10120_v38 = vld [vmem:[#allocation92_spill] sm:$0xff] }
 0x485   : >> { %10094 = vst [vmem:[#allocation99_spill] sm:$0xff] %v7968_v37  ;;  %v5268_v7 = vpack.i.bf16 %v1363_v36, %v1637_v1  ;;  %v10101_v61 = vpack.i.bf16 %v10099_v8, %v10100_v50  ;;  %v4896_v1 = vunpack.i.l.bf16 %v7538_v48  ;;  %v4886_v49 = vunpack.i.l.bf16 %v7536_v19  ;;  %v10159_v37 = vld [vmem:[#allocation48_spill] sm:$0xff] }
 0x486   : >> { %2852 = vmatpush.msrb.mxu0 %v2415_v21  ;;  %3814 = vmatpush.msra.mxu1 %v2415_v21  ;;  %v2412_v41 = vsel %vm617_vm8, %v4926_v47, %v10102_v23  ;;  %v2406_v51 = vsel %vm617_vm8, %v4906_v24, %v10105_v4  ;;  %v5071_v50 = vunpack.i.l.bf16 %v7889_v27  ;;  %v10107_v26 = vunpack.i.h.bf16 %v7538_v48  ;;  %v10108_v23 = vld [vmem:[#allocation18_spill] sm:$0xff]  ;;  %v10110_v4 = vld [vmem:[#allocation96_spill] sm:$0xff] }
 0x487   : >> { %5259 = vrot.lane.b32.xlu1 %v10101_v61, %s5583_s21  ;;  %5269 = vrot.lane.b32.xlu0 %v5268_v7, %s5583_s21  ;;  %v10104_v61 = vunpack.i.h.bf16 %v7638_v14 }
 0x488   : >> { %v7994_v32 = vpop.permute.xlu2 %5099  ;;  %2853 = vmatpush.msrb.mxu0 %v2412_v41  ;;  %3815 = vmatpush.msra.mxu1 %v2412_v41  ;;  %v2403_v24 = vsel %vm617_vm8, %v4896_v1, %v10107_v26  ;;  %v10116_v1 = vunpack.i.h.bf16 %v7536_v19  ;;  %v10119_v41 = vld [vmem:[#allocation93_spill] sm:$0xff] }
 0x489   : >> { %5264 = vrot.lane.b32.xlu2 %v5263_v62, %s5583_s21  ;;  %v7997_v21 = vpop.permute.xlu1 %5049  ;;  %v7999_v8 = vpop.permute.xlu0 %5059  ;;  %v2409_v7 = vsel %vm617_vm8, %v4916_v16, %v10104_v61  ;;  %v9712_v62 = vunpack.i.h.bf16 %v7942_v28  ;;  %v4876_v16 = vunpack.i.l.bf16 %v7380_v45  ;;  %v10109_v61 = vld [vmem:[#allocation20_spill] sm:$0xff]  ;;  %v10121_v2 = vpack.i.bf16 %v10119_v41, %v10120_v38 }
 0x48a   : >> { %10103 = vst [vmem:[#allocation69_spill] sm:$0xff] %v7997_v21  ;;  %v9710_v9 = vunpack.i.l.bf16 %v7997_v21  ;;  %v9711_v54 = vunpack.i.h.bf16 %v7999_v8  ;;  %v5061_v47 = vunpack.i.l.bf16 %v7999_v8  ;;  %2854 = vmatpush.msrb.mxu0 %v2409_v7  ;;  %3816 = vmatpush.msra.mxu1 %v2409_v7 }
 0x48c   : >> { %v2487_v14 = vsel %vm617_vm8, %v5061_v47, %v9711_v54  ;;  %v8020_v36 = vsel %vm617_vm8, %v9712_v62, %v9710_v9  ;;  %2855 = vmatpush.msrb.mxu0 %v2406_v51  ;;  %3817 = vmatpush.msra.mxu1 %v2406_v51  ;;  %v4866_v47 = vunpack.i.l.bf16 %v7450_v52  ;;  %v10111_v9 = vld [vmem:[#allocation97_spill] sm:$0xff]  ;;  %v10113_v51 = vld [vmem:[#allocation88_spill] sm:$0xff] }
 0x48d   : >> { %10106 = vst [vmem:[#allocation68_spill] sm:$0xff] %v8020_v36  ;;  %2885 = vmatpush.msra.mxu2 %v2487_v14  ;;  %v10112_v54 = vpack.i.bf16 %v10110_v4, %v10111_v9  ;;  %v10114_v62 = vld [vmem:[#allocation89_spill] sm:$0xff]  ;;  %v2400_v14 = vsel %vm617_vm8, %v4886_v49, %v10116_v1  ;;  %v10122_v9 = vunpack.i.h.bf16 %v7889_v27  ;;  %v10123_v49 = vunpack.i.h.bf16 %v7380_v45  ;;  %v918_v1 = vld [vmem:[%s7653_s24 + $0x8] sm:$0xff] }
 0x48e   : >> { %2856 = vmatpush.msrb.mxu0 %v2403_v24  ;;  %3818 = vmatpush.msra.mxu1 %v2403_v24  ;;  %v10115_v48 = vpack.i.bf16 %v10113_v51, %v10114_v62  ;;  %v10118_v24 = vld [vmem:[#allocation80_spill] sm:$0xff]  ;;  %v10126_v45 = vunpack.i.h.bf16 %v7027_v43  ;;  %v10129_v51 = vunpack.i.h.bf16 %v7450_v52 }
 0x48f   : >> { %5274 = vrot.lane.b32.xlu1 %v10112_v54, %s5583_s21  ;;  %v2484_v62 = vsel %vm617_vm8, %v5071_v50, %v10122_v9  ;;  %v2397_v4 = vsel %vm617_vm8, %v4876_v16, %v10123_v49  ;;  %v10124_v50 = vld [vmem:[#allocation75_spill] sm:$0xff]  ;;  %v10125_v9 = vunpack.i.l.bf16 %v10108_v23  ;;  %v10132_v52 = vunpack.i.l.bf16 %v10118_v24 }
 0x490   : >> { %5284 = vrot.lane.b32.xlu0 %v10115_v48, %s5583_s21  ;;  %v8042_v26 = vpop.permute.xlu2 %5114  ;;  %2857 = vmatpush.msrb.mxu0 %v2400_v14  ;;  %v2394_v7 = vsel %vm617_vm8, %v4866_v47, %v10129_v51  ;;  %v928_v48 = vld [vmem:[%s7653_s24 + $0x58] sm:$0xff]  ;;  %v10133_v47 = vunpack.i.h.bf16 %v6706_v10 }
 0x491   : >> { %10117 = vst [vmem:[#allocation61_spill] sm:$0xff] %v8042_v26  ;;  %5279 = vrot.lane.b32.xlu2 %v10121_v2, %s5583_s21  ;;  %v8052_v54 = vpop.permute.xlu1 %5064  ;;  %v8054_v19 = vpop.permute.xlu0 %5074  ;;  %3819 = vmatpush.msra.mxu1 %v2400_v14  ;;  %v1725_v16 = vsel %vm501_vm2, %v10126_v45, %v10125_v9  ;;  %v10127_v14 = vunpack.i.l.bf16 %v10109_v61  ;;  %v5086_v9 = vunpack.i.l.bf16 %v7935_v31  ;;  %v10131_v45 = vunpack.i.h.bf16 %v6762_v22  ;;  %v10136_v22 = vld [vmem:[#allocation107_spill] sm:$0xff]  ;;  %v10138_v10 = vld [vmem:[#allocation84_spill] sm:$0xff] }
 0x492   : >> { %2886 = vmatpush.msra.mxu2 %v2484_v62  ;;  %v5076_v2 = vunpack.i.l.bf16 %v8054_v19  ;;  %v9717_v38 = vunpack.i.h.bf16 %v8052_v54  ;;  %v5066_v41 = vunpack.i.l.bf16 %v8052_v54  ;;  %2858 = vmatpush.msrb.mxu0 %v2397_v4  ;;  %v10128_v62 = vunpack.i.h.bf16 %v10055_v57 }
 0x493   : >> { %3820 = vmatpush.msra.mxu1 %v2397_v4  ;;  %v10130_v57 = vunpack.i.l.bf16 %v10124_v50  ;;  %v1546_v51 = vsel %vm477_vm0, %v10133_v47, %v10132_v52 }
 0x494   : >> { %v1728_v49 = vsel %vm501_vm2, %v10128_v62, %v10127_v14  ;;  %v2535_v55 = vsel %vm617_vm8, %v5066_v41, %v9717_v38  ;;  %2859 = vmatpush.msrb.mxu0 %v2394_v7  ;;  %v10134_v41 = vunpack.i.h.bf16 %v8054_v19  ;;  %v10135_v62 = vld [vmem:[#allocation100_spill] sm:$0xff]  ;;  %v5298_v38 = vpack.i.bf16 %v1725_v16, %v1546_v51  ;;  %v10143_v16 = vld [vmem:[#allocation77_spill] sm:$0xff] }
 0x495   : >> { %2926 = vmatpush.msra.mxu3 %v2535_v55  ;;  %v1549_v4 = vsel %vm477_vm0, %v10131_v45, %v10130_v57  ;;  %3821 = vmatpush.msra.mxu1 %v2394_v7  ;;  %v9723_v55 = vunpack.i.l.bf16 %v10135_v62  ;;  %v9720_v57 = vunpack.i.l.bf16 %v10136_v22  ;;  %v10137_v45 = vld [vmem:[#allocation10_spill] sm:$0xff]  ;;  %v10139_v7 = vld [vmem:[#allocation85_spill] sm:$0xff] }
 0x496   : >> { %2860 = vmatmul.f32.vlgmr.msrb.gmra.mxu0 %v918_v1  ;;  %v2532_v14 = vsel %vm617_vm8, %v5076_v2, %v10134_v41  ;;  %v5293_v43 = vpack.i.bf16 %v1728_v49, %v1549_v4  ;;  %2866 = vmatmul.f32.vlgmr.msra.gmra.mxu1 %v928_v48  ;;  %v9721_v21 = vunpack.i.l.bf16 %v10137_v45  ;;  %v10140_v1 = vpack.i.bf16 %v10138_v10, %v10139_v7  ;;  %v10142_v2 = vld [vmem:[#allocation70_spill] sm:$0xff]  ;;  %v10144_v48 = vld [vmem:[#allocation79_spill] sm:$0xff] }
 0x497   : >> { %2927 = vmatpush.msra.mxu3 %v2532_v14  ;;  %3008 = vmatpush.msrb.mxu1 %v7468_v33  ;;  %v9724_v47 = vunpack.i.l.bf16 %v10142_v2  ;;  %v10145_v41 = vunpack.i.h.bf16 %v7935_v31  ;;  %v923_v4 = vld [vmem:[%s7653_s24 + $0x30] sm:$0xff] }
 0x498   : >> { %5289 = vrot.lane.b32.xlu1 %v10140_v1, %s5583_s21  ;;  %v8105_v52 = vpop.permute.xlu2 %5129  ;;  %5299 = vrot.lane.b32.xlu0 %v5298_v38, %s5583_s21 }
 0x499   : >> { %10141 = vst [vmem:[#allocation62_spill] sm:$0xff] %v8105_v52  ;;  %5294 = vrot.lane.b32.xlu2 %v5293_v43, %s5583_s21  ;;  %v8112_v33 = vpop.permute.xlu1 %5079  ;;  %v8114_v51 = vpop.permute.xlu0 %5089  ;;  %v2529_v14 = vsel %vm617_vm8, %v5086_v9, %v10145_v41  ;;  %3009 = vmatpush.msrb.mxu1 %v7427_v20  ;;  %v10146_v43 = vunpack.i.h.bf16 %v10056_v60  ;;  %v10147_v20 = vunpack.i.h.bf16 %v10058_v6  ;;  %v10148_v41 = vunpack.i.h.bf16 %v10057_v12 }
 0x49a   : >> { %v9722_v10 = vunpack.i.h.bf16 %v8112_v33  ;;  %v5081_v7 = vunpack.i.l.bf16 %v8112_v33  ;;  %v5091_v38 = vunpack.i.l.bf16 %v8114_v51  ;;  %2928 = vmatpush.msra.mxu3 %v2529_v14  ;;  %v933_v14 = vld [vmem:[%s7653_s24 + $0x80] sm:$0xff] }
 0x49b   : >> { %v1722_v49 = vsel %vm501_vm2, %v10146_v43, %v9723_v55  ;;  %v1716_v9 = vsel %vm501_vm2, %v10147_v20, %v9720_v57  ;;  %v1719_v1 = vsel %vm501_vm2, %v10148_v41, %v9721_v21  ;;  %3010 = vmatpush.msrb.mxu1 %v7430_v40  ;;  %v10149_v43 = vunpack.i.h.bf16 %v6750_v11  ;;  %v10154_v55 = vld [vmem:[#allocation49_spill] sm:$0xff] }
 0x49c   : >> { %v2481_v60 = vsel %vm617_vm8, %v5081_v7, %v9722_v10  ;;  %v10150_v20 = vunpack.i.l.bf16 %v10144_v48  ;;  %v10151_v57 = vunpack.i.h.bf16 %v6758_v5  ;;  %v5101_v40 = vunpack.i.l.bf16 %v7994_v32 }
 0x49d   : >> { %v1540_v6 = vsel %vm477_vm0, %v10149_v43, %v9724_v47  ;;  %2887 = vmatpush.msra.mxu2 %v2481_v60  ;;  %v10152_v21 = vunpack.i.l.bf16 %v10143_v16  ;;  %v10153_v7 = vunpack.i.h.bf16 %v6659_v3  ;;  %3011 = vmatpush.msrb.mxu1 %v10154_v55  ;;  %v10155_v43 = vunpack.i.h.bf16 %v8114_v51  ;;  %v10157_v60 = vld [vmem:[#allocation101_spill] sm:$0xff]  ;;  %v10160_v55 = vld [vmem:[#allocation63_spill] sm:$0xff] }
 0x49e   : >> { %v1543_v12 = vsel %vm477_vm0, %v10151_v57, %v10150_v20  ;;  %2863 = vmatmul.f32.gmra.mxu0 %v923_v4  ;;  %v10156_v57 = vld [vmem:[#allocation94_spill] sm:$0xff]  ;;  %v5308_v41 = vpack.i.bf16 %v1719_v1, %v1540_v6  ;;  %2869 = vmatmul.f32.gmra.mxu1 %v933_v14  ;;  %v9725_v29 = vunpack.i.l.bf16 %v10157_v60  ;;  %v9728_v3 = vunpack.i.l.bf16 %v10158_v63  ;;  %v10161_v4 = vld [vmem:[#allocation72_spill] sm:$0xff]  ;;  %v10166_v14 = vld [vmem:[#allocation47_spill] sm:$0xff] }
 0x49f   : >> { %v1537_v10 = vsel %vm477_vm0, %v10153_v7, %v10152_v21  ;;  %v5303_v11 = vpack.i.bf16 %v1722_v49, %v1543_v12  ;;  %v2478_v5 = vsel %vm617_vm8, %v5091_v38, %v10155_v43  ;;  %v9726_v20 = vunpack.i.l.bf16 %v10156_v57  ;;  %3012 = vmatpush.msrb.mxu1 %v10159_v37  ;;  %v10162_v12 = vld [vmem:[#allocation76_spill] sm:$0xff]  ;;  %v10170_v49 = vld [vmem:[#allocation45_spill] sm:$0xff] }
 0x4a0   : >> { %v5313_v47 = vpack.i.bf16 %v1716_v9, %v1537_v10  ;;  %2888 = vmatpush.msra.mxu2 %v2478_v5  ;;  %v8171_v21 = vpop.permute.xlu2 %5144  ;;  %v4459_v38 = vunpack.i.h.bf16 %v10161_v4  ;;  %v9729_v7 = vunpack.i.l.bf16 %v10162_v12  ;;  %v10165_v37 = vunpack.i.h.bf16 %v7994_v32 }
 0x4a1   : >> { %5304 = vrot.lane.b32.xlu1 %v5303_v11, %s5583_s21  ;;  %5309 = vrot.lane.b32.xlu2 %v5308_v41, %s5583_s21  ;;  %v8178_v10 = vpop.permute.xlu1 %5094  ;;  %v8180_v1 = vpop.permute.xlu0 %5104  ;;  %v10167_v41 = vunpack.i.h.bf16 %v10061_v30 }
 0x4a2   : >> { %5314 = vrot.lane.b32.xlu0 %v5313_v47, %s5583_s21  ;;  %10163 = vst [vmem:[#allocation65_spill] sm:$0xff] %v8178_v10  ;;  %v2475_v9 = vsel %vm617_vm8, %v5101_v40, %v10165_v37  ;;  %3013 = vmatpush.msrb.mxu1 %v10166_v14  ;;  %v9727_v6 = vunpack.i.h.bf16 %v8178_v10  ;;  %v5096_v11 = vunpack.i.l.bf16 %v8178_v10  ;;  %v5106_v47 = vunpack.i.l.bf16 %v8180_v1 }
 0x4a3   : >> { %10164 = vst [vmem:[#allocation66_spill] sm:$0xff] %v8180_v1  ;;  %2889 = vmatpush.msra.mxu2 %v2475_v9  ;;  %v1713_v5 = vsel %vm501_vm2, %v10167_v41, %v9726_v20  ;;  %v10168_v40 = vunpack.i.h.bf16 %v10067_v42  ;;  %v10169_v14 = vunpack.i.h.bf16 %v10068_v18  ;;  %v938_v9 = vld [vmem:[%s7653_s24 + $0xa8] sm:$0xff]  ;;  %v10171_v41 = vunpack.i.h.bf16 %v6744_v35 }
 0x4a4   : >> { %3014 = vmatpush.msrb.mxu1 %v10170_v49  ;;  %v2526_v30 = vsel %vm617_vm8, %v5096_v11, %v9727_v6  ;;  %v10172_v18 = vunpack.i.l.bf16 %v10160_v55  ;;  %v10173_v49 = vunpack.i.h.bf16 %v6708_v0  ;;  %v10174_v20 = vunpack.i.l.bf16 %v10161_v4  ;;  %v10177_v0 = vld [vmem:[#allocation95_spill] sm:$0xff]  ;;  %v10178_v4 = vld [vmem:[#allocation42_spill] sm:$0xff] }
 0x4a5   : >> { %v1707_v37 = vsel %vm501_vm2, %v10168_v40, %v9725_v29  ;;  %v1710_v43 = vsel %vm501_vm2, %v10169_v14, %v9728_v3  ;;  %v1534_v42 = vsel %vm477_vm0, %v10171_v41, %v9729_v7  ;;  %v5116_v29 = vunpack.i.l.bf16 %v8042_v26  ;;  %2929 = vmatpush.msra.mxu3 %v2526_v30  ;;  %v10175_v3 = vld [vmem:[#allocation41_spill] sm:$0xff] }
 0x4a6   : >> { %v1531_v14 = vsel %vm477_vm0, %v10173_v49, %v10172_v18  ;;  %v1465_v11 = vsel %vm465_vm4, %v10174_v20, %v4459_v38  ;;  %v5318_v6 = vpack.i.bf16 %v1713_v5, %v1534_v42  ;;  %3015 = vmatpush.msrb.mxu1 %v10175_v3  ;;  %v10176_v35 = vunpack.i.h.bf16 %v8180_v1  ;;  %v10179_v3 = vld [vmem:[#allocation58_spill] sm:$0xff]  ;;  %v10180_v5 = vld [vmem:[#allocation67_spill] sm:$0xff] }
 0x4a7   : >> { %v4619_v7 = vunpack.i.h.bf16 %v10089_v59  ;;  %v5328_v30 = vpack.i.bf16 %v1465_v11, %v1707_v37  ;;  %v5323_v40 = vpack.i.bf16 %v1710_v43, %v1531_v14  ;;  %2872 = vmatmul.f32.gmra.mxu1 %v938_v9  ;;  %v4599_v36 = vunpack.i.h.bf16 %v10177_v0  ;;  %v10181_v42 = vld [vmem:[#allocation71_spill] sm:$0xff]  ;;  %v10184_v14 = vld [vmem:[#allocation28_spill] sm:$0xff] }
 0x4a8   : >> { %v2523_v41 = vsel %vm617_vm8, %v5106_v47, %v10176_v35  ;;  %v4609_v18 = vunpack.i.h.bf16 %v10077_v15  ;;  %3016 = vmatpush.msrb.mxu1 %v10178_v4  ;;  %v8234_v20 = vpop.permute.xlu2 %5159  ;;  %v4439_v38 = vunpack.i.h.bf16 %v10179_v3  ;;  %v4429_v47 = vunpack.i.h.bf16 %v10180_v5  ;;  %v943_v11 = vld [vmem:[%s7653_s24 + $0xd0] sm:$0xff] }
 0x4a9   : >> { %2930 = vmatpush.msra.mxu3 %v2523_v41  ;;  %5319 = vrot.lane.b32.xlu1 %v5318_v6, %s5583_s21  ;;  %v4449_v49 = vunpack.i.h.bf16 %v10181_v42  ;;  %v8241_v43 = vpop.permute.xlu1 %5109  ;;  %v8243_v37 = vpop.permute.xlu0 %5119  ;;  %v10183_v9 = vunpack.i.h.bf16 %v8042_v26  ;;  %v10186_v1 = vunpack.i.l.bf16 %v10177_v0  ;;  %v5131_v0 = vunpack.i.l.bf16 %v8105_v52 }
 0x4aa   : >> { %5329 = vrot.lane.b32.xlu0 %v5328_v30, %s5583_s21  ;;  %5324 = vrot.lane.b32.xlu2 %v5323_v40, %s5583_s21  ;;  %10182 = vst [vmem:[#allocation86_spill] sm:$0xff] %v8243_v37  ;;  %v5111_v35 = vunpack.i.l.bf16 %v8241_v43  ;;  %v5121_v30 = vunpack.i.l.bf16 %v8243_v37  ;;  %v10185_v40 = vunpack.i.l.bf16 %v10089_v59  ;;  %v10189_v41 = vunpack.i.h.bf16 %v8241_v43 }
 0x4ab   : >> { %v2520_v6 = vsel %vm617_vm8, %v5116_v29, %v10183_v9  ;;  %3017 = vmatpush.msrb.mxu1 %v10184_v14  ;;  %v1635_v26 = vsel %vm489_vm1, %v10186_v1, %v4599_v36  ;;  %v10187_v29 = vunpack.i.l.bf16 %v10077_v15  ;;  %v10188_v14 = vld [vmem:[#allocation35_spill] sm:$0xff]  ;;  %v10191_v15 = vunpack.i.l.bf16 %v10179_v3 }
 0x4ac   : >> { %2931 = vmatpush.msra.mxu3 %v2520_v6  ;;  %v1641_v4 = vsel %vm489_vm1, %v10185_v40, %v4619_v7  ;;  %v2472_v10 = vsel %vm617_vm8, %v5111_v35, %v10189_v41  ;;  %v10190_v6 = vunpack.i.l.bf16 %v10181_v42  ;;  %v9735_v7 = vunpack.i.h.bf16 %v8105_v52  ;;  %v10195_v35 = vld [vmem:[#allocation81_spill] sm:$0xff] }
 0x4ad   : >> { %v1638_v9 = vsel %vm489_vm1, %v10187_v29, %v4609_v18  ;;  %3018 = vmatpush.msrb.mxu1 %v10188_v14  ;;  %2890 = vmatpush.msra.mxu2 %v2472_v10  ;;  %v1459_v36 = vsel %vm465_vm4, %v10191_v15, %v4439_v38  ;;  %v10192_v1 = vunpack.i.l.bf16 %v10180_v5  ;;  %v10193_v29 = vld [vmem:[#allocation36_spill] sm:$0xff]  ;;  %v10194_v42 = vunpack.i.h.bf16 %v8243_v37  ;;  %v10196_v10 = vld [vmem:[#allocation87_spill] sm:$0xff]  ;;  %v10198_v5 = vld [vmem:[#allocation33_spill] sm:$0xff] }
 0x4ae   : >> { %v1462_v59 = vsel %vm465_vm4, %v10190_v6, %v4449_v49  ;;  %v4589_v41 = vunpack.i.h.bf16 %v10195_v35  ;;  %v5338_v6 = vpack.i.bf16 %v1638_v9, %v1459_v36  ;;  %v4569_v3 = vunpack.i.h.bf16 %v10196_v10  ;;  %v10197_v38 = vld [vmem:[#allocation91_spill] sm:$0xff]  ;;  %v10202_v36 = vld [vmem:[#allocation29_spill] sm:$0xff] }
 0x4af   : >> { %v1456_v18 = vsel %vm465_vm4, %v10192_v1, %v4429_v47  ;;  %v5333_v40 = vpack.i.bf16 %v1641_v4, %v1462_v59  ;;  %3019 = vmatpush.msrb.mxu1 %v10193_v29  ;;  %v2469_v49 = vsel %vm617_vm8, %v5121_v30, %v10194_v42  ;;  %v4579_v15 = vunpack.i.h.bf16 %v10197_v38  ;;  %v10199_v4 = vld [vmem:[#allocation51_spill] sm:$0xff]  ;;  %v10200_v1 = vld [vmem:[#allocation60_spill] sm:$0xff] }
 0x4b0   : >> { %v5343_v14 = vpack.i.bf16 %v1635_v26, %v1456_v18  ;;  %2875 = vmatmul.f32.gmra.mxu1 %v943_v11  ;;  %2891 = vmatpush.msra.mxu2 %v2469_v49  ;;  %v8287_v47 = vpop.permute.xlu2 %5174  ;;  %v4409_v59 = vunpack.i.h.bf16 %v10199_v4  ;;  %v4399_v30 = vunpack.i.h.bf16 %v10200_v1  ;;  %v10201_v29 = vld [vmem:[#allocation64_spill] sm:$0xff]  ;;  %v2466_v9 = vsel %vm617_vm8, %v5131_v0, %v9735_v7  ;;  %v10206_v7 = vld [vmem:[#allocation30_spill] sm:$0xff] }
 0x4b1   : >> { %3020 = vmatpush.msrb.mxu1 %v10198_v5  ;;  %5334 = vrot.lane.b32.xlu1 %v5333_v40, %s5583_s21  ;;  %v4419_v42 = vunpack.i.h.bf16 %v10201_v29  ;;  %v8294_v26 = vpop.permute.xlu1 %5124  ;;  %v8296_v11 = vpop.permute.xlu0 %5134  ;;  %v10204_v31 = vunpack.i.l.bf16 %v10196_v10  ;;  %v10205_v0 = vunpack.i.l.bf16 %v10197_v38  ;;  %v948_v18 = vld [vmem:[%s7653_s24 + $0xf8] sm:$0xff]  ;;  %v5146_v10 = vunpack.i.l.bf16 %v8171_v21 }
 0x4b2   : >> { %5344 = vrot.lane.b32.xlu0 %v5343_v14, %s5583_s21  ;;  %5339 = vrot.lane.b32.xlu2 %v5338_v6, %s5583_s21  ;;  %v5126_v40 = vunpack.i.l.bf16 %v8294_v26  ;;  %v5136_v14 = vunpack.i.l.bf16 %v8296_v11  ;;  %v10203_v6 = vunpack.i.l.bf16 %v10195_v35  ;;  %v10207_v49 = vunpack.i.h.bf16 %v8294_v26 }
 0x4b3   : >> { %3021 = vmatpush.msrb.mxu1 %v10202_v36  ;;  %2892 = vmatpush.msra.mxu2 %v2466_v9  ;;  %v1626_v52 = vsel %vm489_vm1, %v10204_v31, %v4569_v3  ;;  %v1629_v36 = vsel %vm489_vm1, %v10205_v0, %v4579_v15  ;;  %v10208_v9 = vunpack.i.l.bf16 %v10201_v29  ;;  %v10209_v31 = vunpack.i.l.bf16 %v10199_v4 }
 0x4b4   : >> { %v1632_v5 = vsel %vm489_vm1, %v10203_v6, %v4589_v41  ;;  %v2517_v37 = vsel %vm617_vm8, %v5126_v40, %v10207_v49  ;;  %v9737_v41 = vunpack.i.h.bf16 %v8171_v21  ;;  %v10211_v6 = vld [vmem:[#allocation26_spill] sm:$0xff]  ;;  %v10212_v29 = vunpack.i.h.bf16 %v8296_v11 }
 0x4b5   : >> { %3022 = vmatpush.msrb.mxu1 %v10206_v7  ;;  %v1453_v35 = vsel %vm465_vm4, %v10208_v9, %v4419_v42  ;;  %2932 = vmatpush.msra.mxu3 %v2517_v37  ;;  %v1450_v3 = vsel %vm465_vm4, %v10209_v31, %v4409_v59  ;;  %v10210_v7 = vunpack.i.l.bf16 %v10200_v1  ;;  %v10213_v40 = vld [vmem:[#allocation78_spill] sm:$0xff]  ;;  %v10215_v59 = vld [vmem:[#allocation83_spill] sm:$0xff] }
 0x4b6   : >> { %v5348_v15 = vpack.i.bf16 %v1632_v5, %v1453_v35  ;;  %v2514_v42 = vsel %vm617_vm8, %v5136_v14, %v10212_v29  ;;  %v4559_v49 = vunpack.i.h.bf16 %v10213_v40  ;;  %v5353_v9 = vpack.i.bf16 %v1629_v36, %v1450_v3  ;;  %v10214_v37 = vld [vmem:[#allocation82_spill] sm:$0xff] }
 0x4b7   : >> { %v1447_v38 = vsel %vm465_vm4, %v10210_v7, %v4399_v30  ;;  %3023 = vmatpush.msrb.mxu1 %v10211_v6  ;;  %2933 = vmatpush.msra.mxu3 %v2514_v42  ;;  %v4539_v4 = vunpack.i.h.bf16 %v10214_v37  ;;  %v4549_v31 = vunpack.i.h.bf16 %v10215_v59  ;;  %v10216_v30 = vld [vmem:[#allocation59_spill] sm:$0xff]  ;;  %v10218_v6 = vunpack.i.l.bf16 %v10214_v37 }
 0x4b8   : >> { %v5358_v0 = vpack.i.bf16 %v1626_v52, %v1447_v38  ;;  %2878 = vmatmul.f32.gmra.mxu1 %v948_v18  ;;  %v8339_v1 = vpop.permute.xlu2 %5189  ;;  %v4389_v5 = vunpack.i.h.bf16 %v10216_v30  ;;  %v2511_v18 = vsel %vm617_vm8, %v5146_v10, %v9737_v41  ;;  %v10217_v38 = vunpack.i.l.bf16 %v10213_v40 }
 0x4b9   : >> { %5349 = vrot.lane.b32.xlu1 %v5348_v15, %s5583_s21  ;;  %v8344_v14 = vpop.permute.xlu1 %5139  ;;  %v8346_v52 = vpop.permute.xlu0 %5149  ;;  %2934 = vmatpush.msra.mxu3 %v2511_v18  ;;  %v1553_v29 = vsel %vm477_vm0, %v10218_v6, %v4539_v4  ;;  %v10219_v42 = vunpack.i.l.bf16 %v10215_v59  ;;  %v10220_v41 = vunpack.i.l.bf16 %v10216_v30  ;;  %v9741_v40 = vunpack.i.h.bf16 %v8234_v20 }
 0x4ba   : >> { %5359 = vrot.lane.b32.xlu0 %v5358_v0, %s5583_s21  ;;  %5354 = vrot.lane.b32.xlu2 %v5353_v9, %s5583_s21  ;;  %v9765_v36 = vunpack.i.h.bf16 %v8344_v14  ;;  %v5141_v35 = vunpack.i.l.bf16 %v8344_v14  ;;  %v9762_v3 = vunpack.i.h.bf16 %v8346_v52  ;;  %v5151_v7 = vunpack.i.l.bf16 %v8346_v52  ;;  %v953_v0 = vld [vmem:[%s7653_s24 + $0x120] sm:$0xff] }
 0x4bb   : >> { %v1623_v15 = vsel %vm489_vm1, %v10217_v38, %v4559_v49  ;;  %v1620_v10 = vsel %vm489_vm1, %v10219_v42, %v4549_v31  ;;  %v1444_v18 = vsel %vm465_vm4, %v10220_v41, %v4389_v5  ;;  %v5161_v49 = vunpack.i.l.bf16 %v8234_v20 }
 0x4bc   : >> { %v2463_v9 = vsel %vm617_vm8, %v5141_v35, %v9765_v36  ;;  %v5363_v37 = vpack.i.bf16 %v1623_v15, %v1444_v18  ;;  %v2460_v4 = vsel %vm617_vm8, %v5151_v7, %v9762_v3  ;;  %v4529_v59 = vunpack.i.h.bf16 %v10124_v50  ;;  %v8759_v3 = vld [vmem:[%s7653_s24 + $0x118] sm:$0xff]  ;;  %v10282_v36 = vld [vmem:[#allocation50_spill] sm:$0xff] }
 0x4bd   : >> { %2893 = vmatpush.msra.mxu2 %v2463_v9  ;;  %v10221_v31 = vunpack.i.l.bf16 %v10028_v53  ;;  %v10222_v35 = vunpack.i.h.bf16 %v10034_v17  ;;  %v4509_v41 = vunpack.i.h.bf16 %v10144_v48  ;;  %v4519_v5 = vunpack.i.h.bf16 %v10118_v24  ;;  %10276 = vst [vmem:[#allocation88_spill] sm:$0xff] %v8759_v3 }
 0x4be   : >> { %v2457_v17 = vsel %vm617_vm8, %v5161_v49, %v9741_v40  ;;  %v10224_v18 = vunpack.i.l.bf16 %v10144_v48  ;;  %v10225_v49 = vunpack.i.l.bf16 %v10118_v24  ;;  %v4499_v24 = vunpack.i.h.bf16 %v10142_v2 }
 0x4bf   : >> { %v5373_v38 = vpack.i.bf16 %v1553_v29, %v10221_v31  ;;  %v5368_v30 = vpack.i.bf16 %v1620_v10, %v10222_v35  ;;  %2894 = vmatpush.msra.mxu2 %v2460_v4  ;;  %v5176_v35 = vunpack.i.l.bf16 %v8287_v47 }
 0x4c0   : >> { %2881 = vmatmul.f32.gmra.mxu1 %v953_v0  ;;  %v8384_v15 = vpop.permute.xlu2 %5204  ;;  %v10223_v0 = vunpack.i.l.bf16 %v10124_v50  ;;  %v1547_v4 = vsel %vm477_vm0, %v10225_v49, %v4519_v5  ;;  %v10226_v50 = vunpack.i.h.bf16 %v10033_v39  ;;  %v4469_v39 = vunpack.i.h.bf16 %v10160_v55 }
 0x4c1   : >> { %5364 = vrot.lane.b32.xlu1 %v5363_v37, %s5583_s21  ;;  %v8388_v7 = vpop.permute.xlu1 %5154  ;;  %v8390_v53 = vpop.permute.xlu0 %5164  ;;  %2895 = vmatpush.msra.mxu2 %v2457_v17  ;;  %v1544_v37 = vsel %vm477_vm0, %v10224_v18, %v4509_v41  ;;  %v10227_v41 = vld [vmem:[#allocation40_spill] sm:$0xff]  ;;  %v5423_v18 = vld [vmem:[%s7653_s24] sm:$0xff]  ;;  %v4699_v49 = vunpack.i.h.bf16 %v10109_v61 }
 0x4c2   : >> { %5374 = vrot.lane.b32.xlu0 %v5373_v38, %s5583_s21  ;;  %5369 = vrot.lane.b32.xlu2 %v5368_v30, %s5583_s21  ;;  %v9739_v6 = vunpack.i.h.bf16 %v8388_v7  ;;  %v5156_v29 = vunpack.i.l.bf16 %v8388_v7  ;;  %v9738_v42 = vunpack.i.h.bf16 %v8390_v53  ;;  %v5166_v10 = vunpack.i.l.bf16 %v8390_v53 }
 0x4c3   : >> { %v1550_v9 = vsel %vm477_vm0, %v10223_v0, %v4529_v59  ;;  %v9740_v38 = vunpack.i.h.bf16 %v8287_v47  ;;  %v4489_v30 = vunpack.i.h.bf16 %v10143_v16  ;;  %v10228_v5 = vunpack.i.h.bf16 %v10227_v41 }
 0x4c4   : >> { %v2508_v31 = vsel %vm617_vm8, %v5156_v29, %v9739_v6  ;;  %v5378_v59 = vpack.i.bf16 %v1550_v9, %v10226_v50  ;;  %v2505_v48 = vsel %vm617_vm8, %v5166_v10, %v9738_v42  ;;  %v10229_v29 = vunpack.i.l.bf16 %v10037_v58 }
 0x4c5   : >> { %2935 = vmatpush.msra.mxu3 %v2508_v31  ;;  %v5388_v17 = vpack.i.bf16 %v1544_v37, %v10228_v5  ;;  %v4689_v9 = vunpack.i.h.bf16 %v10108_v23  ;;  %v4479_v31 = vunpack.i.h.bf16 %v10162_v12  ;;  %v9760_v37 = vunpack.i.h.bf16 %v7865_v34 }
 0x4c6   : >> { %v5383_v0 = vpack.i.bf16 %v1547_v4, %v10229_v29  ;;  %v5056_v58 = vunpack.i.l.bf16 %v7865_v34  ;;  %v10232_v6 = vunpack.i.l.bf16 %v10108_v23  ;;  %v5046_v23 = vunpack.i.l.bf16 %v7942_v28 }
 0x4c7   : >> { %2936 = vmatpush.msra.mxu3 %v2505_v48 }
 0x4c8   : >> { %3024 = vmatmul.f32.vlgmr.msrb.gmra.mxu1 %v5423_v18  ;;  %v8429_v10 = vpop.permute.xlu2 %5219  ;;  %v10231_v18 = vunpack.i.l.bf16 %v10143_v16  ;;  %v10234_v16 = vunpack.i.l.bf16 %v10160_v55 }
 0x4c9   : >> { %5379 = vrot.lane.b32.xlu1 %v5378_v59, %s5583_s21  ;;  %v8436_v4 = vpop.permute.xlu1 %5169  ;;  %v8438_v50 = vpop.permute.xlu0 %5179  ;;  %v2502_v59 = vsel %vm617_vm8, %v5176_v35, %v9740_v38  ;;  %v1726_v35 = vsel %vm501_vm2, %v10232_v6, %v4689_v9  ;;  %v10233_v38 = vunpack.i.l.bf16 %v10109_v61  ;;  %v10235_v61 = vunpack.i.l.bf16 %v10162_v12 }
 0x4ca   : >> { %5389 = vrot.lane.b32.xlu0 %v5388_v17, %s5583_s21  ;;  %5384 = vrot.lane.b32.xlu2 %v5383_v0, %s5583_s21  ;;  %v9761_v48 = vunpack.i.h.bf16 %v8436_v4  ;;  %v5171_v41 = vunpack.i.l.bf16 %v8436_v4  ;;  %v9746_v5 = vunpack.i.h.bf16 %v8438_v50  ;;  %v5181_v29 = vunpack.i.l.bf16 %v8438_v50 }
 0x4cb   : >> { %2937 = vmatpush.msra.mxu3 %v2502_v59  ;;  %v10230_v17 = vunpack.i.l.bf16 %v10142_v2  ;;  %v1538_v42 = vsel %vm477_vm0, %v10231_v18, %v4489_v30  ;;  %v1729_v40 = vsel %vm501_vm2, %v10233_v38, %v4699_v49  ;;  %v1535_v6 = vsel %vm477_vm0, %v10235_v61, %v4479_v31 }
 0x4cc   : >> { %v2454_v59 = vsel %vm617_vm8, %v5171_v41, %v9761_v48  ;;  %v2499_v2 = vsel %vm617_vm8, %v5181_v29, %v9746_v5  ;;  %v4679_v30 = vunpack.i.h.bf16 %v10135_v62  ;;  %v2451_v9 = vsel %vm617_vm8, %v5056_v58, %v9760_v37  ;;  %v5424_v29 = vld [vmem:[%s7653_s24 + $0x28] sm:$0xff]  ;;  %v8755_v48 = vld [vmem:[%s7653_s24 + $0xd8] sm:$0xff] }
 0x4cd   : >> { %v1541_v0 = vsel %vm477_vm0, %v10230_v17, %v4499_v24  ;;  %v1532_v24 = vsel %vm477_vm0, %v10234_v16, %v4469_v39  ;;  %2896 = vmatpush.msra.mxu2 %v2454_v59  ;;  %2938 = vmatpush.msra.mxu3 %v2499_v2  ;;  %v4669_v49 = vunpack.i.h.bf16 %v10137_v45  ;;  %v5398_v41 = vpack.i.bf16 %v1729_v40, %v1535_v6  ;;  %v10255_v5 = vld [vmem:[#allocation119_spill] sm:$0xff] }
 0x4ce   : >> { %v5393_v38 = vpack.i.bf16 %v1538_v42, %v1541_v0  ;;  %v5403_v55 = vpack.i.bf16 %v1726_v35, %v1532_v24  ;;  %v5036_v39 = vunpack.i.l.bf16 %v7940_v44  ;;  %v4639_v12 = vunpack.i.h.bf16 %v10158_v63 }
 0x4cf   : >> { %2897 = vmatpush.msra.mxu2 %v2451_v9  ;;  %v4659_v31 = vunpack.i.h.bf16 %v10136_v22  ;;  %v5026_v17 = vunpack.i.l.bf16 %v7799_v13  ;;  %v10236_v0 = vunpack.i.h.bf16 %v7942_v28  ;;  %v4649_v35 = vunpack.i.h.bf16 %v10156_v57 }
 0x4d0   : >> { %3027 = vmatmul.f32.gmra.mxu1 %v5424_v29  ;;  %v8482_v42 = vpop.permute.xlu2 %5234  ;;  %v4629_v59 = vunpack.i.h.bf16 %v10157_v60  ;;  %v10237_v24 = vunpack.i.l.bf16 %v10135_v62  ;;  %v10238_v6 = vunpack.i.l.bf16 %v10137_v45  ;;  %v10239_v28 = vunpack.i.h.bf16 %v7940_v44  ;;  %v8517_v45 = vld [vmem:[%s7653_s24 + $0x10] sm:$0xff] }
 0x4d1   : >> { %5394 = vrot.lane.b32.xlu1 %v5393_v38, %s5583_s21  ;;  %v8487_v40 = vpop.permute.xlu1 %5184  ;;  %v8489_v58 = vpop.permute.xlu0 %5194  ;;  %v2448_v18 = vsel %vm617_vm8, %v5046_v23, %v10236_v0  ;;  %v10240_v9 = vunpack.i.l.bf16 %v10158_v63  ;;  %v9743_v44 = vunpack.i.h.bf16 %v8339_v1  ;;  %v10242_v63 = vunpack.i.h.bf16 %v7799_v13  ;;  %v8533_v13 = vld [vmem:[%s7653_s24 + $0x50] sm:$0xff] }
 0x4d2   : >> { %5404 = vrot.lane.b32.xlu0 %v5403_v55, %s5583_s21  ;;  %5399 = vrot.lane.b32.xlu2 %v5398_v41, %s5583_s21  ;;  %v9745_v2 = vunpack.i.h.bf16 %v8487_v40  ;;  %v5186_v16 = vunpack.i.l.bf16 %v8487_v40  ;;  %v1723_v61 = vsel %vm501_vm2, %v10237_v24, %v4679_v30  ;;  %v1720_v38 = vsel %vm501_vm2, %v10238_v6, %v4669_v49 }
 0x4d3   : >> { %2898 = vmatpush.msra.mxu2 %v2448_v18  ;;  %v2445_v23 = vsel %vm617_vm8, %v5036_v39, %v10239_v28  ;;  %v1711_v55 = vsel %vm501_vm2, %v10240_v9, %v4639_v12  ;;  %v10241_v41 = vunpack.i.l.bf16 %v10136_v22  ;;  %v5191_v30 = vunpack.i.l.bf16 %v8339_v1  ;;  %v8566_v9 = vld [vmem:[%s7653_s24 + $0x38] sm:$0xff] }
 0x4d4   : >> { %v2496_v62 = vsel %vm617_vm8, %v5186_v16, %v9745_v2  ;;  %v2442_v49 = vsel %vm617_vm8, %v5026_v17, %v10242_v63  ;;  %v10243_v22 = vunpack.i.l.bf16 %v10156_v57  ;;  %v10244_v12 = vunpack.i.l.bf16 %v10157_v60 }
 0x4d5   : >> { %v1717_v29 = vsel %vm501_vm2, %v10241_v41, %v4659_v31  ;;  %2899 = vmatpush.msra.mxu2 %v2445_v23  ;;  %2939 = vmatpush.msra.mxu3 %v2496_v62  ;;  %v5408_v0 = vpack.i.bf16 %v1720_v38, %v1723_v61  ;;  %v9742_v24 = vunpack.i.h.bf16 %v8489_v58  ;;  %v5196_v6 = vunpack.i.l.bf16 %v8489_v58  ;;  %v8554_v61 = vld [vmem:[%s7653_s24 + $0x18] sm:$0xff] }
 0x4d6   : >> { %v1714_v39 = vsel %vm501_vm2, %v10243_v22, %v4649_v35  ;;  %v1708_v31 = vsel %vm501_vm2, %v10244_v12, %v4629_v59  ;;  %v2493_v57 = vsel %vm617_vm8, %v5191_v30, %v9743_v44  ;;  %v9751_v38 = vunpack.i.h.bf16 %v8384_v15  ;;  %v8573_v62 = vld [vmem:[%s7653_s24 + $0x78] sm:$0xff]  ;;  %v10247_v30 = vld [vmem:[#allocation103_spill] sm:$0xff]  ;;  %v10254_v44 = vld [vmem:[#allocation54_spill] sm:$0xff] }
 0x4d7   : >> { %2900 = vmatpush.msra.mxu2 %v2442_v49  ;;  %v5418_v18 = vpack.i.bf16 %v1708_v31, %v1711_v55  ;;  %v5413_v16 = vpack.i.bf16 %v1714_v39, %v1717_v29  ;;  %2940 = vmatpush.msra.mxu3 %v2493_v57  ;;  %v5206_v28 = vunpack.i.l.bf16 %v8384_v15  ;;  %v2490_v23 = vsel %vm617_vm8, %v5196_v6, %v9742_v24  ;;  %v10245_v29 = vld [vmem:[#allocation98_spill] sm:$0xff]  ;;  %v10248_v39 = vld [vmem:[#allocation125_spill] sm:$0xff] }
 0x4d8   : >> { %3030 = vmatmul.f32.gmra.mxu1 %v8533_v13  ;;  %2901 = vmatmul.f32.vlgmr.msra.gmra.mxu2 %v8517_v45  ;;  %10246 = vst [vmem:[#allocation57_spill] sm:$0xff] %v8573_v62  ;;  %v5221_v6 = vunpack.i.l.bf16 %v8429_v10  ;;  %v10249_v57 = vld [vmem:[#allocation126_spill] sm:$0xff]  ;;  %v10275_v37 = vunpack.i.h.bf16 %v8054_v19  ;;  %v10279_v19 = vld [vmem:[#allocation37_spill] sm:$0xff]  ;;  %vm3601_vm0 = vcmask (%p903_p8), 1043456  }
 0x4d9   : >> { %3049 = vmatpush.msrb.mxu2 %v7901_v56  ;;  %5409 = vrot.lane.b32.xlu1 %v5408_v0, %s5583_s21  ;;  %v8544_v60 = vpop.permute.xlu1 %5199  ;;  %v8546_v17 = vpop.permute.xlu0 %5209 }
 0x4da   : >> { %5419 = vrot.lane.b32.xlu0 %v5418_v18, %s5583_s21  ;;  %5414 = vrot.lane.b32.xlu2 %v5413_v16, %s5583_s21  ;;  %v5202_v56 = vunpack.i.h.bf16 %v8544_v60  ;;  %v5201_v35 = vunpack.i.l.bf16 %v8544_v60  ;;  %v9750_v55 = vunpack.i.h.bf16 %v8546_v17  ;;  %v5211_v41 = vunpack.i.l.bf16 %v8546_v17  ;;  %v8594_v18 = vld [vmem:[%s7653_s24 + $0x40] sm:$0xff] }
 0x4db   : >> { %3050 = vmatpush.msrb.mxu2 %v7878_v25  ;;  %v8551_v59 = vpop.permute.xlu2 %5249  ;;  %2941 = vmatpush.msra.mxu3 %v2490_v23  ;;  %v9747_v16 = vunpack.i.h.bf16 %v8429_v10 }
 0x4dc   : >> { %v2559_v25 = vsel %vm617_vm8, %v5201_v35, %v5202_v56  ;;  %2942 = vmatmul.f32.vlgmr.msra.gmra.mxu3 %v8554_v61  ;;  %v2553_v22 = vsel %vm617_vm8, %v5211_v41, %v9750_v55  ;;  %v10250_v41 = vld [vmem:[#allocation53_spill] sm:$0xff] }
 0x4dd   : >> { %3051 = vmatpush.msrb.mxu2 %v7847_v46  ;;  %2975 = vmatpush.msra.mxu0 %v2559_v25  ;;  %v2556_v46 = vsel %vm617_vm8, %v5206_v28, %v9751_v38  ;;  %v8603_v28 = vld [vmem:[%s7653_s24 + $0x60] sm:$0xff] }
 0x4de   : >> { %3822 = vmatpush.msrb.mxu3 %v2559_v25  ;;  %v10260_v38 = vld [vmem:[#allocation117_spill] sm:$0xff] }
 0x4df   : >> { %3052 = vmatpush.msrb.mxu2 %v10245_v29  ;;  %2976 = vmatpush.msra.mxu0 %v2556_v46  ;;  %v8610_v29 = vld [vmem:[%s7653_s24 + $0xa0] sm:$0xff] }
 0x4e0   : >> { %3033 = vmatmul.f32.gmra.mxu1 %v8573_v62  ;;  %2904 = vmatmul.f32.gmra.mxu2 %v8566_v9  ;;  %10251 = vst [vmem:[#allocation56_spill] sm:$0xff] %v8610_v29 }
 0x4e1   : >> { %3053 = vmatpush.msrb.mxu2 %v10247_v30  ;;  %3823 = vmatpush.msrb.mxu3 %v2556_v46  ;;  %v8581_v63 = vpop.permute.xlu1 %5214  ;;  %v8583_v49 = vpop.permute.xlu0 %5224  ;;  %v2547_v46 = vsel %vm617_vm8, %v5221_v6, %v9747_v16  ;;  %v10252_v30 = vld [vmem:[#allocation43_spill] sm:$0xff]  ;;  %v8647_v16 = vld [vmem:[%s7653_s24 + $0x20] sm:$0xff] }
 0x4e2   : >> { %v9749_v12 = vunpack.i.h.bf16 %v8581_v63  ;;  %v5216_v31 = vunpack.i.l.bf16 %v8581_v63  ;;  %2977 = vmatpush.msra.mxu0 %v2553_v22  ;;  %v9744_v23 = vunpack.i.h.bf16 %v8583_v49  ;;  %v5226_v25 = vunpack.i.l.bf16 %v8583_v49  ;;  %v8629_v6 = vld [vmem:[%s7653_s24 + $0x68] sm:$0xff]  ;;  %10256 = vst [vmem:[#allocation18_spill] sm:$0xff] %v8647_v16 }
 0x4e3   : >> { %3054 = vmatpush.msrb.mxu2 %v10248_v39  ;;  %v8591_v0 = vpop.permute.xlu2 %5264  ;;  %3824 = vmatpush.msrb.mxu3 %v2553_v22 }
 0x4e4   : >> { %v2550_v35 = vsel %vm617_vm8, %v5216_v31, %v9749_v12  ;;  %2945 = vmatmul.f32.gmra.mxu3 %v8594_v18  ;;  %v2544_v31 = vsel %vm617_vm8, %v5226_v25, %v9744_v23  ;;  %v9753_v2 = vunpack.i.l.bf16 %v8591_v0 }
 0x4e5   : >> { %3055 = vmatpush.msrb.mxu2 %v10249_v57  ;;  %2978 = vmatpush.msra.mxu0 %v2550_v35  ;;  %v10253_v57 = vld [vmem:[#allocation46_spill] sm:$0xff] }
 0x4e6   : >> { %3825 = vmatpush.msrb.mxu3 %v2550_v35 }
 0x4e7   : >> { %3056 = vmatpush.msrb.mxu2 %v10250_v41  ;;  %2979 = vmatpush.msra.mxu0 %v2547_v46 }
 0x4e8   : >> { %3036 = vmatmul.f32.gmra.mxu1 %v8610_v29  ;;  %2907 = vmatmul.f32.gmra.mxu2 %v8603_v28  ;;  %v10308_v29 = vld [vmem:[#allocation61_spill] sm:$0xff] }
 0x4e9   : >> { %3057 = vmatpush.msrb.mxu2 %v10252_v30  ;;  %3826 = vmatpush.msrb.mxu3 %v2547_v46  ;;  %v8618_v22 = vpop.permute.xlu1 %5229  ;;  %v8620_v39 = vpop.permute.xlu0 %5239  ;;  %v9752_v46 = vunpack.i.h.bf16 %v8482_v42  ;;  %v5236_v30 = vunpack.i.l.bf16 %v8482_v42  ;;  %v10309_v62 = vunpack.i.h.bf16 %v10308_v29  ;;  %v10314_v29 = vunpack.i.h.bf16 %v8384_v15 }
 0x4ea   : >> { %v9748_v35 = vunpack.i.h.bf16 %v8618_v22  ;;  %v5231_v41 = vunpack.i.l.bf16 %v8618_v22  ;;  %2980 = vmatpush.msra.mxu0 %v2544_v31  ;;  %v9754_v23 = vunpack.i.l.bf16 %v8620_v39 }
 0x4eb   : >> { %3058 = vmatpush.msrb.mxu2 %v10253_v57  ;;  %v8633_v24 = vpop.permute.xlu2 %5279  ;;  %3827 = vmatpush.msrb.mxu3 %v2544_v31  ;;  %v8640_v57 = vld [vmem:[%s7653_s24 + $0x88] sm:$0xff] }
 0x4ec   : >> { %v2541_v25 = vsel %vm617_vm8, %v5231_v41, %v9748_v35  ;;  %2948 = vmatmul.f32.gmra.mxu3 %v8629_v6  ;;  %v8651_v31 = vld [vmem:[%s7653_s24 + $0xc8] sm:$0xff]  ;;  %v2538_v41 = vsel %vm617_vm8, %v5236_v30, %v9752_v46  ;;  %v10258_v35 = vld [vmem:[#allocation120_spill] sm:$0xff]  ;;  %v10262_v46 = vunpack.i.h.bf16 %v7889_v27  ;;  %v9759_v27 = vunpack.i.l.bf16 %v8551_v59 }
 0x4ed   : >> { %3059 = vmatpush.msrb.mxu2 %v10254_v44  ;;  %2981 = vmatpush.msra.mxu0 %v2541_v25  ;;  %v9758_v44 = vunpack.i.h.bf16 %v8620_v39  ;;  %10257 = vst [vmem:[#allocation20_spill] sm:$0xff] %v8651_v31 }
 0x4ee   : >> { %3828 = vmatpush.msrb.mxu3 %v2541_v25 }
 0x4ef   : >> { %3060 = vmatpush.msrb.mxu2 %v10255_v5  ;;  %2982 = vmatpush.msra.mxu0 %v2538_v41  ;;  %v10259_v5 = vunpack.i.h.bf16 %v7999_v8  ;;  %v8678_v8 = vld [vmem:[%s7653_s24 + $0x90] sm:$0xff] }
 0x4f0   : >> { %3039 = vmatmul.f32.gmra.mxu1 %v8651_v31  ;;  %2910 = vmatmul.f32.gmra.mxu2 %v8640_v57  ;;  %v8862_v31 = vpop.f32.mrf.mxu0 }
 0x4f1   : >> { %3061 = vmatpush.msrb.mxu2 %v10258_v35  ;;  %3829 = vmatpush.msrb.mxu3 %v2538_v41  ;;  %v2488_v25 = vsel %vm617_vm8, %v10259_v5, %v9754_v23  ;;  %v8666_v12 = vpop.permute.xlu1 %5244  ;;  %v8668_v55 = vpop.permute.xlu0 %5254  ;;  %v10261_v35 = vunpack.i.h.bf16 %v8052_v54  ;;  %v8697_v23 = vld [vmem:[%s7653_s24 + $0xb0] sm:$0xff] }
 0x4f2   : >> { %3746 = vmatmul.msk.f32.vlgmr.msra.gmra.mxu0 %vm2778_vm14, %v8647_v16  ;;  %v9757_v41 = vunpack.i.l.bf16 %v8666_v12 }
 0x4f3   : >> { %3062 = vmatpush.msrb.mxu2 %v10260_v38  ;;  %3090 = vmatpush.msra.mxu3 %v2488_v25  ;;  %v2536_v30 = vsel %vm617_vm8, %v10261_v35, %v9753_v2  ;;  %v8680_v5 = vpop.permute.xlu2 %5294  ;;  %v2485_v38 = vsel %vm617_vm8, %v10262_v46, %v9758_v44  ;;  %v9756_v25 = vunpack.i.h.bf16 %v8666_v12  ;;  %v10263_v35 = vld [vmem:[#allocation113_spill] sm:$0xff]  ;;  %v10265_v46 = vld [vmem:[#allocation114_spill] sm:$0xff]  ;;  %v9767_v44 = vunpack.i.h.bf16 %v8668_v55 }
 0x4f4   : >> { %3131 = vmatpush.msrb.mxu0 %v2536_v30  ;;  %v9755_v54 = vunpack.i.h.bf16 %v8680_v5  ;;  %v10264_v30 = vunpack.i.h.bf16 %v8112_v33  ;;  %2951 = vmatmul.f32.gmra.mxu3 %v8678_v8  ;;  %v10267_v33 = vld [vmem:[#allocation31_spill] sm:$0xff] }
 0x4f5   : >> { %3063 = vmatpush.msrb.mxu2 %v10263_v35  ;;  %3091 = vmatpush.msra.mxu3 %v2485_v38  ;;  %v8707_v35 = vld [vmem:[%s7653_s24 + $0xf0] sm:$0xff] }
 0x4f6   : >> { %v2482_v2 = vsel %vm617_vm8, %v10264_v30, %v9757_v41  ;;  %v2560_v38 = vsel %vm617_vm8, %v5202_v56, %v9755_v54  ;;  %10266 = vst [vmem:[#allocation96_spill] sm:$0xff] %v8707_v35  ;;  %v8712_v30 = vld [vmem:[%s7653_s24 + $0x48] sm:$0xff] }
 0x4f7   : >> { %3064 = vmatpush.msrb.mxu2 %v10265_v46  ;;  %3092 = vmatpush.msra.mxu3 %v2482_v2  ;;  %10268 = vst [vmem:[#allocation97_spill] sm:$0xff] %v8712_v30  ;;  %v10269_v2 = vunpack.i.h.bf16 %v8114_v51  ;;  %v9763_v46 = vunpack.i.h.bf16 %v8551_v59  ;;  %v10270_v56 = vld [vmem:[#allocation110_spill] sm:$0xff]  ;;  %v10272_v41 = vld [vmem:[#allocation111_spill] sm:$0xff] }
 0x4f8   : >> { %3042 = vmatmul.f32.gmra.mxu1 %v8707_v35  ;;  %2913 = vmatmul.f32.gmra.mxu2 %v8697_v23  ;;  %v10287_v35 = vld [vmem:[#allocation34_spill] sm:$0xff] }
 0x4f9   : >> { %3213 = vmatpush.msra.mxu2 %v10267_v33  ;;  %3180 = vmatpush.msra.mxu1 %v2560_v38  ;;  %v2479_v60 = vsel %vm617_vm8, %v10269_v2, %v9756_v25  ;;  %v8722_v54 = vpop.permute.xlu1 %5259  ;;  %v8726_v38 = vpop.permute.xlu0 %5269  ;;  %v10271_v33 = vunpack.i.h.bf16 %v7994_v32  ;;  %v8734_v2 = vld [vmem:[%s7653_s24 + $0xb8] sm:$0xff]  ;;  %v10273_v32 = vunpack.i.h.bf16 %v8241_v43  ;;  %v10277_v43 = vld [vmem:[#allocation86_spill] sm:$0xff] }
 0x4fa   : >> { %3093 = vmatpush.msra.mxu3 %v2479_v60  ;;  %3747 = vmatmul.msk.f32.gmra.mxu0 %vm2778_vm14, %v8712_v30  ;;  %v9766_v60 = vunpack.i.l.bf16 %v8668_v55 }
 0x4fb   : >> { %3214 = vmatpush.msra.mxu2 %v10270_v56  ;;  %v2476_v51 = vsel %vm617_vm8, %v10271_v33, %v9759_v27  ;;  %v9764_v56 = vunpack.i.l.bf16 %v8726_v38  ;;  %v8738_v25 = vpop.permute.xlu2 %5309  ;;  %v2473_v33 = vsel %vm617_vm8, %v10273_v32, %v9763_v46  ;;  %v10274_v27 = vld [vmem:[#allocation38_spill] sm:$0xff] }
 0x4fc   : >> { %3094 = vmatpush.msra.mxu3 %v2476_v51 }
 0x4fd   : >> { %3215 = vmatpush.msra.mxu2 %v10272_v41  ;;  %2954 = vmatmul.f32.gmra.mxu3 %v8734_v2  ;;  %v2533_v51 = vsel %vm617_vm8, %v10275_v37, %v9764_v56  ;;  %v9770_v41 = vunpack.i.l.bf16 %v8722_v54  ;;  %v8769_v37 = vld [vmem:[%s7653_s24 + $0x70] sm:$0xff] }
 0x4fe   : >> { %3095 = vmatpush.msra.mxu3 %v2473_v33  ;;  %3132 = vmatpush.msrb.mxu0 %v2533_v51  ;;  %v10280_v51 = vld [vmem:[#allocation62_spill] sm:$0xff] }
 0x4ff   : >> { %3216 = vmatpush.msra.mxu2 %v10274_v27  ;;  %v10278_v27 = vunpack.i.h.bf16 %v10277_v43  ;;  %v10281_v46 = vunpack.i.h.bf16 %v10280_v51 }
 0x500   : >> { %3045 = vmatmul.f32.gmra.mxu1 %v8759_v3  ;;  %2916 = vmatmul.f32.gmra.mxu2 %v8755_v48 }
 0x501   : >> { %v2470_v32 = vsel %vm617_vm8, %v10278_v27, %v9766_v60  ;;  %3217 = vmatpush.msra.mxu2 %v10279_v19  ;;  %v2467_v56 = vsel %vm617_vm8, %v10281_v46, %v9767_v44  ;;  %v8781_v43 = vpop.permute.xlu1 %5274  ;;  %v10285_v19 = vunpack.i.h.bf16 %v8722_v54  ;;  %v10286_v60 = vunpack.i.h.bf16 %v8346_v52  ;;  %v8813_v44 = vld [vmem:[%s7653_s24 + $0x100] sm:$0xff] }
 0x502   : >> { %3096 = vmatpush.msra.mxu3 %v2470_v32  ;;  %3748 = vmatmul.msk.f32.gmra.mxu0 %vm2778_vm14, %v8769_v37  ;;  %v8783_v27 = vpop.permute.xlu0 %5284  ;;  %v8786_v32 = vld [vmem:[%s7653_s24 + $0xe0] sm:$0xff]  ;;  %10291 = vst [vmem:[#allocation89_spill] sm:$0xff] %v8813_v44  ;;  %v10292_v52 = vunpack.i.h.bf16 %v8591_v0 }
 0x503   : >> { %3218 = vmatpush.msra.mxu2 %v10282_v36  ;;  %v10283_v36 = vunpack.i.h.bf16 %v8344_v14  ;;  %v2461_v3 = vsel %vm617_vm8, %v10286_v60, %v10285_v19  ;;  %v10288_v14 = vunpack.i.l.bf16 %v8781_v43  ;;  %v10293_v60 = vunpack.i.h.bf16 %v8234_v20  ;;  %v10294_v19 = vld [vmem:[#allocation44_spill] sm:$0xff] }
 0x504   : >> { %3097 = vmatpush.msra.mxu3 %v2467_v56  ;;  %v8790_v51 = vpop.permute.xlu2 %5324  ;;  %v10284_v56 = vld [vmem:[#allocation19_spill] sm:$0xff]  ;;  %v10298_v20 = vunpack.i.h.bf16 %v8726_v38 }
 0x505   : >> { %v2464_v46 = vsel %vm617_vm8, %v10283_v36, %v9770_v41  ;;  %3219 = vmatpush.msra.mxu2 %v10284_v56  ;;  %2957 = vmatmul.f32.gmra.mxu3 %v8786_v32  ;;  %v10289_v36 = vld [vmem:[#allocation74_spill] sm:$0xff] }
 0x506   : >> { %3098 = vmatpush.msra.mxu3 %v2464_v46  ;;  %v10290_v41 = vunpack.i.h.bf16 %v10289_v36  ;;  %v8824_v36 = vld [vmem:[%s7653_s24 + $0x98] sm:$0xff]  ;;  %v10299_v46 = vunpack.i.h.bf16 %v8436_v4  ;;  %v8850_v4 = vld [vmem:[%s7653_s24 + $0x108] sm:$0xff] }
 0x507   : >> { %3220 = vmatpush.msra.mxu2 %v10287_v35  ;;  %v2458_v35 = vsel %vm617_vm8, %v10293_v60, %v10292_v52  ;;  %v10300_v60 = vld [vmem:[#allocation13_spill] sm:$0xff] }
 0x508   : >> { %v2530_v56 = vsel %vm617_vm8, %v10290_v41, %v10288_v14  ;;  %3099 = vmatpush.msra.mxu3 %v2461_v3  ;;  %2919 = vmatmul.f32.gmra.mxu2 %v8813_v44  ;;  %v10295_v3 = vunpack.i.l.bf16 %v8633_v24  ;;  %v10296_v14 = vld [vmem:[#allocation65_spill] sm:$0xff]  ;;  %v2455_v52 = vsel %vm617_vm8, %v10299_v46, %v10298_v20  ;;  %v10304_v20 = vunpack.i.h.bf16 %v8781_v43 }
 0x509   : >> { %3133 = vmatpush.msrb.mxu0 %v2530_v56  ;;  %3221 = vmatpush.msra.mxu2 %v10294_v19  ;;  %v10297_v56 = vunpack.i.h.bf16 %v10296_v14  ;;  %v10301_v14 = vunpack.i.h.bf16 %v8633_v24  ;;  %v10306_v19 = vld [vmem:[#allocation39_spill] sm:$0xff] }
 0x50a   : >> { %3100 = vmatpush.msra.mxu3 %v2458_v35  ;;  %3749 = vmatmul.msk.f32.gmra.mxu0 %vm2778_vm14, %v8824_v36  ;;  %v8842_v35 = vpop.permute.xlu1 %5289  ;;  %v8852_v46 = vpop.permute.xlu0 %5299 }
 0x50b   : >> { %v2527_v33 = vsel %vm617_vm8, %v10297_v56, %v10295_v3  ;;  %3222 = vmatpush.msra.mxu2 %v10300_v60  ;;  %v10302_v3 = vld [vmem:[#allocation66_spill] sm:$0xff]  ;;  %v9786_v15 = vunpack.i.l.bf16 %v8852_v46 }
 0x50c   : >> { %3134 = vmatpush.msrb.mxu0 %v2527_v33  ;;  %3101 = vmatpush.msra.mxu3 %v2455_v52  ;;  %v10303_v56 = vunpack.i.h.bf16 %v10302_v3  ;;  %v8854_v33 = vpop.permute.xlu2 %5339  ;;  %v10305_v52 = vunpack.i.h.bf16 %v7865_v34  ;;  %v9776_v3 = vunpack.i.h.bf16 %v8852_v46  ;;  %v9777_v34 = vunpack.i.h.bf16 %v8842_v35 }
 0x50d   : >> { %3223 = vmatpush.msra.mxu2 %v10306_v19  ;;  %2960 = vmatmul.f32.gmra.mxu3 %v8850_v4  ;;  %v10311_v19 = vld [vmem:[#allocation25_spill] sm:$0xff] }
 0x50e   : >> { %v2524_v41 = vsel %vm617_vm8, %v10303_v56, %v10301_v14  ;;  %v2452_v60 = vsel %vm617_vm8, %v10305_v52, %v10304_v20  ;;  %v9778_v14 = vunpack.i.l.bf16 %v8842_v35  ;;  %v10307_v56 = vunpack.i.l.bf16 %v8783_v27 }
 0x50f   : >> { %3135 = vmatpush.msrb.mxu0 %v2524_v41  ;;  %3102 = vmatpush.msra.mxu3 %v2452_v60  ;;  %v10310_v41 = vld [vmem:[#allocation68_spill] sm:$0xff]  ;;  %v10312_v20 = vunpack.i.h.bf16 %v8783_v27  ;;  %v10313_v52 = vunpack.i.h.bf16 %v8294_v26  ;;  %v10317_v26 = vunpack.i.h.bf16 %v8296_v11 }
 0x510   : >> { %v2521_v44 = vsel %vm617_vm8, %v10309_v62, %v10307_v56  ;;  %3224 = vmatpush.msra.mxu2 %v10311_v19  ;;  %v2557_v62 = vsel %vm617_vm8, %v10314_v29, %v9776_v3  ;;  %v9780_v56 = vunpack.i.l.bf16 %v8680_v5  ;;  %v10316_v19 = vld [vmem:[#allocation16_spill] sm:$0xff] }
 0x511   : >> { %3136 = vmatpush.msrb.mxu0 %v2521_v44  ;;  %3103 = vmatpush.msra.mxu3 %v10310_v41  ;;  %v2518_v60 = vsel %vm617_vm8, %v10313_v52, %v10312_v20  ;;  %v8886_v44 = vld [vmem:[%s7653_s24 + $0x128] sm:$0xff]  ;;  %v2515_v20 = vsel %vm617_vm8, %v10317_v26, %v9778_v14  ;;  %v8908_v11 = vld [vmem:[%s7653_s24 + $0x130] sm:$0xff] }
 0x512   : >> { %3181 = vmatpush.msra.mxu1 %v2557_v62  ;;  %v10315_v41 = vld [vmem:[#allocation99_spill] sm:$0xff]  ;;  %3225 = vmatpush.msra.mxu2 %v10316_v19  ;;  %v10318_v52 = vld [vmem:[#allocation90_spill] sm:$0xff]  ;;  %v10320_v62 = vunpack.i.h.bf16 %v8171_v21  ;;  %v10322_v21 = vunpack.i.h.bf16 %v8388_v7  ;;  %v10324_v19 = vld [vmem:[#allocation21_spill] sm:$0xff]  ;;  %v10325_v7 = vunpack.i.h.bf16 %v8390_v53 }
 0x513   : >> { %3137 = vmatpush.msrb.mxu0 %v2518_v60  ;;  %3104 = vmatpush.msra.mxu3 %v10315_v41  ;;  %v10319_v60 = vld [vmem:[#allocation22_spill] sm:$0xff]  ;;  %v8900_v29 = vpop.permute.xlu1 %5304 }
 0x514   : >> { %2922 = vmatmul.f32.gmra.mxu2 %v8886_v44  ;;  %v2512_v41 = vsel %vm617_vm8, %v10320_v62, %v9777_v34  ;;  %v9779_v26 = vunpack.i.h.bf16 %v8900_v29  ;;  %v8914_v3 = vpop.permute.xlu2 %5354  ;;  %v2509_v62 = vsel %vm617_vm8, %v10322_v21, %v9780_v56  ;;  %v2506_v21 = vsel %vm617_vm8, %v10325_v7, %v9786_v15  ;;  %v8951_v53 = vld [vmem:[%s7653_s24 + $0x8] sm:$0xff] }
 0x515   : >> { %3138 = vmatpush.msrb.mxu0 %v2515_v20  ;;  %3105 = vmatpush.msra.mxu3 %v10318_v52  ;;  %v8912_v20 = vpop.permute.xlu0 %5314  ;;  %v8930_v52 = vpop.f32.mrf.mxu0  ;;  %v10328_v56 = vunpack.i.l.bf16 %v8900_v29 }
 0x516   : >> { %3226 = vmatpush.msra.mxu2 %v10319_v60  ;;  %v10321_v60 = vld [vmem:[#allocation32_spill] sm:$0xff]  ;;  %v9781_v34 = vunpack.i.h.bf16 %v8912_v20  ;;  %2963 = vmatmul.f32.gmra.mxu3 %v8908_v11 }
 0x517   : >> { %3139 = vmatpush.msrb.mxu0 %v2512_v41  ;;  %v10323_v41 = vunpack.i.h.bf16 %v8546_v17  ;;  %v10327_v17 = vunpack.i.h.bf16 %v8581_v63  ;;  %v10330_v63 = vunpack.i.h.bf16 %v8429_v10 }
 0x518   : >> { %3227 = vmatpush.msra.mxu2 %v10321_v60 }
 0x519   : >> { %3140 = vmatpush.msrb.mxu0 %v2509_v62  ;;  %v2554_v14 = vsel %vm617_vm8, %v10323_v41, %v9779_v26  ;;  %v10326_v62 = vunpack.i.h.bf16 %v8738_v25  ;;  %v9782_v26 = vunpack.i.l.bf16 %v8912_v20 }
 0x51a   : >> { %3228 = vmatpush.msra.mxu2 %v10324_v19  ;;  %3182 = vmatpush.msra.mxu1 %v2554_v14  ;;  %v10329_v19 = vunpack.i.h.bf16 %v8287_v47  ;;  %v2548_v14 = vsel %vm617_vm8, %v10330_v63, %v9781_v34  ;;  %v10332_v47 = vunpack.i.h.bf16 %v8438_v50  ;;  %v10333_v50 = vunpack.i.h.bf16 %v8487_v40  ;;  %v10335_v34 = vld [vmem:[#allocation73_spill] sm:$0xff] }
 0x51b   : >> { %3141 = vmatpush.msrb.mxu0 %v2506_v21  ;;  %v2551_v41 = vsel %vm617_vm8, %v10327_v17, %v10326_v62  ;;  %v8959_v7 = vpop.permute.xlu1 %5319  ;;  %v10331_v21 = vunpack.i.l.bf16 %v8738_v25  ;;  %v8967_v62 = vld [vmem:[%s7653_s24 + $0xc0] sm:$0xff]  ;;  %v10336_v40 = vunpack.i.h.bf16 %v8583_v49  ;;  %v10340_v49 = vunpack.i.h.bf16 %v8618_v22 }
 0x51c   : >> { %v2503_v60 = vsel %vm617_vm8, %v10329_v19, %v10328_v56  ;;  %3183 = vmatpush.msra.mxu1 %v2551_v41  ;;  %3065 = vmatmul.f32.vlgmr.msrb.gmra.mxu2 %v8951_v53  ;;  %v9784_v17 = vunpack.i.h.bf16 %v8959_v7  ;;  %v8973_v10 = vpop.permute.xlu2 %5369  ;;  %v9785_v19 = vunpack.i.l.bf16 %v8790_v51  ;;  %v2497_v63 = vsel %vm617_vm8, %v10333_v50, %v9782_v26 }
 0x51d   : >> { %3142 = vmatpush.msrb.mxu0 %v2503_v60  ;;  %v2500_v56 = vsel %vm617_vm8, %v10332_v47, %v10331_v21  ;;  %v9783_v60 = vunpack.i.l.bf16 %v8959_v7  ;;  %v8971_v41 = vpop.permute.xlu0 %5329  ;;  %v10334_v21 = vunpack.i.h.bf16 %v8339_v1  ;;  %v10337_v1 = vld [vmem:[#allocation124_spill] sm:$0xff] }
 0x51e   : >> { %3184 = vmatpush.msra.mxu1 %v2548_v14  ;;  %v9787_v14 = vunpack.i.h.bf16 %v8790_v51  ;;  %3750 = vmatmul.msk.f32.vlgmr.msrb.gmra.mxu3 %vm2778_vm14, %v8967_v62  ;;  %v2545_v50 = vsel %vm617_vm8, %v10336_v40, %v9784_v17  ;;  %v10341_v40 = vld [vmem:[#allocation108_spill] sm:$0xff]  ;;  %v5341_v17 = vunpack.i.l.bf16 %v8854_v33  ;;  %v10343_v22 = vunpack.i.l.bf16 %v8971_v41 }
 0x51f   : >> { %3143 = vmatpush.msrb.mxu0 %v2500_v56  ;;  %v2494_v47 = vsel %vm617_vm8, %v10334_v21, %v9783_v60  ;;  %v5332_v56 = vunpack.i.h.bf16 %v8971_v41  ;;  %3254 = vmatpush.msrb.mxu3 %v10335_v34  ;;  %v10338_v21 = vunpack.i.h.bf16 %v8489_v58  ;;  %v9006_v60 = vld [vmem:[%s7653_s24 + $0x30] sm:$0xff] }
 0x520   : >> { %3185 = vmatpush.msra.mxu1 %v2545_v50  ;;  %10339 = vst [vmem:[#allocation80_spill] sm:$0xff] %v9006_v60  ;;  %v10342_v50 = vunpack.i.l.bf16 %v8620_v39 }
 0x521   : >> { %3144 = vmatpush.msrb.mxu0 %v2497_v63  ;;  %v8997_v63 = vpop.f32.mrf.mxu0  ;;  %3255 = vmatpush.msrb.mxu3 %v10337_v1  ;;  %v2491_v34 = vsel %vm617_vm8, %v10338_v21, %v9785_v19  ;;  %v9019_v21 = vld [vmem:[%s7653_s24 + $0xe8] sm:$0xff] }
 0x522   : >> { %v2489_v58 = vsel %vm617_vm8, %v10342_v50, %v5332_v56  ;;  %v9030_v56 = vpop.f32.mrf.mxu1  ;;  %v10345_v50 = vld [vmem:[#allocation104_spill] sm:$0xff] }
 0x523   : >> { %3145 = vmatpush.msrb.mxu0 %v2494_v47  ;;  %v2542_v47 = vsel %vm617_vm8, %v10340_v49, %v9787_v14  ;;  %3256 = vmatpush.msrb.mxu3 %v10341_v40  ;;  %v5335_v1 = vpop.permute.xlu1 %5334  ;;  %v10344_v49 = vunpack.i.h.bf16 %v8482_v42  ;;  %v5342_v40 = vunpack.i.h.bf16 %v8854_v33  ;;  %v10347_v42 = vunpack.i.l.bf16 %v8591_v0 }
 0x524   : >> { %3068 = vmatmul.f32.gmra.mxu2 %v9006_v60  ;;  %3186 = vmatpush.msra.mxu1 %v2542_v47  ;;  %v5336_v19 = vunpack.i.l.bf16 %v5335_v1  ;;  %v9022_v26 = vpop.permute.xlu2 %5384  ;;  %v10350_v60 = vld [vmem:[#allocation127_spill] sm:$0xff] }
 0x525   : >> { %3146 = vmatpush.msrb.mxu0 %v2491_v34  ;;  %v5337_v34 = vunpack.i.h.bf16 %v5335_v1  ;;  %v5345_v15 = vpop.permute.xlu0 %5344  ;;  %v2539_v47 = vsel %vm617_vm8, %v10344_v49, %v10343_v22  ;;  %3257 = vmatpush.msrb.mxu3 %v10345_v50  ;;  %v10346_v1 = vunpack.i.h.bf16 %v8620_v39  ;;  %v10348_v49 = vld [vmem:[#allocation55_spill] sm:$0xff]  ;;  %v10351_v39 = vunpack.i.l.bf16 %v8726_v38 }
 0x526   : >> { %3187 = vmatpush.msra.mxu1 %v2539_v47  ;;  %3751 = vmatmul.msk.f32.gmra.mxu3 %vm2778_vm14, %v9019_v21  ;;  %v5347_v33 = vunpack.i.h.bf16 %v5345_v15  ;;  %v10349_v47 = vunpack.i.l.bf16 %v8666_v12 }
 0x527   : >> { %3295 = vmatpush.msra.mxu0 %v2489_v58  ;;  %v5346_v58 = vunpack.i.l.bf16 %v5345_v15  ;;  %v2486_v14 = vsel %vm617_vm8, %v10346_v1, %v5336_v19  ;;  %v2537_v22 = vsel %vm617_vm8, %v10347_v42, %v5337_v34  ;;  %3258 = vmatpush.msrb.mxu3 %v10348_v49  ;;  %v2534_v19 = vsel %vm617_vm8, %v10351_v39, %v5342_v40  ;;  %v9051_v34 = vld [vmem:[%s7653_s24 + $0x58] sm:$0xff]  ;;  %v9064_v40 = vld [vmem:[%s7653_s24 + $0x110] sm:$0xff] }
 0x528   : >> { %3147 = vmatmul.f32.vlgmr.msrb.gmra.mxu0 %v8554_v61  ;;  %3336 = vmatpush.msrb.mxu1 %v2537_v22  ;;  %v2483_v50 = vsel %vm617_vm8, %v10349_v47, %v5341_v17  ;;  %10352 = vst [vmem:[#allocation93_spill] sm:$0xff] %v9051_v34  ;;  %v10353_v15 = vunpack.i.h.bf16 %v8666_v12  ;;  %v10354_v42 = vld [vmem:[#allocation128_spill] sm:$0xff]  ;;  %v5356_v49 = vunpack.i.l.bf16 %v8914_v3 }
 0x529   : >> { %3296 = vmatpush.msra.mxu0 %v2486_v14  ;;  %3259 = vmatpush.msrb.mxu3 %v10350_v60  ;;  %v9057_v1 = vpop.f32.mrf.mxu0  ;;  %v10355_v60 = vunpack.i.l.bf16 %v8781_v43 }
 0x52a   : >> { %3337 = vmatpush.msrb.mxu1 %v2534_v19  ;;  %v2480_v14 = vsel %vm617_vm8, %v10353_v15, %v5346_v58  ;;  %v5357_v58 = vunpack.i.h.bf16 %v8914_v3  ;;  %v10356_v19 = vld [vmem:[#allocation118_spill] sm:$0xff] }
 0x52b   : >> { %3297 = vmatpush.msra.mxu0 %v2483_v50  ;;  %3260 = vmatpush.msrb.mxu3 %v10354_v42  ;;  %v5350_v17 = vpop.permute.xlu1 %5349  ;;  %v2531_v22 = vsel %vm617_vm8, %v10355_v60, %v5347_v33  ;;  %v9083_v60 = vpop.f32.mrf.mxu1 }
 0x52c   : >> { %3071 = vmatmul.f32.gmra.mxu2 %v9051_v34  ;;  %v5352_v47 = vunpack.i.h.bf16 %v5350_v17  ;;  %v5351_v50 = vunpack.i.l.bf16 %v5350_v17  ;;  %v9067_v12 = vpop.permute.xlu2 %5399  ;;  %3338 = vmatpush.msrb.mxu1 %v2531_v22  ;;  %v10358_v17 = vunpack.i.l.bf16 %v8633_v24 }
 0x52d   : >> { %3298 = vmatpush.msra.mxu0 %v2480_v14  ;;  %v5360_v39 = vpop.permute.xlu0 %5359  ;;  %3261 = vmatpush.msrb.mxu3 %v10356_v19  ;;  %v5402_v15 = vunpack.i.h.bf16 %v9067_v12  ;;  %v10357_v14 = vunpack.i.l.bf16 %v8551_v59  ;;  %v10359_v19 = vld [vmem:[#allocation52_spill] sm:$0xff] }
 0x52e   : >> { %3754 = vmatmul.msk.f32.vlgmr.msra.gmra.mxu1 %vm2778_vm14, %v8647_v16  ;;  %v5361_v33 = vunpack.i.l.bf16 %v5360_v39  ;;  %3752 = vmatmul.msk.f32.gmra.mxu3 %vm2778_vm14, %v9064_v40  ;;  %v2528_v3 = vsel %vm617_vm8, %v10358_v17, %v5352_v47  ;;  %v5362_v22 = vunpack.i.h.bf16 %v5360_v39  ;;  %v10360_v16 = vunpack.i.h.bf16 %v8680_v5  ;;  %v10362_v47 = vld [vmem:[#allocation123_spill] sm:$0xff] }
 0x52f   : >> { %v2477_v42 = vsel %vm617_vm8, %v10357_v14, %v5351_v50  ;;  %3262 = vmatpush.msrb.mxu3 %v10359_v19  ;;  %3339 = vmatpush.msrb.mxu1 %v2528_v3  ;;  %v10361_v50 = vunpack.i.h.bf16 %v8551_v59  ;;  %v10363_v17 = vunpack.i.h.bf16 %v8633_v24  ;;  %v9097_v19 = vld [vmem:[%s7653_s24 + $0x80] sm:$0xff]  ;;  %v9108_v24 = vld [vmem:[%s7653_s24 + $0x138] sm:$0xff] }
 0x530   : >> { %3150 = vmatmul.f32.gmra.mxu0 %v8594_v18  ;;  %v2561_v34 = vsel %vm617_vm8, %v10360_v16, %v5402_v15  ;;  %v10364_v16 = vunpack.i.l.bf16 %v8668_v55 }
 0x531   : >> { %3299 = vmatpush.msra.mxu0 %v2477_v42  ;;  %3385 = vmatpush.msrb.mxu2 %v2561_v34  ;;  %v2474_v14 = vsel %vm617_vm8, %v10361_v50, %v5356_v49  ;;  %v2525_v39 = vsel %vm617_vm8, %v10363_v17, %v5357_v58  ;;  %v10365_v42 = vld [vmem:[#allocation112_spill] sm:$0xff]  ;;  %v10366_v49 = vunpack.i.l.bf16 %v8783_v27  ;;  %v5371_v58 = vunpack.i.l.bf16 %v8973_v10 }
 0x532   : >> { %3263 = vmatpush.msrb.mxu3 %v10362_v47  ;;  %3340 = vmatpush.msrb.mxu1 %v2525_v39  ;;  %v2471_v15 = vsel %vm617_vm8, %v10364_v16, %v5361_v33  ;;  %v5372_v17 = vunpack.i.h.bf16 %v8973_v10  ;;  %v10367_v39 = vld [vmem:[#allocation121_spill] sm:$0xff]  ;;  %v9115_v33 = vpop.f32.mrf.mxu0 }
 0x533   : >> { %3300 = vmatpush.msra.mxu0 %v2474_v14  ;;  %v5365_v59 = vpop.permute.xlu1 %5364  ;;  %v2522_v3 = vsel %vm617_vm8, %v10366_v49, %v5362_v22  ;;  %v10368_v22 = vunpack.i.h.bf16 %v8668_v55  ;;  %v10370_v49 = vld [vmem:[#allocation122_spill] sm:$0xff]  ;;  %v10372_v55 = vld [vmem:[#allocation109_spill] sm:$0xff] }
 0x534   : >> { %3074 = vmatmul.f32.gmra.mxu2 %v9097_v19  ;;  %3264 = vmatpush.msrb.mxu3 %v10365_v42  ;;  %v5367_v50 = vunpack.i.h.bf16 %v5365_v59  ;;  %v5366_v14 = vunpack.i.l.bf16 %v5365_v59  ;;  %v10369_v42 = vunpack.i.h.bf16 %v8783_v27  ;;  %v10373_v27 = vunpack.i.l.bf16 %v8842_v35 }
 0x535   : >> { %3301 = vmatpush.msra.mxu0 %v2471_v15  ;;  %v5375_v47 = vpop.permute.xlu0 %5374  ;;  %3341 = vmatpush.msrb.mxu1 %v2522_v3  ;;  %v10371_v3 = vunpack.i.l.bf16 %v8722_v54 }
 0x536   : >> { %3265 = vmatpush.msrb.mxu3 %v10367_v39  ;;  %3755 = vmatmul.msk.f32.gmra.mxu1 %vm2778_vm14, %v8712_v30  ;;  %v5376_v16 = vunpack.i.l.bf16 %v5375_v47  ;;  %v2468_v15 = vsel %vm617_vm8, %v10368_v22, %v5366_v14  ;;  %v2519_v10 = vsel %vm617_vm8, %v10369_v42, %v5367_v50  ;;  %v5377_v59 = vunpack.i.h.bf16 %v5375_v47  ;;  %v9130_v30 = vpop.f32.mrf.mxu1  ;;  %v9137_v14 = vld [vmem:[%s7653_s24 + $0xa8] sm:$0xff] }
 0x537   : >> { %3753 = vmatmul.msk.f32.gmra.mxu3 %vm2778_vm14, %v9108_v24  ;;  %3302 = vmatpush.msra.mxu0 %v2468_v15  ;;  %v2465_v39 = vsel %vm617_vm8, %v10371_v3, %v5371_v58  ;;  %v2516_v50 = vsel %vm617_vm8, %v10373_v27, %v5372_v17  ;;  %v10374_v47 = vunpack.i.h.bf16 %v8722_v54  ;;  %v10375_v15 = vld [vmem:[#allocation115_spill] sm:$0xff]  ;;  %v10376_v42 = vunpack.i.h.bf16 %v8842_v35  ;;  %v10377_v27 = vld [vmem:[#allocation116_spill] sm:$0xff] }
 0x538   : >> { %3153 = vmatmul.f32.gmra.mxu0 %v8629_v6  ;;  %3266 = vmatpush.msrb.mxu3 %v10370_v49  ;;  %v5386_v49 = vunpack.i.l.bf16 %v9022_v26  ;;  %v10378_v35 = vunpack.i.h.bf16 %v8591_v0 }
 0x539   : >> { %3342 = vmatpush.msrb.mxu1 %v2519_v10  ;;  %3303 = vmatpush.msra.mxu0 %v2465_v39  ;;  %v2462_v22 = vsel %vm617_vm8, %v10374_v47, %v5376_v16  ;;  %v2513_v10 = vsel %vm617_vm8, %v10376_v42, %v5377_v59  ;;  %v10379_v59 = vunpack.i.l.bf16 %v8680_v5  ;;  %v10380_v47 = vld [vmem:[#allocation69_spill] sm:$0xff]  ;;  %v10382_v42 = vunpack.i.l.bf16 %v8852_v46 }
 0x53a   : >> { %3267 = vmatpush.msrb.mxu3 %v10372_v55  ;;  %v5387_v55 = vunpack.i.h.bf16 %v9022_v26 }
 0x53b   : >> { %3343 = vmatpush.msrb.mxu1 %v2516_v50  ;;  %v5380_v58 = vpop.permute.xlu1 %5379  ;;  %3304 = vmatpush.msra.mxu0 %v2462_v22  ;;  %v5052_v22 = vunpack.i.h.bf16 %v10380_v47 }
 0x53c   : >> { %3077 = vmatmul.f32.gmra.mxu2 %v9137_v14  ;;  %3268 = vmatpush.msrb.mxu3 %v10375_v15  ;;  %v5382_v17 = vunpack.i.h.bf16 %v5380_v58  ;;  %v5381_v3 = vunpack.i.l.bf16 %v5380_v58  ;;  %v9161_v15 = vpop.f32.mrf.mxu0  ;;  %v10381_v58 = vunpack.i.h.bf16 %v8726_v38  ;;  %v2507_v5 = vsel %vm617_vm8, %v10382_v42, %v5387_v55  ;;  %v10386_v55 = vld [vmem:[#allocation102_spill] sm:$0xff] }
 0x53d   : >> { %v5390_v39 = vpop.permute.xlu0 %5389  ;;  %3344 = vmatpush.msrb.mxu1 %v2513_v10  ;;  %v10383_v10 = vld [vmem:[#allocation15_spill] sm:$0xff] }
 0x53e   : >> { %3269 = vmatpush.msrb.mxu3 %v10377_v27  ;;  %3756 = vmatmul.msk.f32.gmra.mxu1 %vm2778_vm14, %v8769_v37  ;;  %v5391_v54 = vunpack.i.l.bf16 %v5390_v39  ;;  %v2459_v16 = vsel %vm617_vm8, %v10378_v35, %v5381_v3  ;;  %v2510_v50 = vsel %vm617_vm8, %v10379_v59, %v5382_v17  ;;  %v5392_v26 = vunpack.i.h.bf16 %v5390_v39  ;;  %v9171_v3 = vld [vmem:[%s7653_s24 + $0xd0] sm:$0xff]  ;;  %v9177_v27 = vpop.f32.mrf.mxu1 }
 0x53f   : >> { %3106 = vmatmul.f32.vlgmr.msra.gmra.mxu3 %v8517_v45  ;;  %3305 = vmatpush.msra.mxu0 %v2459_v16  ;;  %v2456_v0 = vsel %vm617_vm8, %v10381_v58, %v5386_v49  ;;  %v5042_v17 = vunpack.i.h.bf16 %v10383_v10  ;;  %v10385_v49 = vunpack.i.l.bf16 %v8900_v29  ;;  %v5032_v16 = vunpack.i.h.bf16 %v10386_v55 }
 0x540   : >> { %3156 = vmatmul.f32.gmra.mxu0 %v8678_v8  ;;  %3830 = vmatpush.msra.mxu3 %v2561_v34  ;;  %v10384_v34 = vunpack.i.h.bf16 %v8781_v43 }
 0x541   : >> { %3345 = vmatpush.msrb.mxu1 %v2510_v50  ;;  %3306 = vmatpush.msra.mxu0 %v2456_v0  ;;  %v2504_v35 = vsel %vm617_vm8, %v10385_v49, %v5392_v26  ;;  %v10387_v0 = vunpack.i.l.bf16 %v10380_v47  ;;  %v10388_v26 = vunpack.i.l.bf16 %v10383_v10 }
 0x542   : >> { %v2453_v39 = vsel %vm617_vm8, %v10384_v34, %v5391_v54  ;;  %v5401_v54 = vunpack.i.l.bf16 %v9067_v12  ;;  %v10389_v34 = vunpack.i.l.bf16 %v8738_v25 }
 0x543   : >> { %3346 = vmatpush.msrb.mxu1 %v2507_v5  ;;  %v5395_v38 = vpop.permute.xlu1 %5394  ;;  %3307 = vmatpush.msra.mxu0 %v2453_v39  ;;  %v2450_v43 = vsel %vm617_vm8, %v10387_v0, %v5052_v22  ;;  %v2447_v5 = vsel %vm617_vm8, %v10388_v26, %v5042_v17  ;;  %v10390_v22 = vunpack.i.h.bf16 %v8852_v46  ;;  %v10392_v17 = vunpack.i.l.bf16 %v8912_v20  ;;  %v5415_v0 = vpop.permute.xlu2 %5414 }
 0x544   : >> { %3080 = vmatmul.f32.gmra.mxu2 %v9171_v3  ;;  %v5397_v59 = vunpack.i.h.bf16 %v5395_v38  ;;  %v5396_v50 = vunpack.i.l.bf16 %v5395_v38  ;;  %v10391_v38 = vunpack.i.l.bf16 %v10386_v55  ;;  %v10393_v46 = vunpack.i.l.bf16 %v8959_v7 }
 0x545   : >> { %v5405_v58 = vpop.permute.xlu0 %5404  ;;  %3347 = vmatpush.msrb.mxu1 %v2504_v35  ;;  %3308 = vmatpush.msra.mxu0 %v2450_v43  ;;  %v9206_v35 = vpop.f32.mrf.mxu0 }
 0x546   : >> { %v5407_v42 = vunpack.i.h.bf16 %v5405_v58  ;;  %3757 = vmatmul.msk.f32.gmra.mxu1 %vm2778_vm14, %v8824_v36  ;;  %v2501_v47 = vsel %vm617_vm8, %v10389_v34, %v5396_v50  ;;  %v5406_v12 = vunpack.i.l.bf16 %v5405_v58  ;;  %v2444_v10 = vsel %vm617_vm8, %v10391_v38, %v5032_v16  ;;  %v9209_v50 = vld [vmem:[%s7653_s24 + $0xf8] sm:$0xff]  ;;  %v9218_v26 = vpop.f32.mrf.mxu1 }
 0x547   : >> { %3109 = vmatmul.f32.gmra.mxu3 %v8566_v9  ;;  %3309 = vmatpush.msra.mxu0 %v2447_v5  ;;  %v2498_v49 = vsel %vm617_vm8, %v10392_v17, %v5397_v59  ;;  %v2495_v58 = vsel %vm617_vm8, %v10393_v46, %v5401_v54  ;;  %v5416_v5 = vunpack.i.l.bf16 %v5415_v0  ;;  %v10395_v34 = vunpack.i.h.bf16 %v8900_v29 }
 0x548   : >> { %3159 = vmatmul.f32.gmra.mxu0 %v8734_v2  ;;  %3348 = vmatpush.msrb.mxu1 %v2501_v47  ;;  %v2558_v39 = vsel %vm617_vm8, %v10390_v22, %v5407_v42  ;;  %v10394_v42 = vunpack.i.l.bf16 %v8790_v51  ;;  %v5417_v22 = vunpack.i.h.bf16 %v5415_v0  ;;  %v10397_v29 = vunpack.i.h.bf16 %v8912_v20 }
 0x549   : >> { %3386 = vmatpush.msrb.mxu2 %v2558_v39  ;;  %3831 = vmatpush.msra.mxu3 %v2558_v39  ;;  %v10396_v39 = vunpack.i.h.bf16 %v8738_v25  ;;  %v10398_v25 = vunpack.i.h.bf16 %v8959_v7  ;;  %v10399_v0 = vunpack.i.h.bf16 %v8790_v51  ;;  %v10400_v7 = vunpack.i.l.bf16 %v8971_v41 }
 0x54a   : >> { %3310 = vmatpush.msra.mxu0 %v2444_v10  ;;  %3349 = vmatpush.msrb.mxu1 %v2498_v49  ;;  %v2492_v59 = vsel %vm617_vm8, %v10394_v42, %v5406_v12  ;;  %v9231_v10 = vld [vmem:[%s7653_s24 + $0x120] sm:$0xff]  ;;  %v2549_v17 = vsel %vm617_vm8, %v10397_v29, %v5416_v5  ;;  %v5440_v5 = vld [vmem:[%s7653_s24 + $0x28] sm:$0xff] }
 0x54b   : >> { %v5410_v55 = vpop.permute.xlu1 %5409  ;;  %v2546_v46 = vsel %vm617_vm8, %v10398_v25, %v5417_v22  ;;  %v10401_v22 = vld [vmem:[#allocation12_spill] sm:$0xff] }
 0x54c   : >> { %3083 = vmatmul.f32.gmra.mxu2 %v9209_v50  ;;  %3350 = vmatpush.msrb.mxu1 %v2495_v58  ;;  %v5412_v16 = vunpack.i.h.bf16 %v5410_v55  ;;  %v5411_v43 = vunpack.i.l.bf16 %v5410_v55 }
 0x54d   : >> { %v5420_v47 = vpop.permute.xlu0 %5419  ;;  %v9240_v58 = vpop.f32.mrf.mxu0 }
 0x54e   : >> { %3351 = vmatpush.msrb.mxu1 %v2492_v59  ;;  %v2555_v54 = vsel %vm617_vm8, %v10395_v34, %v5411_v43  ;;  %v2552_v12 = vsel %vm617_vm8, %v10396_v39, %v5412_v16  ;;  %v5421_v38 = vunpack.i.l.bf16 %v5420_v47  ;;  %v5422_v49 = vunpack.i.h.bf16 %v5420_v47  ;;  %v9248_v55 = vpop.f32.mrf.mxu1  ;;  %v5439_v43 = vld [vmem:[%s7653_s24] sm:$0xff] }
 0x54f   : >> { %3112 = vmatmul.f32.gmra.mxu3 %v8603_v28  ;;  %3758 = vmatmul.msk.f32.gmra.mxu1 %vm2778_vm14, %v8967_v62  ;;  %v2821_v39 = vadd.f32 %v8862_v31, %v10401_v22 }
 0x550   : >> { %3387 = vmatpush.msrb.mxu2 %v2555_v54  ;;  %3832 = vmatpush.msra.mxu3 %v2555_v54  ;;  %v2543_v20 = vsel %vm617_vm8, %v10399_v0, %v5421_v38  ;;  %v2540_v16 = vsel %vm617_vm8, %v10400_v7, %v5422_v49  ;;  %v3442_v54 = vld [vmem:[%s9491_s7] sm:$0x7]  ;;  %v10402_v38 = vmov 0  }
 0x551   : >> { %3162 = vmatmul.f32.gmra.mxu0 %v8786_v32  ;;  %vm3443_vm15 = vcmp.gt.f32.partialorder %v3442_v54, 0.5  ;;  %v10403_v7 = vld [vmem:[#allocation89_spill] sm:$0xff] }
 0x552   : >> { %3388 = vmatpush.msrb.mxu2 %v2552_v12  ;;  %3833 = vmatpush.msra.mxu3 %v2552_v12  ;;  %v9272_v29 = vsel %vm3443_vm15, 1, %v10402_v38 }
 0x553   : >> { %v3445_v0 = vperm.slane %v9272_v29, 0 }
 0x554   : >> { %3086 = vmatmul.f32.gmra.mxu2 %v9231_v10  ;;  %3834 = vmatpush.msra.mxu3 %v2549_v17 }
 0x555   : >> { %3389 = vmatpush.msrb.mxu2 %v2549_v17  ;;  %v2861_v42 = vpop.f32.mrf.mxu0  ;;  %vm9282_vm9 = vcmp.eq.s32.totalorder %v3445_v0, 1 }
 0x556   : >> { %3835 = vmatpush.msra.mxu3 %v2546_v46  ;;  %v9259_v59 = vpop.f32.mrf.mxu1  ;;  %v2862_v17 = vadd.f32 %v2861_v42, %v2821_v39 }
 0x557   : >> { %3390 = vmatpush.msrb.mxu2 %v2546_v46  ;;  %3115 = vmatmul.f32.gmra.mxu3 %v8640_v57 }
 0x558   : >> { %3759 = vmatmul.msk.f32.gmra.mxu1 %vm2778_vm14, %v9019_v21  ;;  %3836 = vmatpush.msra.mxu3 %v2543_v20 }
 0x559   : >> { %3391 = vmatpush.msrb.mxu2 %v2543_v20  ;;  %3165 = vmatmul.f32.gmra.mxu0 %v8850_v4 }
 0x55a   : >> { %3837 = vmatpush.msra.mxu3 %v2540_v16 }
 0x55b   : >> { %3392 = vmatpush.msrb.mxu2 %v2540_v16  ;;  %v2902_v51 = vpop.f32.mrf.mxu2 }
 0x55c   : >> { %3229 = vmatmul.f32.vlgmr.msra.gmra.mxu2 %v5439_v43  ;;  %v2903_v46 = vadd.f32 %v2902_v51, %v2862_v17 }
 0x55d   : >> { %v2864_v47 = vpop.f32.mrf.mxu0 }
 0x55e   : >> { %v9275_v49 = vpop.f32.mrf.mxu1 }
 0x55f   : >> { %3118 = vmatmul.f32.gmra.mxu3 %v8697_v23  ;;  %v2943_v41 = vpop.f32.mrf.mxu3 }
 0x560   : >> { %3760 = vmatmul.msk.f32.gmra.mxu1 %vm2778_vm14, %v9064_v40  ;;  %v2944_v20 = vadd.f32 %v2943_v41, %v2903_v46 }
 0x561   : >> { %3168 = vmatmul.f32.gmra.mxu0 %v8908_v11 }
 0x563   : >> { %v2905_v34 = vpop.f32.mrf.mxu2 }
 0x564   : >> { %3232 = vmatmul.f32.gmra.mxu2 %v5440_v5  ;;  %v10407_v5 = vld [vmem:[#allocation57_spill] sm:$0xff] }
 0x566   : >> { %v9291_v39 = vpop.f32.mrf.mxu1 }
 0x567   : >> { %3121 = vmatmul.f32.gmra.mxu3 %v8755_v48  ;;  %v2946_v12 = vpop.f32.mrf.mxu3 }
 0x568   : >> { %3761 = vmatmul.msk.f32.gmra.mxu1 %vm2778_vm14, %v9108_v24 }
 0x569   : >> { %3311 = vmatmul.f32.vlgmr.msra.gmra.mxu0 %v8517_v45 }
 0x56b   : >> { %v2908_v25 = vpop.f32.mrf.mxu2 }
 0x56c   : >> { %3235 = vmatmul.f32.gmra.mxu2 %v8533_v13  ;;  %v10406_v13 = vld [vmem:[#allocation106_spill] sm:$0xff] }
 0x56d   : >> { %v2824_v43 = vadd.f32 %v8930_v52, %v10406_v13  ;;  %v3029_v16 = vadd.f32 %v9275_v49, %v10406_v13 }
 0x56f   : >> { %3124 = vmatmul.f32.gmra.mxu3 %v10403_v7  ;;  %v2984_v45 = vpop.f32.mrf.mxu0  ;;  %v2949_v51 = vpop.f32.mrf.mxu3  ;;  %v2865_v41 = vadd.f32 %v2864_v47, %v2824_v43  ;;  %v10408_v47 = vld [vmem:[#allocation23_spill] sm:$0xff] }
 0x570   : >> { %3352 = vmatmul.f32.vlgmr.msrb.gmra.mxu1 %v8554_v61  ;;  %v2985_v31 = vadd.f32 %v2984_v45, %v2944_v20  ;;  %v2827_v17 = vadd.f32 %v8997_v63, %v10408_v47  ;;  %v10409_v20 = vld [vmem:[#allocation56_spill] sm:$0xff] }
 0x571   : >> { %3314 = vmatmul.f32.gmra.mxu0 %v8566_v9  ;;  %v2906_v38 = vadd.f32 %v2905_v34, %v2865_v41  ;;  %v10411_v41 = vld [vmem:[#allocation20_spill] sm:$0xff] }
 0x572   : >> { %v3418_v42 = vmax.f32 %v2985_v31, 0.0  ;;  %v2868_v34 = vadd.f32 %v9030_v56, %v2827_v17 }
 0x573   : >> { %v2911_v54 = vpop.f32.mrf.mxu2  ;;  %v2947_v9 = vadd.f32 %v2946_v12, %v2906_v38  ;;  %v10410_v12 = vld [vmem:[#allocation11_spill] sm:$0xff] }
 0x574   : >> { %3238 = vmatmul.f32.gmra.mxu2 %v10407_v5  ;;  %v3451_v61 = vsel %vm9282_vm9, %v3418_v42, 0.0  ;;  %v2909_v43 = vadd.f32 %v2908_v25, %v2868_v34  ;;  %v2830_v56 = vadd.f32 %v9057_v1, %v10410_v12 }
 0x575   : >> { %3478 = vst [vmem:[%s9293_s26 + $0x8] sm:$0xff] %v3451_v61 }
 0x576   : >> { %v2871_v61 = vadd.f32 %v9083_v60, %v2830_v56  ;;  %v10417_v56 = vld [vmem:[#allocation18_spill] sm:$0xff] }
 0x577   : >> { %3127 = vmatmul.f32.gmra.mxu3 %v8886_v44  ;;  %v2987_v52 = vpop.f32.mrf.mxu0  ;;  %v2952_v46 = vpop.f32.mrf.mxu3 }
 0x578   : >> { %3355 = vmatmul.f32.gmra.mxu1 %v8594_v18  ;;  %v2988_v0 = vadd.f32 %v2987_v52, %v2947_v9  ;;  %v9308_v18 = vpop.f32.mrf.mxu1 }
 0x579   : >> { %3317 = vmatmul.f32.gmra.mxu0 %v8603_v28  ;;  %v2950_v28 = vadd.f32 %v2949_v51, %v2909_v43  ;;  %v10412_v51 = vld [vmem:[#allocation80_spill] sm:$0xff] }
 0x57a   : >> { %v3421_v45 = vmax.f32 %v2988_v0, 0.0  ;;  %v10413_v0 = vld [vmem:[#allocation96_spill] sm:$0xff] }
 0x57b   : >> { %v2914_v31 = vpop.f32.mrf.mxu2 }
 0x57c   : >> { %3241 = vmatmul.f32.gmra.mxu2 %v10409_v20  ;;  %v3454_v42 = vsel %vm9282_vm9, %v3421_v45, 0.0  ;;  %v10414_v45 = vld [vmem:[#allocation93_spill] sm:$0xff] }
 0x57d   : >> { %3481 = vst [vmem:[%s9293_s26 + $0x30] sm:$0xff] %v3454_v42 }
 0x57f   : >> { %3270 = vmatmul.f32.vlgmr.msrb.gmra.mxu3 %v8951_v53  ;;  %v2990_v63 = vpop.f32.mrf.mxu0  ;;  %v2912_v53 = vadd.f32 %v2911_v54, %v2871_v61 }
 0x580   : >> { %3358 = vmatmul.f32.gmra.mxu1 %v8629_v6  ;;  %v2955_v5 = vpop.f32.mrf.mxu3  ;;  %v2991_v25 = vadd.f32 %v2990_v63, %v2950_v28  ;;  %v9321_v52 = vpop.f32.mrf.mxu1  ;;  %v10416_v28 = vld [vmem:[#allocation14_spill] sm:$0xff] }
 0x581   : >> { %3320 = vmatmul.f32.gmra.mxu0 %v8640_v57  ;;  %v2953_v57 = vadd.f32 %v2952_v46, %v2912_v53  ;;  %v2833_v63 = vadd.f32 %v9115_v33, %v10416_v28 }
 0x582   : >> { %v3424_v38 = vmax.f32 %v2991_v25, 0.0 }
 0x583   : >> { %v2917_v9 = vpop.f32.mrf.mxu2 }
 0x584   : >> { %3244 = vmatmul.f32.gmra.mxu2 %v10411_v41  ;;  %v3457_v6 = vsel %vm9282_vm9, %v3424_v38, 0.0  ;;  %v10419_v38 = vld [vmem:[#allocation97_spill] sm:$0xff] }
 0x585   : >> { %3484 = vst [vmem:[%s9293_s26 + $0x58] sm:$0xff] %v3457_v6 }
 0x587   : >> { %3273 = vmatmul.f32.gmra.mxu3 %v10412_v51  ;;  %v2993_v1 = vpop.f32.mrf.mxu0 }
 0x588   : >> { %3361 = vmatmul.f32.gmra.mxu1 %v8678_v8  ;;  %v2958_v17 = vpop.f32.mrf.mxu3  ;;  %v2994_v60 = vadd.f32 %v2993_v1, %v2953_v57  ;;  %v9331_v46 = vpop.f32.mrf.mxu1 }
 0x589   : >> { %3323 = vmatmul.f32.gmra.mxu0 %v8697_v23  ;;  %v10415_v23 = vld [vmem:[#allocation88_spill] sm:$0xff] }
 0x58a   : >> { %v3427_v20 = vmax.f32 %v2994_v60, 0.0 }
 0x58b   : >> { %v2920_v54 = vpop.f32.mrf.mxu2 }
 0x58c   : >> { %3247 = vmatmul.f32.gmra.mxu2 %v10413_v0  ;;  %v3460_v34 = vsel %vm9282_vm9, %v3427_v20, 0.0  ;;  %v10421_v20 = vld [vmem:[#allocation27_spill] sm:$0xff] }
 0x58d   : >> { %3487 = vst [vmem:[%s9293_s26 + $0x80] sm:$0xff] %v3460_v34  ;;  %v2842_v34 = vadd.f32 %v9240_v58, %v10421_v20 }
 0x58f   : >> { %3276 = vmatmul.f32.gmra.mxu3 %v10414_v45 }
 0x590   : >> { %3364 = vmatmul.f32.gmra.mxu1 %v8734_v2  ;;  %v2961_v8 = vpop.f32.mrf.mxu3  ;;  %v9341_v2 = vpop.f32.mrf.mxu1 }
 0x591   : >> { %3326 = vmatmul.f32.gmra.mxu0 %v8755_v48  ;;  %v2874_v48 = vadd.f32 %v9130_v30, %v2833_v63 }
 0x593   : >> { %v2915_v41 = vadd.f32 %v2914_v31, %v2874_v48 }
 0x594   : >> { %3250 = vmatmul.f32.gmra.mxu2 %v10415_v23 }
 0x597   : >> { %v2923_v43 = vpop.f32.mrf.mxu2  ;;  %3279 = vmatmul.f32.gmra.mxu3 %v9097_v19 }
 0x598   : >> { %3367 = vmatmul.f32.gmra.mxu1 %v8786_v32  ;;  %v2956_v32 = vadd.f32 %v2955_v5, %v2915_v41  ;;  %v10420_v5 = vld [vmem:[#allocation17_spill] sm:$0xff]  ;;  %v3026_v41 = vadd.f32 %v9259_v59, %v10401_v22 }
 0x599   : >> { %3329 = vmatmul.f32.gmra.mxu0 %v10403_v7  ;;  %v2964_v42 = vpop.f32.mrf.mxu3  ;;  %v10418_v7 = vld [vmem:[#allocation24_spill] sm:$0xff]  ;;  %v2839_v51 = vadd.f32 %v9206_v35, %v10420_v5 }
 0x59a   : >> { %v2836_v33 = vadd.f32 %v9161_v15, %v10418_v7 }
 0x59b   : >> { %v2880_v57 = vadd.f32 %v9218_v26, %v2839_v51  ;;  %v2883_v26 = vadd.f32 %v9248_v55, %v2842_v34 }
 0x59c   : >> { %3762 = vmatmul.msk.f32.vlgmr.msrb.gmra.mxu2 %vm2778_vm14, %v10417_v56  ;;  %v2877_v30 = vadd.f32 %v9177_v27, %v2836_v33 }
 0x59d   : >> { %v2921_v60 = vadd.f32 %v2920_v54, %v2880_v57  ;;  %v2924_v63 = vadd.f32 %v2923_v43, %v2883_v26 }
 0x59e   : >> { %v2918_v6 = vadd.f32 %v2917_v9, %v2877_v30 }
 0x59f   : >> { %v3066_v25 = vpop.f32.mrf.mxu2  ;;  %3282 = vmatmul.f32.gmra.mxu3 %v9137_v14  ;;  %v2962_v0 = vadd.f32 %v2961_v8, %v2921_v60  ;;  %v2965_v8 = vadd.f32 %v2964_v42, %v2924_v63 }
 0x5a0   : >> { %3370 = vmatmul.f32.gmra.mxu1 %v8850_v4  ;;  %v9355_v4 = vpop.f32.mrf.mxu1  ;;  %v3067_v42 = vadd.f32 %v3066_v25, %v3026_v41 }
 0x5a1   : >> { %3332 = vmatmul.f32.gmra.mxu0 %v8886_v44  ;;  %v2996_v19 = vpop.f32.mrf.mxu3  ;;  %v2959_v44 = vadd.f32 %v2958_v17, %v2918_v6 }
 0x5a2   : >> { %v2997_v61 = vadd.f32 %v2996_v19, %v2956_v32 }
 0x5a4   : >> { %3763 = vmatmul.msk.f32.gmra.mxu2 %vm2778_vm14, %v10419_v38  ;;  %v3430_v53 = vmax.f32 %v2997_v61, 0.0 }
 0x5a5   : >> { %v3148_v9 = vpop.f32.mrf.mxu0 }
 0x5a6   : >> { %v3463_v14 = vsel %vm9282_vm9, %v3430_v53, 0.0 }
 0x5a7   : >> { %v3069_v31 = vpop.f32.mrf.mxu2  ;;  %3285 = vmatmul.f32.gmra.mxu3 %v9171_v3  ;;  %3490 = vst [vmem:[%s9293_s26 + $0xa8] sm:$0xff] %v3463_v14 }
 0x5a8   : >> { %3373 = vmatmul.f32.gmra.mxu1 %v8908_v11  ;;  %v3070_v25 = vadd.f32 %v3069_v31, %v3029_v16 }
 0x5a9   : >> { %v2999_v15 = vpop.f32.mrf.mxu3 }
 0x5aa   : >> { %v3000_v27 = vadd.f32 %v2999_v15, %v2959_v44 }
 0x5ab   : >> { %v3189_v17 = vpop.f32.mrf.mxu1 }
 0x5ac   : >> { %3764 = vmatmul.msk.f32.gmra.mxu2 %vm2778_vm14, %v8769_v37  ;;  %v3433_v1 = vmax.f32 %v3000_v27, 0.0 }
 0x5ad   : >> { %v3151_v23 = vpop.f32.mrf.mxu0 }
 0x5ae   : >> { %v3466_v11 = vsel %vm9282_vm9, %v3433_v1, 0.0 }
 0x5af   : >> { %v3072_v3 = vpop.f32.mrf.mxu2  ;;  %3288 = vmatmul.f32.gmra.mxu3 %v9209_v50  ;;  %3493 = vst [vmem:[%s9293_s26 + $0xd0] sm:$0xff] %v3466_v11 }
 0x5b1   : >> { %v3002_v35 = vpop.f32.mrf.mxu3 }
 0x5b2   : >> { %v3003_v37 = vadd.f32 %v3002_v35, %v2962_v0  ;;  %v3035_v0 = vadd.f32 %v9308_v18, %v10410_v12 }
 0x5b3   : >> { %v3192_v58 = vpop.f32.mrf.mxu1 }
 0x5b4   : >> { %3765 = vmatmul.msk.f32.gmra.mxu2 %vm2778_vm14, %v8824_v36  ;;  %v3436_v54 = vmax.f32 %v3003_v37, 0.0 }
 0x5b6   : >> { %v3469_v50 = vsel %vm9282_vm9, %v3436_v54, 0.0 }
 0x5b7   : >> { %v3075_v45 = vpop.f32.mrf.mxu2  ;;  %3291 = vmatmul.f32.gmra.mxu3 %v9231_v10  ;;  %3496 = vst [vmem:[%s9293_s26 + $0xf8] sm:$0xff] %v3469_v50  ;;  %v3154_v10 = vpop.f32.mrf.mxu0 }
 0x5b8   : >> { %v3076_v37 = vadd.f32 %v3075_v45, %v3035_v0 }
 0x5ba   : >> { %v3005_v56 = vpop.f32.mrf.mxu3 }
 0x5bb   : >> { %v3006_v48 = vadd.f32 %v3005_v56, %v2965_v8  ;;  %v3195_v33 = vpop.f32.mrf.mxu1  ;;  %v3038_v8 = vadd.f32 %v9321_v52, %v10416_v28 }
 0x5bc   : >> { %3766 = vmatmul.msk.f32.gmra.mxu2 %vm2778_vm14, %v8967_v62  ;;  %v3446_v62 = vperm.slane %v9272_v29, 1 }
 0x5bd   : >> { %v3439_v36 = vmax.f32 %v3006_v48, 0.0 }
 0x5be   : >> { %vm9392_vm10 = vcmp.eq.s32.totalorder %v3446_v62, 1 }
 0x5bf   : >> { %v3078_v55 = vpop.f32.mrf.mxu2  ;;  %v3472_v43 = vsel %vm9282_vm9, %v3439_v36, 0.0  ;;  %3768 = vmatmul.msk.f32.vlgmr.msra.gmra.mxu3 %vm2778_vm14, %v9064_v40  ;;  %v3157_v53 = vpop.f32.mrf.mxu0 }
 0x5c0   : >> { %3499 = vst [vmem:[%s9293_s26 + $0x120] sm:$0xff] %v3472_v43 }
 0x5c2   : >> { %v3107_v32 = vpop.f32.mrf.mxu3 }
 0x5c3   : >> { %v3108_v19 = vadd.f32 %v3107_v32, %v3067_v42  ;;  %v3198_v15 = vpop.f32.mrf.mxu1  ;;  %v3041_v42 = vadd.f32 %v9331_v46, %v10418_v7 }
 0x5c4   : >> { %3767 = vmatmul.msk.f32.gmra.mxu2 %vm2778_vm14, %v9019_v21 }
 0x5c5   : >> { %v3149_v61 = vadd.f32 %v3148_v9, %v3108_v19 }
 0x5c7   : >> { %v3081_v59 = vpop.f32.mrf.mxu2  ;;  %v3190_v38 = vadd.f32 %v3189_v17, %v3149_v61  ;;  %3769 = vmatmul.msk.f32.gmra.mxu3 %vm2778_vm14, %v9108_v24  ;;  %v3032_v24 = vadd.f32 %v9291_v39, %v10408_v47  ;;  %v3160_v60 = vpop.f32.mrf.mxu0 }
 0x5c8   : >> { %v3082_v62 = vadd.f32 %v3081_v59, %v3041_v42 }
 0x5c9   : >> { %v3419_v30 = vmax.f32 %v3190_v38, 0.0  ;;  %v3073_v27 = vadd.f32 %v3072_v3, %v3032_v24 }
 0x5ca   : >> { %v3110_v21 = vpop.f32.mrf.mxu3 }
 0x5cb   : >> { %v3452_v6 = vsel %vm9392_vm10, %v3419_v30, 0.0  ;;  %v3111_v14 = vadd.f32 %v3110_v21, %v3070_v25  ;;  %v3044_v30 = vadd.f32 %v9341_v2, %v10420_v5 }
 0x5cc   : >> { %3479 = vst [vmem:[%s9293_s26 + $0x10] sm:$0xff] %v3452_v6  ;;  %v3201_v34 = vpop.f32.mrf.mxu1 }
 0x5cd   : >> { %v3152_v44 = vadd.f32 %v3151_v23, %v3111_v14 }
 0x5cf   : >> { %v3084_v49 = vpop.f32.mrf.mxu2  ;;  %v3193_v51 = vadd.f32 %v3192_v58, %v3152_v44  ;;  %v3163_v50 = vpop.f32.mrf.mxu0  ;;  %v3079_v58 = vadd.f32 %v3078_v55, %v3038_v8 }
 0x5d1   : >> { %v3422_v9 = vmax.f32 %v3193_v51, 0.0 }
 0x5d2   : >> { %v3113_v31 = vpop.f32.mrf.mxu3 }
 0x5d3   : >> { %v3455_v57 = vsel %vm9392_vm10, %v3422_v9, 0.0  ;;  %v3114_v1 = vadd.f32 %v3113_v31, %v3073_v27  ;;  %v3047_v27 = vadd.f32 %v9355_v4, %v10421_v20 }
 0x5d4   : >> { %3482 = vst [vmem:[%s9293_s26 + $0x38] sm:$0xff] %v3455_v57 }
 0x5d5   : >> { %v3155_v11 = vadd.f32 %v3154_v10, %v3114_v1  ;;  %v3204_v45 = vpop.f32.mrf.mxu1 }
 0x5d7   : >> { %v3087_v17 = vpop.f32.mrf.mxu2  ;;  %v3196_v35 = vadd.f32 %v3195_v33, %v3155_v11  ;;  %v3166_v19 = vpop.f32.mrf.mxu0 }
 0x5d8   : >> { %v3088_v2 = vadd.f32 %v3087_v17, %v3047_v27 }
 0x5d9   : >> { %v3425_v39 = vmax.f32 %v3196_v35, 0.0 }
 0x5da   : >> { %v3116_v3 = vpop.f32.mrf.mxu3 }
 0x5db   : >> { %v3458_v26 = vsel %vm9392_vm10, %v3425_v39, 0.0  ;;  %v3117_v54 = vadd.f32 %v3116_v3, %v3076_v37 }
 0x5dc   : >> { %3485 = vst [vmem:[%s9293_s26 + $0x60] sm:$0xff] %v3458_v26 }
 0x5dd   : >> { %v3158_v23 = vadd.f32 %v3157_v53, %v3117_v54  ;;  %v3207_v16 = vpop.f32.mrf.mxu1  ;;  %v3085_v53 = vadd.f32 %v3084_v49, %v3044_v30 }
 0x5df   : >> { %v3230_v63 = vpop.f32.mrf.mxu2  ;;  %v3199_v56 = vadd.f32 %v3198_v15, %v3158_v23  ;;  %v3169_v59 = vpop.f32.mrf.mxu0 }
 0x5e1   : >> { %v3428_v18 = vmax.f32 %v3199_v56, 0.0  ;;  %v3231_v56 = vadd.f32 %v3230_v63, %v10401_v22 }
 0x5e2   : >> { %v3119_v48 = vpop.f32.mrf.mxu3 }
 0x5e3   : >> { %v3461_v36 = vsel %vm9392_vm10, %v3428_v18, 0.0  ;;  %v3120_v41 = vadd.f32 %v3119_v48, %v3079_v58 }
 0x5e4   : >> { %3488 = vst [vmem:[%s9293_s26 + $0x88] sm:$0xff] %v3461_v36 }
 0x5e5   : >> { %v3161_v43 = vadd.f32 %v3160_v60, %v3120_v41  ;;  %v3210_v51 = vpop.f32.mrf.mxu1 }
 0x5e7   : >> { %v3233_v10 = vpop.f32.mrf.mxu2  ;;  %v3202_v32 = vadd.f32 %v3201_v34, %v3161_v43  ;;  %v3312_v60 = vpop.f32.mrf.mxu0  ;;  %v3447_v43 = vperm.slane %v9272_v29, 2 }
 0x5e8   : >> { %v3234_v40 = vadd.f32 %v3233_v10, %v10406_v13 }
 0x5e9   : >> { %v3431_v52 = vmax.f32 %v3202_v32, 0.0  ;;  %vm9435_vm11 = vcmp.eq.s32.totalorder %v3447_v43, 1 }
 0x5ea   : >> { %v3122_v55 = vpop.f32.mrf.mxu3 }
 0x5eb   : >> { %v3464_v33 = vsel %vm9392_vm10, %v3431_v52, 0.0  ;;  %v3123_v61 = vadd.f32 %v3122_v55, %v3082_v62 }
 0x5ec   : >> { %3491 = vst [vmem:[%s9293_s26 + $0xb0] sm:$0xff] %v3464_v33 }
 0x5ed   : >> { %v3164_v38 = vadd.f32 %v3163_v50, %v3123_v61  ;;  %v3353_v34 = vpop.f32.mrf.mxu1 }
 0x5ef   : >> { %v3236_v25 = vpop.f32.mrf.mxu2  ;;  %v3205_v21 = vadd.f32 %v3204_v45, %v3164_v38  ;;  %v3315_v17 = vpop.f32.mrf.mxu0 }
 0x5f0   : >> { %v3237_v61 = vadd.f32 %v3236_v25, %v10408_v47 }
 0x5f1   : >> { %v3434_v46 = vmax.f32 %v3205_v21, 0.0 }
 0x5f2   : >> { %v3125_v6 = vpop.f32.mrf.mxu3 }
 0x5f3   : >> { %v3467_v14 = vsel %vm9392_vm10, %v3434_v46, 0.0  ;;  %v3126_v44 = vadd.f32 %v3125_v6, %v3085_v53 }
 0x5f4   : >> { %3494 = vst [vmem:[%s9293_s26 + $0xd8] sm:$0xff] %v3467_v14 }
 0x5f5   : >> { %v3167_v15 = vadd.f32 %v3166_v19, %v3126_v44  ;;  %v3356_v54 = vpop.f32.mrf.mxu1 }
 0x5f7   : >> { %v3239_v24 = vpop.f32.mrf.mxu2  ;;  %v3208_v9 = vadd.f32 %v3207_v16, %v3167_v15  ;;  %v3318_v50 = vpop.f32.mrf.mxu0 }
 0x5f9   : >> { %v3437_v31 = vmax.f32 %v3208_v9, 0.0 }
 0x5fa   : >> { %v3128_v49 = vpop.f32.mrf.mxu3 }
 0x5fb   : >> { %v3470_v57 = vsel %vm9392_vm10, %v3437_v31, 0.0  ;;  %v3129_v1 = vadd.f32 %v3128_v49, %v3088_v2 }
 0x5fc   : >> { %3497 = vst [vmem:[%s9293_s26 + $0x100] sm:$0xff] %v3470_v57 }
 0x5fd   : >> { %v3170_v11 = vadd.f32 %v3169_v59, %v3129_v1  ;;  %v3359_v58 = vpop.f32.mrf.mxu1  ;;  %v3240_v59 = vadd.f32 %v3239_v24, %v10410_v12 }
 0x5ff   : >> { %v3242_v0 = vpop.f32.mrf.mxu2  ;;  %v3211_v35 = vadd.f32 %v3210_v51, %v3170_v11  ;;  %v3321_v41 = vpop.f32.mrf.mxu0 }
 0x600   : >> { %v3243_v49 = vadd.f32 %v3242_v0, %v10416_v28 }
 0x601   : >> { %v3440_v37 = vmax.f32 %v3211_v35, 0.0 }
 0x602   : >> { %v3271_v39 = vpop.f32.mrf.mxu3 }
 0x603   : >> { %v3473_v4 = vsel %vm9392_vm10, %v3440_v37, 0.0  ;;  %v3272_v18 = vadd.f32 %v3271_v39, %v3231_v56 }
 0x604   : >> { %3500 = vst [vmem:[%s9293_s26 + $0x128] sm:$0xff] %v3473_v4 }
 0x605   : >> { %v3313_v45 = vadd.f32 %v3312_v60, %v3272_v18  ;;  %v3362_v19 = vpop.f32.mrf.mxu1 }
 0x607   : >> { %v3245_v3 = vpop.f32.mrf.mxu2  ;;  %v3354_v42 = vadd.f32 %v3353_v34, %v3313_v45  ;;  %v3324_v29 = vpop.f32.mrf.mxu0 }
 0x60a   : >> { %v3274_v26 = vpop.f32.mrf.mxu3 }
 0x60b   : >> { %v3275_v32 = vadd.f32 %v3274_v26, %v3234_v40 }
 0x60d   : >> { %v3316_v22 = vadd.f32 %v3315_v17, %v3275_v32  ;;  %v3365_v21 = vpop.f32.mrf.mxu1  ;;  %v3246_v17 = vadd.f32 %v3245_v3, %v10418_v7 }
 0x60f   : >> { %v3248_v23 = vpop.f32.mrf.mxu2  ;;  %v3357_v10 = vadd.f32 %v3356_v54, %v3316_v22  ;;  %v3327_v44 = vpop.f32.mrf.mxu0 }
 0x610   : >> { %v3249_v60 = vadd.f32 %v3248_v23, %v10420_v5 }
 0x612   : >> { %v3277_v8 = vpop.f32.mrf.mxu3 }
 0x613   : >> { %v3278_v16 = vadd.f32 %v3277_v8, %v3237_v61 }
 0x615   : >> { %v3319_v53 = vadd.f32 %v3318_v50, %v3278_v16  ;;  %v3368_v2 = vpop.f32.mrf.mxu1 }
 0x617   : >> { %v3251_v48 = vpop.f32.mrf.mxu2  ;;  %v3360_v47 = vadd.f32 %v3359_v58, %v3319_v53  ;;  %v3330_v35 = vpop.f32.mrf.mxu0 }
 0x618   : >> { %v3252_v5 = vadd.f32 %v3251_v48, %v10421_v20 }
 0x61a   : >> { %v3280_v36 = vpop.f32.mrf.mxu3 }
 0x61b   : >> { %v3281_v25 = vadd.f32 %v3280_v36, %v3240_v59 }
 0x61d   : >> { %v3322_v27 = vadd.f32 %v3321_v41, %v3281_v25  ;;  %v3371_v0 = vpop.f32.mrf.mxu1 }
 0x61f   : >> { %v3394_v62 = vpop.f32.mrf.mxu2  ;;  %v3363_v12 = vadd.f32 %v3362_v19, %v3322_v27  ;;  %v3333_v36 = vpop.f32.mrf.mxu0 }
 0x620   : >> { %v3395_v52 = vadd.f32 %v3394_v62, %v3354_v42 }
 0x622   : >> { %v3420_v63 = vmax.f32 %v3395_v52, 0.0  ;;  %v3283_v33 = vpop.f32.mrf.mxu3 }
 0x623   : >> { %v3284_v24 = vadd.f32 %v3283_v33, %v3243_v49 }
 0x624   : >> { %v3453_v13 = vsel %vm9435_vm11, %v3420_v63, 0.0 }
 0x625   : >> { %3480 = vst [vmem:[%s9293_s26 + $0x18] sm:$0xff] %v3453_v13  ;;  %v3325_v34 = vadd.f32 %v3324_v29, %v3284_v24  ;;  %v3374_v32 = vpop.f32.mrf.mxu1 }
 0x627   : >> { %v3397_v38 = vpop.f32.mrf.mxu2  ;;  %v3366_v26 = vadd.f32 %v3365_v21, %v3325_v34 }
 0x628   : >> { %v3398_v30 = vadd.f32 %v3397_v38, %v3357_v10  ;;  %v10426_v38 = vmov (%p903_p8), 0  }
 0x629   : > { %5441 = vset.pattern.permute.xlu0 (%p903_p8), %v10426_v38 }
 0x62a   : >> { %v3423_v46 = vmax.f32 %v3398_v30, 0.0  ;;  %v3286_v6 = vpop.f32.mrf.mxu3 }
 0x62b   : >> { %v3287_v54 = vadd.f32 %v3286_v6, %v3246_v17 }
 0x62c   : >> { %v3456_v14 = vsel %vm9435_vm11, %v3423_v46, 0.0 }
 0x62d   : >> { %3483 = vst [vmem:[%s9293_s26 + $0x40] sm:$0xff] %v3456_v14  ;;  %v3328_v56 = vadd.f32 %v3327_v44, %v3287_v54 }
 0x62f   : >> { %v3400_v15 = vpop.f32.mrf.mxu2  ;;  %v3369_v40 = vadd.f32 %v3368_v2, %v3328_v56 }
 0x630   : >> { %v3401_v51 = vadd.f32 %v3400_v15, %v3360_v47 }
 0x632   : >> { %v3426_v9 = vmax.f32 %v3401_v51, 0.0  ;;  %v3289_v31 = vpop.f32.mrf.mxu3 }
 0x633   : >> { %v3290_v37 = vadd.f32 %v3289_v31, %v3249_v60 }
 0x634   : >> { %v3459_v57 = vsel %vm9435_vm11, %v3426_v9, 0.0  ;;  %v3528_v9 = vld [vmem:[%s9490_s6] sm:$0x7] (%p903_p8) }
 0x635   : >> { %3486 = vst [vmem:[%s9293_s26 + $0x68] sm:$0xff] %v3459_v57  ;;  %v3331_v50 = vadd.f32 %v3330_v35, %v3290_v37  ;;  %3531 = vperm.xlu0 (%p903_p8), %5441, %v3528_v9  }
 0x637   : >> { %v3403_v1 = vpop.f32.mrf.mxu2  ;;  %v3372_v58 = vadd.f32 %v3371_v0, %v3331_v50 }
 0x638   : >> { %v3404_v11 = vadd.f32 %v3403_v1, %v3363_v12  ;;  %v3527_v1 = vld [vmem:[#allocation7] sm:$0x7] (%p903_p8) }
 0x63a   : >> { %v3429_v39 = vmax.f32 %v3404_v11, 0.0  ;;  %v3292_v4 = vpop.f32.mrf.mxu3 }
 0x63b   : >> { %v3293_v18 = vadd.f32 %v3292_v4, %v3252_v5 }
 0x63c   : >> { %v3462_v28 = vsel %vm9435_vm11, %v3429_v39, 0.0 }
 0x63d   : >> { %3489 = vst [vmem:[%s9293_s26 + $0x90] sm:$0xff] %v3462_v28  ;;  %v3334_v43 = vadd.f32 %v3333_v36, %v3293_v18 }
 0x63f   : >> { %v3406_v8 = vpop.f32.mrf.mxu2  ;;  %v3375_v62 = vadd.f32 %v3374_v32, %v3334_v43 }
 0x640   : >> { %v3407_v23 = vadd.f32 %v3406_v8, %v3366_v26 }
 0x642   : >> { %v3432_v45 = vmax.f32 %v3407_v23, 0.0  ;;  %v3412_v7 = vpop.f32.mrf.mxu3 }
 0x643   : >> { %v3413_v41 = vadd.f32 %v3412_v7, %v3372_v58 }
 0x644   : >> { %v3465_v3 = vsel %vm9435_vm11, %v3432_v45, 0.0 }
 0x645   : >> { %3492 = vst [vmem:[%s9293_s26 + $0xb8] sm:$0xff] %v3465_v3  ;;  %v3438_v42 = vmax.f32 %v3413_v41, 0.0 }
 0x647   : >> { %v3409_v20 = vpop.f32.mrf.mxu2  ;;  %v3471_v48 = vsel %vm9435_vm11, %v3438_v42, 0.0 }
 0x648   : >> { %v3410_v19 = vadd.f32 %v3409_v20, %v3369_v40  ;;  %3498 = vst [vmem:[%s9293_s26 + $0x108] sm:$0xff] %v3471_v48 }
 0x64a   : >> { %v3435_v52 = vmax.f32 %v3410_v19, 0.0  ;;  %v3415_v22 = vpop.f32.mrf.mxu3 }
 0x64b   : >> { %v3416_v33 = vadd.f32 %v3415_v22, %v3375_v62 }
 0x64c   : >> { %v3468_v63 = vsel %vm9435_vm11, %v3435_v52, 0.0  ;;  %905 = sbr.rel (!%p903_p8) target bundleno = 499 (0x1f3), region = 107 }
 0x64d   : >> { %3495 = vst [vmem:[%s9293_s26 + $0xe0] sm:$0xff] %v3468_v63  ;;  %v3441_v61 = vmax.f32 %v3416_v33, 0.0 }
 0x64f   : >> { %v3474_v13 = vsel %vm9435_vm11, %v3441_v61, 0.0 }
 0x650   : >> { %3501 = vst [vmem:[%s9293_s26 + $0x130] sm:$0xff] %v3474_v13 }
 0x657   : > { %v3526_v29 = vld [vmem:[#allocation2 + $0x270] sm:$0xff]  ;;  %v3525_v10 = vld [vmem:[#allocation2 + $0x268] sm:$0xff]  ;;  %v3524_v30 = vld [vmem:[#allocation2 + $0x260] sm:$0xff] }
 0x658   : > { %v3523_v16 = vld [vmem:[#allocation2 + $0x248] sm:$0xff]  ;;  %3586 = vmatpush.msra.mxu2 %v3526_v29  ;;  %3566 = vmatpush.msra.mxu1 %v3525_v10  ;;  %v3522_v21 = vld [vmem:[#allocation2 + $0x240] sm:$0xff]  ;;  %v3521_v55 = vld [vmem:[#allocation2 + $0x238] sm:$0xff] }
 0x659   : > { %3546 = vmatpush.msra.mxu0 %v3524_v30  ;;  %v3520_v53 = vld [vmem:[#allocation2 + $0x220] sm:$0xff]  ;;  %v3519_v46 = vld [vmem:[#allocation2 + $0x218] sm:$0xff]  ;;  %v3518_v6 = vld [vmem:[#allocation2 + $0x210] sm:$0xff] }
 0x65a   : > { %3587 = vmatpush.msra.mxu2 %v3523_v16  ;;  %3567 = vmatpush.msra.mxu1 %v3522_v21  ;;  %v3517_v59 = vld [vmem:[#allocation2 + $0x1f8] sm:$0xff]  ;;  %v3516_v14 = vld [vmem:[#allocation2 + $0x1f0] sm:$0xff]  ;;  %v3515_v47 = vld [vmem:[#allocation2 + $0x1e8] sm:$0xff] }
 0x65b   : > { %3547 = vmatpush.msra.mxu0 %v3521_v55  ;;  %v3514_v25 = vld [vmem:[#allocation2 + $0x1d0] sm:$0xff]  ;;  %v3513_v44 = vld [vmem:[#allocation2 + $0x1c8] sm:$0xff]  ;;  %v3512_v15 = vld [vmem:[#allocation2 + $0x1c0] sm:$0xff] }
 0x65c   : > { %3588 = vmatpush.msra.mxu2 %v3520_v53  ;;  %3568 = vmatpush.msra.mxu1 %v3519_v46  ;;  %v3511_v51 = vld [vmem:[#allocation2 + $0x1a8] sm:$0xff]  ;;  %v3510_v27 = vld [vmem:[#allocation2 + $0x1a0] sm:$0xff]  ;;  %v3509_v2 = vld [vmem:[#allocation2 + $0x198] sm:$0xff] }
 0x65d   : > { %3548 = vmatpush.msra.mxu0 %v3518_v6  ;;  %v3508_v31 = vld [vmem:[#allocation2 + $0x180] sm:$0xff]  ;;  %v3507_v49 = vld [vmem:[#allocation2 + $0x178] sm:$0xff]  ;;  %v3506_v57 = vld [vmem:[#allocation2 + $0x170] sm:$0xff] }
 0x65e   : > { %3589 = vmatpush.msra.mxu2 %v3517_v59  ;;  %3569 = vmatpush.msra.mxu1 %v3516_v14  ;;  %v3505_v12 = vld [vmem:[#allocation2 + $0x158] sm:$0xff]  ;;  %v3504_v24 = vld [vmem:[#allocation2 + $0x150] sm:$0xff]  ;;  %v3503_v60 = vld [vmem:[#allocation2 + $0x148] sm:$0xff] }
 0x65f   : > { %3549 = vmatpush.msra.mxu0 %v3515_v47 }
 0x660   : > { %3590 = vmatpush.msra.mxu2 %v3514_v25  ;;  %3570 = vmatpush.msra.mxu1 %v3513_v44 }
 0x661   : > { %3550 = vmatpush.msra.mxu0 %v3512_v15 }
 0x662   : > { %3591 = vmatpush.msra.mxu2 %v3511_v51  ;;  %3571 = vmatpush.msra.mxu1 %v3510_v27 }
 0x663   : > { %3551 = vmatpush.msra.mxu0 %v3509_v2 }
 0x664   : > { %3592 = vmatpush.msra.mxu2 %v3508_v31  ;;  %3572 = vmatpush.msra.mxu1 %v3507_v49 }
 0x665   : > { %3552 = vmatpush.msra.mxu0 %v3506_v57 }
 0x666   : > { %3593 = vmatpush.msra.mxu2 %v3505_v12  ;;  %3573 = vmatpush.msra.mxu1 %v3504_v24 }
 0x667   : > { %3773 = vmatmul.msk.f32.vlgmr.msra.gmra.mxu2 %vm2778_vm14, %v3527_v1  ;;  %3772 = vmatmul.msk.f32.vlgmr.msra.gmra.mxu1 %vm2778_vm14, %v3527_v1 }
 0x668   : > { %3553 = vmatpush.msra.mxu0 %v3503_v60 }
 0x669   : > { %3771 = vmatmul.msk.f32.vlgmr.msra.gmra.mxu0 %vm2778_vm14, %v3527_v1 }
 0x6a7   : > { %v3532_v11 = vpop.permute.xlu0 %3531 }
 0x6e4   : > { %v3575_v35 = vpop.f32.mrf.mxu1 }
 0x6e5   : > { %v3576_v34 = vadd.f32 %v3575_v35, %v3532_v11 }
 0x6e6   : > { %v3555_v37 = vpop.f32.mrf.mxu0 }
 0x6e7   : > { %v3600_v39 = vrot.slane %v3576_v34, 4  ;;  %v3556_v4 = vadd.f32 %v3555_v37, %v3532_v11 }
 0x6e9   : > { %v3602_v17 = vsel %vm3601_vm0, %v3556_v4, %v3600_v39 }
 0x6ea   : > { %3604 = vst [vmem:[%s5687_s15] sm:$0x77] %v3602_v17  ;;  %v3595_v28 = vpop.f32.mrf.mxu2 }
 0x6eb   : > { %v3596_v0 = vadd.f32 %v3595_v28, %v3532_v11 }
 0x6ed   : > { %3605 = vst [vmem:[%s5687_s15 + $0x8] sm:$0x7] %v3596_v0 }
 0x6ee PF: > { %s20_s27 = sadd.s32 1, %s5550_s27  }
 0x6ef   : > { %p17_p9 = scmp.ge.s32.totalorder %s20_s27, 4  }
 0x6f1   :  { %19 = sbr.rel (!%p17_p9) target bundleno = 2 (0x2), region = 118 }
 0x6f6   :  { %3627 = vsyncpa [#allocation4], 1 }
 0x6f7   :  { %3629 = vsyncpa [#allocation4 + $0x1], 1 }
 0x6f8   :  { %3630 = vsyncpa [#allocation6], 1 }

</bundles_post_ra>
